<compile_context>
chip_gen: v7x
topology: tpu7x:2x2x1
jax: 0.10.0
libtpu: 0.0.40
codegen_flags: <defaults>
</compile_context>

<pallas_src>
import jax
import jax.numpy as jnp
from jax import lax
from jax.experimental import pallas as pl
from jax.experimental.pallas import tpu as pltpu

KSIZE = 7
PAD = KSIZE // 2
HALO_BH = 8          # height of the (sublane-aligned) halo row blocks


def _fused_sum_max(view, num_ch):
    """One pass over channels: running (sum, max) of (rows, W) planes in f32."""
    v0 = view[0].astype(jnp.float32)

    def body(c, carry):
        s, m = carry
        v = view[c].astype(jnp.float32)
        return s + v, jnp.maximum(m, v)

    return lax.fori_loop(1, num_ch, body, (v0, v0))


def _spatial_attention_kernel(w_ref, xc_ref, xt_ref, xb_ref, o_ref,
                              pad_ref, shift_ref):
    # w_ref    : (98,) f32 SMEM, layout [sum taps * (1/C) | max taps], row-major (dy,dx)
    # xc_ref   : (C, TH, W)  current row tile of x (model dtype)
    # xt_ref   : (C, 8,  W)  8-row block just above the tile (clamped at r == 0)
    # xb_ref   : (C, 8,  W)  8-row block just below the tile (clamped at r == R-1)
    # o_ref    : (C, TH, W)  output tile
    # pad_ref  : (2, TH+6, W+6) f32 VMEM  zero-padded [sum | max] stats planes
    # shift_ref: (14, TH+6, W)  f32 VMEM  lane-shifted copies (7 per stats plane)
    C, TH, W = xc_ref.shape
    r = pl.program_id(1)
    num_r = pl.num_programs(1)

    # ---- channel reduce: single fused pass producing sum & max planes ----
    tile_s, tile_m = _fused_sum_max(xc_ref, C)          # (TH, W)
    top_s8, top_m8 = _fused_sum_max(xt_ref, C)          # (8, W)
    bot_s8, bot_m8 = _fused_sum_max(xb_ref, C)          # (8, W)

    # Vertical zero padding of the stats map at the image boundary: mask the
    # halo contribution to 0 for the first / last row tile (matches the
    # reference's zero padding of the [avg, max] map).
    keep_t = (r > 0).astype(jnp.float32)
    keep_b = (r < num_r - 1).astype(jnp.float32)
    top_s = top_s8[HALO_BH - PAD:, :] * keep_t           # (PAD, W)
    top_m = top_m8[HALO_BH - PAD:, :] * keep_t
    bot_s = bot_s8[:PAD, :] * keep_b
    bot_m = bot_m8[:PAD, :] * keep_b

    # ---- assemble zero-padded stats planes in VMEM scratch ----
    pad_ref[...] = jnp.zeros_like(pad_ref)               # also zeroes lane borders
    pad_ref[0, 0:PAD, PAD:PAD + W] = top_s
    pad_ref[1, 0:PAD, PAD:PAD + W] = top_m
    pad_ref[0, PAD:PAD + TH, PAD:PAD + W] = tile_s
    pad_ref[1, PAD:PAD + TH, PAD:PAD + W] = tile_m
    pad_ref[0, PAD + TH:, PAD:PAD + W] = bot_s
    pad_ref[1, PAD + TH:, PAD:PAD + W] = bot_m

    # ---- hoist the lane (dx) shifts: 14 lane-offset reads instead of 98 ----
    for c in range(2):
        for dx in range(KSIZE):
            shift_ref[c * KSIZE + dx] = pad_ref[c, :, dx:dx + W]

    # ---- 7x7 conv as 98 sublane-addressed loads + FMAs, 4 accumulators ----
    zero = jnp.zeros((TH, W), jnp.float32)

    def dy_body(dy, accs):
        a0, a1, a2, a3 = accs
        for dx in range(KSIZE):                           # static, 7 iters
            w_s = w_ref[dy * KSIZE + dx]                  # sum-plane tap (pre-scaled 1/C)
            w_m = w_ref[KSIZE * KSIZE + dy * KSIZE + dx]  # max-plane tap
            s_sl = shift_ref[dx, pl.ds(dy, TH), :]
            m_sl = shift_ref[KSIZE + dx, pl.ds(dy, TH), :]
            if dx % 2 == 0:
                a0 = a0 + w_s * s_sl
                a2 = a2 + w_m * m_sl
            else:
                a1 = a1 + w_s * s_sl
                a3 = a3 + w_m * m_sl
        return a0, a1, a2, a3

    a0, a1, a2, a3 = lax.fori_loop(0, KSIZE, dy_body, (zero, zero, zero, zero),
                                   unroll=True)
    att = jax.nn.sigmoid((a0 + a1) + (a2 + a3))           # (TH, W) f32

    # ---- out = x * att, per channel, cast back to the model dtype ----
    def mul_body(c, carry):
        o_ref[c] = (xc_ref[c].astype(jnp.float32) * att).astype(o_ref.dtype)
        return carry

    lax.fori_loop(0, C, mul_body, 0)


def _ceil_to(v, m):
    return -(-v // m) * m


def spatial_attention(x, weight, *, tile_h=None):
    """x: (N, C, H, W), weight: (1, 2, 7, 7) f32 (Conv2d(2, 1, 7, bias=False))."""
    N, C, H, W = x.shape
    assert H % HALO_BH == 0, "H must be a multiple of 8 (8-row halo blocks)"
    # TODO(synk): support H not a multiple of 8 / ragged row tiles via a manual
    # halo DMA (memory_space=pl.ANY + make_async_copy) instead of halo blocks.

    if tile_h is None:
        tile_h = H
        if H > 128:
            for cand in range(128, HALO_BH - 1, -HALO_BH):
                if H % cand == 0:
                    tile_h = cand
                    break
    TH = int(tile_h)
    assert TH % HALO_BH == 0 and H % TH == 0 and TH >= HALO_BH
    R = H // TH                      # row tiles per image
    bpt = TH // HALO_BH              # 8-row blocks per tile
    nb8 = H // HALO_BH               # 8-row blocks per image

    # Fold the 1/C of the channel mean into the "avg" taps so the kernel only
    # accumulates a channel SUM. Layout: [sum taps | max taps], row-major
    # (dy, dx) -- keep in sync with the PyTorch (1, 2, 7, 7) weight layout.
    w2 = weight.astype(jnp.float32).reshape(2, KSIZE * KSIZE)
    w_flat = jnp.concatenate([w2[0] / jnp.float32(C), w2[1]])

    out_dtype = x.dtype
    itemsize = x.dtype.itemsize

    # VMEM budget: double-buffered in/out blocks + scratch, with layout padding.
    lane_w = _ceil_to(W, 128)
    lane_wp = _ceil_to(W + 2 * PAD, 128)
    sub_th = _ceil_to(TH, 8)
    sub_thp = _ceil_to(TH + 2 * PAD, 8)
    blk_cur = C * sub_th * lane_w * itemsize
    blk_halo = C * HALO_BH * lane_w * itemsize
    blk_out = C * sub_th * lane_w * itemsize
    scratch_b = (2 * sub_thp * lane_wp + 2 * KSIZE * sub_thp * lane_w) * 4
    vmem_limit = 2 * (blk_cur + 2 * blk_halo + blk_out) + scratch_b + (2 << 20)
    vmem_limit = int(max(16 << 20, min(vmem_limit, 64 << 20)))

    cost = pl.CostEstimate(
        flops=int(N * H * W * (3 * C + 4 * KSIZE * KSIZE + 2)),
        transcendentals=int(N * H * W),
        bytes_accessed=int(N * C * W * itemsize * (2 * H + 2 * HALO_BH * R)),
    )

    return pl.pallas_call(
        _spatial_attention_kernel,
        out_shape=jax.ShapeDtypeStruct((N, C, H, W), out_dtype),
        grid=(N, R),
        in_specs=[
            pl.BlockSpec(memory_space=pltpu.MemorySpace.SMEM),              # conv weights
            pl.BlockSpec((None, C, TH, W), lambda n, r: (n, 0, r, 0)),      # current tile
            pl.BlockSpec((None, C, HALO_BH, W),                             # top halo block
                         lambda n, r: (n, 0, jnp.maximum(r * bpt - 1, 0), 0)),
            pl.BlockSpec((None, C, HALO_BH, W),                             # bottom halo block
                         lambda n, r: (n, 0, jnp.minimum((r + 1) * bpt, nb8 - 1), 0)),
        ],
        out_specs=pl.BlockSpec((None, C, TH, W), lambda n, r: (n, 0, r, 0)),
        scratch_shapes=[
            pltpu.VMEM((2, TH + 2 * PAD, W + 2 * PAD), jnp.float32),   # padded stats
            pltpu.VMEM((2 * KSIZE, TH + 2 * PAD, W), jnp.float32),     # lane-shifted stats
        ],
        compiler_params=pltpu.CompilerParams(
            dimension_semantics=("parallel", "parallel"),
            vmem_limit_bytes=vmem_limit),
        cost_estimate=cost,
    )(w_flat, x, x, x)


# ----------------------------- reference (pure JAX) -----------------------------

def spatial_attention_ref(x, weight):
    avg = jnp.mean(x, axis=1, keepdims=True)
    mx = jnp.max(x, axis=1, keepdims=True)
    stats = jnp.concatenate([avg, mx], axis=1)                 # (N, 2, H, W)
    sp = jnp.pad(stats, ((0, 0), (0, 0), (PAD, PAD), (PAD, PAD)))
    N, C, H, W = x.shape
    att = jnp.zeros((N, 1, H, W), jnp.float32)
    for c in range(2):
        for dy in range(KSIZE):
            for dx in range(KSIZE):
                att = att + weight[0, c, dy, dx] * sp[:, c:c + 1, dy:dy + H, dx:dx + W]
    return x * jax.nn.sigmoid(att)


# ----------------------------- main -----------------------------

if __name__ == "__main__":
    N, C, H, W = 2, 4, 16, 16

    key = jax.random.PRNGKey(0)
    kx, kw = jax.random.split(key)
    x = jax.random.normal(kx, (N, C, H, W), jnp.float32)
    fan_in = float(2 * KSIZE * KSIZE)
    weight = jax.random.normal(kw, (1, 2, KSIZE, KSIZE), jnp.float32) / jnp.sqrt(fan_in)

    ref = spatial_attention_ref(x, weight)

    # Multi-row-tile path (tile_h=8 -> 2 row tiles per image; exercises halos).
    fwd_tiled = jax.jit(lambda a, w: spatial_attention(a, w, tile_h=8))
    out_tiled = jax.block_until_ready(fwd_tiled(x, weight))
    assert out_tiled.shape == (N, C, H, W)
    assert out_tiled.dtype == jnp.float32
    assert jnp.allclose(out_tiled, ref, atol=1e-4, rtol=1e-4), \
        float(jnp.max(jnp.abs(out_tiled - ref)))

    # Single-tile path (tile_h defaults to H).
    fwd_full = jax.jit(lambda a, w: spatial_attention(a, w))
    out_full = jax.block_until_ready(fwd_full(x, weight))
    assert jnp.allclose(out_full, ref, atol=1e-4, rtol=1e-4), \
        float(jnp.max(jnp.abs(out_full - ref)))

    # bf16 I/O path (f32 accumulation in-kernel, bf16 HBM read + store).
    xb = x.astype(jnp.bfloat16)
    outb = jax.block_until_ready(fwd_tiled(xb, weight))
    refb = spatial_attention_ref(xb.astype(jnp.float32), weight)
    assert outb.dtype == jnp.bfloat16
    assert jnp.allclose(outb.astype(jnp.float32), refb, atol=5e-2, rtol=5e-2)

    print("KERNEL_OK")
</pallas_src>

<mosaic_0001>
module attributes {stable_mosaic.version = 11 : i64} {
  func.func @_spatial_attention_kernel(%arg0: i32, %arg1: i32, %arg2: memref<98xf32, #tpu.memory_space<smem>>, %arg3: memref<1x4x8x16xf32, #tpu.memory_space<vmem>>, %arg4: memref<1x4x8x16xf32, #tpu.memory_space<vmem>>, %arg5: memref<1x4x8x16xf32, #tpu.memory_space<vmem>>, %arg6: memref<1x4x8x16xf32, #tpu.memory_space<vmem>>, %arg7: memref<2x14x22xf32, #tpu.memory_space<vmem>>, %arg8: memref<14x14x16xf32, #tpu.memory_space<vmem>>) attributes {dimension_semantics = [#tpu.dimension_semantics<parallel>, #tpu.dimension_semantics<parallel>], iteration_bounds = array<i64: 2, 2>, scalar_prefetch = 0 : i64, scratch_operands = 2 : i64, tpu.core_type = #tpu.core_type<tc>, window_params = [{transform_indices = @transform_0, window_bounds = array<i64: 98>}, {transform_indices = @transform_1, window_bounds = array<i64: 1, 4, 8, 16>}, {transform_indices = @transform_2, window_bounds = array<i64: 1, 4, 8, 16>}, {transform_indices = @transform_3, window_bounds = array<i64: 1, 4, 8, 16>}, {transform_indices = @transform_4, window_bounds = array<i64: 1, 4, 8, 16>}]} {
    %c0 = arith.constant 0 : index
    %c0_0 = arith.constant 0 : index
    %c0_1 = arith.constant 0 : index
    %c0_2 = arith.constant 0 : index
    %0 = vector.load %arg3[%c0, %c0_0, %c0_1, %c0_2] : memref<1x4x8x16xf32, #tpu.memory_space<vmem>>, vector<1x1x8x16xf32>
    %1 = vector.shape_cast %0 : vector<1x1x8x16xf32> to vector<8x16xf32>
    %c1_i32 = arith.constant 1 : i32
    %c3_i32 = arith.constant 3 : i32
    %2 = arith.addi %c1_i32, %c3_i32 : i32
    %c1_i32_3 = arith.constant 1 : i32
    %3:2 = scf.for %arg9 = %c1_i32 to %2 step %c1_i32_3 iter_args(%arg10 = %1, %arg11 = %1) -> (vector<8x16xf32>, vector<8x16xf32>)  : i32 {
      %c0_563 = arith.constant 0 : index
      %1159 = arith.index_cast %arg9 : i32 to index
      %c0_564 = arith.constant 0 : index
      %c0_565 = arith.constant 0 : index
      %1160 = vector.load %arg3[%c0_563, %1159, %c0_564, %c0_565] : memref<1x4x8x16xf32, #tpu.memory_space<vmem>>, vector<1x1x8x16xf32>
      %1161 = vector.shape_cast %1160 : vector<1x1x8x16xf32> to vector<8x16xf32>
      %1162 = arith.addf %arg10, %1161 : vector<8x16xf32>
      %1163 = arith.maximumf %arg11, %1161 : vector<8x16xf32>
      scf.yield %1162, %1163 : vector<8x16xf32>, vector<8x16xf32>
    }
    %c3_i32_4 = arith.constant 3 : i32
    %c0_5 = arith.constant 0 : index
    %c0_6 = arith.constant 0 : index
    %c0_7 = arith.constant 0 : index
    %c0_8 = arith.constant 0 : index
    %4 = vector.load %arg4[%c0_5, %c0_6, %c0_7, %c0_8] : memref<1x4x8x16xf32, #tpu.memory_space<vmem>>, vector<1x1x8x16xf32>
    %5 = vector.shape_cast %4 : vector<1x1x8x16xf32> to vector<8x16xf32>
    %c1_i32_9 = arith.constant 1 : i32
    %c3_i32_10 = arith.constant 3 : i32
    %6 = arith.addi %c1_i32_9, %c3_i32_10 : i32
    %c1_i32_11 = arith.constant 1 : i32
    %7:2 = scf.for %arg9 = %c1_i32_9 to %6 step %c1_i32_11 iter_args(%arg10 = %5, %arg11 = %5) -> (vector<8x16xf32>, vector<8x16xf32>)  : i32 {
      %c0_563 = arith.constant 0 : index
      %1159 = arith.index_cast %arg9 : i32 to index
      %c0_564 = arith.constant 0 : index
      %c0_565 = arith.constant 0 : index
      %1160 = vector.load %arg4[%c0_563, %1159, %c0_564, %c0_565] : memref<1x4x8x16xf32, #tpu.memory_space<vmem>>, vector<1x1x8x16xf32>
      %1161 = vector.shape_cast %1160 : vector<1x1x8x16xf32> to vector<8x16xf32>
      %1162 = arith.addf %arg10, %1161 : vector<8x16xf32>
      %1163 = arith.maximumf %arg11, %1161 : vector<8x16xf32>
      scf.yield %1162, %1163 : vector<8x16xf32>, vector<8x16xf32>
    }
    %c3_i32_12 = arith.constant 3 : i32
    %c0_13 = arith.constant 0 : index
    %c0_14 = arith.constant 0 : index
    %c0_15 = arith.constant 0 : index
    %c0_16 = arith.constant 0 : index
    %8 = vector.load %arg5[%c0_13, %c0_14, %c0_15, %c0_16] : memref<1x4x8x16xf32, #tpu.memory_space<vmem>>, vector<1x1x8x16xf32>
    %9 = vector.shape_cast %8 : vector<1x1x8x16xf32> to vector<8x16xf32>
    %c1_i32_17 = arith.constant 1 : i32
    %c3_i32_18 = arith.constant 3 : i32
    %10 = arith.addi %c1_i32_17, %c3_i32_18 : i32
    %c1_i32_19 = arith.constant 1 : i32
    %11:2 = scf.for %arg9 = %c1_i32_17 to %10 step %c1_i32_19 iter_args(%arg10 = %9, %arg11 = %9) -> (vector<8x16xf32>, vector<8x16xf32>)  : i32 {
      %c0_563 = arith.constant 0 : index
      %1159 = arith.index_cast %arg9 : i32 to index
      %c0_564 = arith.constant 0 : index
      %c0_565 = arith.constant 0 : index
      %1160 = vector.load %arg5[%c0_563, %1159, %c0_564, %c0_565] : memref<1x4x8x16xf32, #tpu.memory_space<vmem>>, vector<1x1x8x16xf32>
      %1161 = vector.shape_cast %1160 : vector<1x1x8x16xf32> to vector<8x16xf32>
      %1162 = arith.addf %arg10, %1161 : vector<8x16xf32>
      %1163 = arith.maximumf %arg11, %1161 : vector<8x16xf32>
      scf.yield %1162, %1163 : vector<8x16xf32>, vector<8x16xf32>
    }
    %c3_i32_20 = arith.constant 3 : i32
    %c0_i32 = arith.constant 0 : i32
    %12 = arith.cmpi sgt, %arg1, %c0_i32 : i32
    %13 = arith.extui %12 : i1 to i32
    %14 = arith.sitofp %13 : i32 to f32
    %c1_i32_21 = arith.constant 1 : i32
    %15 = arith.cmpi slt, %arg1, %c1_i32_21 : i32
    %16 = arith.extui %15 : i1 to i32
    %17 = arith.sitofp %16 : i32 to f32
    %18 = vector.extract_strided_slice %7#0 {offsets = [5, 0], sizes = [3, 16], strides = [1, 1]} : vector<8x16xf32> to vector<3x16xf32>
    %19 = vector.broadcast %14 : f32 to vector<3x16xf32>
    %20 = arith.mulf %18, %19 : vector<3x16xf32>
    %21 = vector.extract_strided_slice %7#1 {offsets = [5, 0], sizes = [3, 16], strides = [1, 1]} : vector<8x16xf32> to vector<3x16xf32>
    %22 = vector.broadcast %14 : f32 to vector<3x16xf32>
    %23 = arith.mulf %21, %22 : vector<3x16xf32>
    %24 = vector.extract_strided_slice %11#0 {offsets = [0, 0], sizes = [3, 16], strides = [1, 1]} : vector<8x16xf32> to vector<3x16xf32>
    %25 = vector.broadcast %17 : f32 to vector<3x16xf32>
    %26 = arith.mulf %24, %25 : vector<3x16xf32>
    %27 = vector.extract_strided_slice %11#1 {offsets = [0, 0], sizes = [3, 16], strides = [1, 1]} : vector<8x16xf32> to vector<3x16xf32>
    %28 = vector.broadcast %17 : f32 to vector<3x16xf32>
    %29 = arith.mulf %27, %28 : vector<3x16xf32>
    %cst = arith.constant 0.000000e+00 : f32
    %30 = vector.broadcast %cst : f32 to vector<2x14x22xf32>
    %c0_22 = arith.constant 0 : index
    %c0_23 = arith.constant 0 : index
    %c0_24 = arith.constant 0 : index
    %31 = vector.load %arg7[%c0_22, %c0_23, %c0_24] : memref<2x14x22xf32, #tpu.memory_space<vmem>>, vector<2x14x22xf32>
    tpu.vector_store %arg7[%c0_22, %c0_23, %c0_24], %30 {strides = array<i32>} : memref<2x14x22xf32, #tpu.memory_space<vmem>>, vector<2x14x22xf32>,
    %c0_25 = arith.constant 0 : index
    %c0_26 = arith.constant 0 : index
    %c3 = arith.constant 3 : index
    %32 = vector.load %arg7[%c0_25, %c0_26, %c3] : memref<2x14x22xf32, #tpu.memory_space<vmem>>, vector<1x3x16xf32>
    %33 = vector.shape_cast %32 : vector<1x3x16xf32> to vector<3x16xf32>
    %34 = vector.shape_cast %20 : vector<3x16xf32> to vector<1x3x16xf32>
    tpu.vector_store %arg7[%c0_25, %c0_26, %c3], %34 {strides = array<i32>} : memref<2x14x22xf32, #tpu.memory_space<vmem>>, vector<1x3x16xf32>,
    %c1 = arith.constant 1 : index
    %c0_27 = arith.constant 0 : index
    %c3_28 = arith.constant 3 : index
    %35 = vector.load %arg7[%c1, %c0_27, %c3_28] : memref<2x14x22xf32, #tpu.memory_space<vmem>>, vector<1x3x16xf32>
    %36 = vector.shape_cast %35 : vector<1x3x16xf32> to vector<3x16xf32>
    %37 = vector.shape_cast %23 : vector<3x16xf32> to vector<1x3x16xf32>
    tpu.vector_store %arg7[%c1, %c0_27, %c3_28], %37 {strides = array<i32>} : memref<2x14x22xf32, #tpu.memory_space<vmem>>, vector<1x3x16xf32>,
    %c0_29 = arith.constant 0 : index
    %c3_30 = arith.constant 3 : index
    %c3_31 = arith.constant 3 : index
    %38 = vector.load %arg7[%c0_29, %c3_30, %c3_31] : memref<2x14x22xf32, #tpu.memory_space<vmem>>, vector<1x8x16xf32>
    %39 = vector.shape_cast %38 : vector<1x8x16xf32> to vector<8x16xf32>
    %40 = vector.shape_cast %3#0 : vector<8x16xf32> to vector<1x8x16xf32>
    tpu.vector_store %arg7[%c0_29, %c3_30, %c3_31], %40 {strides = array<i32>} : memref<2x14x22xf32, #tpu.memory_space<vmem>>, vector<1x8x16xf32>,
    %c1_32 = arith.constant 1 : index
    %c3_33 = arith.constant 3 : index
    %c3_34 = arith.constant 3 : index
    %41 = vector.load %arg7[%c1_32, %c3_33, %c3_34] : memref<2x14x22xf32, #tpu.memory_space<vmem>>, vector<1x8x16xf32>
    %42 = vector.shape_cast %41 : vector<1x8x16xf32> to vector<8x16xf32>
    %43 = vector.shape_cast %3#1 : vector<8x16xf32> to vector<1x8x16xf32>
    tpu.vector_store %arg7[%c1_32, %c3_33, %c3_34], %43 {strides = array<i32>} : memref<2x14x22xf32, #tpu.memory_space<vmem>>, vector<1x8x16xf32>,
    %c0_35 = arith.constant 0 : index
    %c11 = arith.constant 11 : index
    %c3_36 = arith.constant 3 : index
    %44 = vector.load %arg7[%c0_35, %c11, %c3_36] : memref<2x14x22xf32, #tpu.memory_space<vmem>>, vector<1x3x16xf32>
    %45 = vector.shape_cast %44 : vector<1x3x16xf32> to vector<3x16xf32>
    %46 = vector.shape_cast %26 : vector<3x16xf32> to vector<1x3x16xf32>
    tpu.vector_store %arg7[%c0_35, %c11, %c3_36], %46 {strides = array<i32>} : memref<2x14x22xf32, #tpu.memory_space<vmem>>, vector<1x3x16xf32>,
    %c1_37 = arith.constant 1 : index
    %c11_38 = arith.constant 11 : index
    %c3_39 = arith.constant 3 : index
    %47 = vector.load %arg7[%c1_37, %c11_38, %c3_39] : memref<2x14x22xf32, #tpu.memory_space<vmem>>, vector<1x3x16xf32>
    %48 = vector.shape_cast %47 : vector<1x3x16xf32> to vector<3x16xf32>
    %49 = vector.shape_cast %29 : vector<3x16xf32> to vector<1x3x16xf32>
    tpu.vector_store %arg7[%c1_37, %c11_38, %c3_39], %49 {strides = array<i32>} : memref<2x14x22xf32, #tpu.memory_space<vmem>>, vector<1x3x16xf32>,
    %c0_40 = arith.constant 0 : index
    %c0_41 = arith.constant 0 : index
    %c0_42 = arith.constant 0 : index
    %50 = vector.load %arg7[%c0_40, %c0_41, %c0_42] : memref<2x14x22xf32, #tpu.memory_space<vmem>>, vector<1x14x16xf32>
    %51 = vector.shape_cast %50 : vector<1x14x16xf32> to vector<14x16xf32>
    %c0_43 = arith.constant 0 : index
    %c0_44 = arith.constant 0 : index
    %c0_45 = arith.constant 0 : index
    %52 = vector.load %arg8[%c0_43, %c0_44, %c0_45] : memref<14x14x16xf32, #tpu.memory_space<vmem>>, vector<1x14x16xf32>
    %53 = vector.shape_cast %52 : vector<1x14x16xf32> to vector<14x16xf32>
    %54 = vector.shape_cast %51 : vector<14x16xf32> to vector<1x14x16xf32>
    tpu.vector_store %arg8[%c0_43, %c0_44, %c0_45], %54 {strides = array<i32>} : memref<14x14x16xf32, #tpu.memory_space<vmem>>, vector<1x14x16xf32>,
    %c0_46 = arith.constant 0 : index
    %c0_47 = arith.constant 0 : index
    %c1_48 = arith.constant 1 : index
    %55 = vector.load %arg7[%c0_46, %c0_47, %c1_48] : memref<2x14x22xf32, #tpu.memory_space<vmem>>, vector<1x14x16xf32>
    %56 = vector.shape_cast %55 : vector<1x14x16xf32> to vector<14x16xf32>
    %c1_49 = arith.constant 1 : index
    %c0_50 = arith.constant 0 : index
    %c0_51 = arith.constant 0 : index
    %57 = vector.load %arg8[%c1_49, %c0_50, %c0_51] : memref<14x14x16xf32, #tpu.memory_space<vmem>>, vector<1x14x16xf32>
    %58 = vector.shape_cast %57 : vector<1x14x16xf32> to vector<14x16xf32>
    %59 = vector.shape_cast %56 : vector<14x16xf32> to vector<1x14x16xf32>
    tpu.vector_store %arg8[%c1_49, %c0_50, %c0_51], %59 {strides = array<i32>} : memref<14x14x16xf32, #tpu.memory_space<vmem>>, vector<1x14x16xf32>,
    %c0_52 = arith.constant 0 : index
    %c0_53 = arith.constant 0 : index
    %c2 = arith.constant 2 : index
    %60 = vector.load %arg7[%c0_52, %c0_53, %c2] : memref<2x14x22xf32, #tpu.memory_space<vmem>>, vector<1x14x16xf32>
    %61 = vector.shape_cast %60 : vector<1x14x16xf32> to vector<14x16xf32>
    %c2_54 = arith.constant 2 : index
    %c0_55 = arith.constant 0 : index
    %c0_56 = arith.constant 0 : index
    %62 = vector.load %arg8[%c2_54, %c0_55, %c0_56] : memref<14x14x16xf32, #tpu.memory_space<vmem>>, vector<1x14x16xf32>
    %63 = vector.shape_cast %62 : vector<1x14x16xf32> to vector<14x16xf32>
    %64 = vector.shape_cast %61 : vector<14x16xf32> to vector<1x14x16xf32>
    tpu.vector_store %arg8[%c2_54, %c0_55, %c0_56], %64 {strides = array<i32>} : memref<14x14x16xf32, #tpu.memory_space<vmem>>, vector<1x14x16xf32>,
    %c0_57 = arith.constant 0 : index
    %c0_58 = arith.constant 0 : index
    %c3_59 = arith.constant 3 : index
    %65 = vector.load %arg7[%c0_57, %c0_58, %c3_59] : memref<2x14x22xf32, #tpu.memory_space<vmem>>, vector<1x14x16xf32>
    %66 = vector.shape_cast %65 : vector<1x14x16xf32> to vector<14x16xf32>
    %c3_60 = arith.constant 3 : index
    %c0_61 = arith.constant 0 : index
    %c0_62 = arith.constant 0 : index
    %67 = vector.load %arg8[%c3_60, %c0_61, %c0_62] : memref<14x14x16xf32, #tpu.memory_space<vmem>>, vector<1x14x16xf32>
    %68 = vector.shape_cast %67 : vector<1x14x16xf32> to vector<14x16xf32>
    %69 = vector.shape_cast %66 : vector<14x16xf32> to vector<1x14x16xf32>
    tpu.vector_store %arg8[%c3_60, %c0_61, %c0_62], %69 {strides = array<i32>} : memref<14x14x16xf32, #tpu.memory_space<vmem>>, vector<1x14x16xf32>,
    %c0_63 = arith.constant 0 : index
    %c0_64 = arith.constant 0 : index
    %c4 = arith.constant 4 : index
    %70 = vector.load %arg7[%c0_63, %c0_64, %c4] : memref<2x14x22xf32, #tpu.memory_space<vmem>>, vector<1x14x16xf32>
    %71 = vector.shape_cast %70 : vector<1x14x16xf32> to vector<14x16xf32>
    %c4_65 = arith.constant 4 : index
    %c0_66 = arith.constant 0 : index
    %c0_67 = arith.constant 0 : index
    %72 = vector.load %arg8[%c4_65, %c0_66, %c0_67] : memref<14x14x16xf32, #tpu.memory_space<vmem>>, vector<1x14x16xf32>
    %73 = vector.shape_cast %72 : vector<1x14x16xf32> to vector<14x16xf32>
    %74 = vector.shape_cast %71 : vector<14x16xf32> to vector<1x14x16xf32>
    tpu.vector_store %arg8[%c4_65, %c0_66, %c0_67], %74 {strides = array<i32>} : memref<14x14x16xf32, #tpu.memory_space<vmem>>, vector<1x14x16xf32>,
    %c0_68 = arith.constant 0 : index
    %c0_69 = arith.constant 0 : index
    %c5 = arith.constant 5 : index
    %75 = vector.load %arg7[%c0_68, %c0_69, %c5] : memref<2x14x22xf32, #tpu.memory_space<vmem>>, vector<1x14x16xf32>
    %76 = vector.shape_cast %75 : vector<1x14x16xf32> to vector<14x16xf32>
    %c5_70 = arith.constant 5 : index
    %c0_71 = arith.constant 0 : index
    %c0_72 = arith.constant 0 : index
    %77 = vector.load %arg8[%c5_70, %c0_71, %c0_72] : memref<14x14x16xf32, #tpu.memory_space<vmem>>, vector<1x14x16xf32>
    %78 = vector.shape_cast %77 : vector<1x14x16xf32> to vector<14x16xf32>
    %79 = vector.shape_cast %76 : vector<14x16xf32> to vector<1x14x16xf32>
    tpu.vector_store %arg8[%c5_70, %c0_71, %c0_72], %79 {strides = array<i32>} : memref<14x14x16xf32, #tpu.memory_space<vmem>>, vector<1x14x16xf32>,
    %c0_73 = arith.constant 0 : index
    %c0_74 = arith.constant 0 : index
    %c6 = arith.constant 6 : index
    %80 = vector.load %arg7[%c0_73, %c0_74, %c6] : memref<2x14x22xf32, #tpu.memory_space<vmem>>, vector<1x14x16xf32>
    %81 = vector.shape_cast %80 : vector<1x14x16xf32> to vector<14x16xf32>
    %c6_75 = arith.constant 6 : index
    %c0_76 = arith.constant 0 : index
    %c0_77 = arith.constant 0 : index
    %82 = vector.load %arg8[%c6_75, %c0_76, %c0_77] : memref<14x14x16xf32, #tpu.memory_space<vmem>>, vector<1x14x16xf32>
    %83 = vector.shape_cast %82 : vector<1x14x16xf32> to vector<14x16xf32>
    %84 = vector.shape_cast %81 : vector<14x16xf32> to vector<1x14x16xf32>
    tpu.vector_store %arg8[%c6_75, %c0_76, %c0_77], %84 {strides = array<i32>} : memref<14x14x16xf32, #tpu.memory_space<vmem>>, vector<1x14x16xf32>,
    %c1_78 = arith.constant 1 : index
    %c0_79 = arith.constant 0 : index
    %c0_80 = arith.constant 0 : index
    %85 = vector.load %arg7[%c1_78, %c0_79, %c0_80] : memref<2x14x22xf32, #tpu.memory_space<vmem>>, vector<1x14x16xf32>
    %86 = vector.shape_cast %85 : vector<1x14x16xf32> to vector<14x16xf32>
    %c7 = arith.constant 7 : index
    %c0_81 = arith.constant 0 : index
    %c0_82 = arith.constant 0 : index
    %87 = vector.load %arg8[%c7, %c0_81, %c0_82] : memref<14x14x16xf32, #tpu.memory_space<vmem>>, vector<1x14x16xf32>
    %88 = vector.shape_cast %87 : vector<1x14x16xf32> to vector<14x16xf32>
    %89 = vector.shape_cast %86 : vector<14x16xf32> to vector<1x14x16xf32>
    tpu.vector_store %arg8[%c7, %c0_81, %c0_82], %89 {strides = array<i32>} : memref<14x14x16xf32, #tpu.memory_space<vmem>>, vector<1x14x16xf32>,
    %c1_83 = arith.constant 1 : index
    %c0_84 = arith.constant 0 : index
    %c1_85 = arith.constant 1 : index
    %90 = vector.load %arg7[%c1_83, %c0_84, %c1_85] : memref<2x14x22xf32, #tpu.memory_space<vmem>>, vector<1x14x16xf32>
    %91 = vector.shape_cast %90 : vector<1x14x16xf32> to vector<14x16xf32>
    %c8 = arith.constant 8 : index
    %c0_86 = arith.constant 0 : index
    %c0_87 = arith.constant 0 : index
    %92 = vector.load %arg8[%c8, %c0_86, %c0_87] : memref<14x14x16xf32, #tpu.memory_space<vmem>>, vector<1x14x16xf32>
    %93 = vector.shape_cast %92 : vector<1x14x16xf32> to vector<14x16xf32>
    %94 = vector.shape_cast %91 : vector<14x16xf32> to vector<1x14x16xf32>
    tpu.vector_store %arg8[%c8, %c0_86, %c0_87], %94 {strides = array<i32>} : memref<14x14x16xf32, #tpu.memory_space<vmem>>, vector<1x14x16xf32>,
    %c1_88 = arith.constant 1 : index
    %c0_89 = arith.constant 0 : index
    %c2_90 = arith.constant 2 : index
    %95 = vector.load %arg7[%c1_88, %c0_89, %c2_90] : memref<2x14x22xf32, #tpu.memory_space<vmem>>, vector<1x14x16xf32>
    %96 = vector.shape_cast %95 : vector<1x14x16xf32> to vector<14x16xf32>
    %c9 = arith.constant 9 : index
    %c0_91 = arith.constant 0 : index
    %c0_92 = arith.constant 0 : index
    %97 = vector.load %arg8[%c9, %c0_91, %c0_92] : memref<14x14x16xf32, #tpu.memory_space<vmem>>, vector<1x14x16xf32>
    %98 = vector.shape_cast %97 : vector<1x14x16xf32> to vector<14x16xf32>
    %99 = vector.shape_cast %96 : vector<14x16xf32> to vector<1x14x16xf32>
    tpu.vector_store %arg8[%c9, %c0_91, %c0_92], %99 {strides = array<i32>} : memref<14x14x16xf32, #tpu.memory_space<vmem>>, vector<1x14x16xf32>,
    %c1_93 = arith.constant 1 : index
    %c0_94 = arith.constant 0 : index
    %c3_95 = arith.constant 3 : index
    %100 = vector.load %arg7[%c1_93, %c0_94, %c3_95] : memref<2x14x22xf32, #tpu.memory_space<vmem>>, vector<1x14x16xf32>
    %101 = vector.shape_cast %100 : vector<1x14x16xf32> to vector<14x16xf32>
    %c10 = arith.constant 10 : index
    %c0_96 = arith.constant 0 : index
    %c0_97 = arith.constant 0 : index
    %102 = vector.load %arg8[%c10, %c0_96, %c0_97] : memref<14x14x16xf32, #tpu.memory_space<vmem>>, vector<1x14x16xf32>
    %103 = vector.shape_cast %102 : vector<1x14x16xf32> to vector<14x16xf32>
    %104 = vector.shape_cast %101 : vector<14x16xf32> to vector<1x14x16xf32>
    tpu.vector_store %arg8[%c10, %c0_96, %c0_97], %104 {strides = array<i32>} : memref<14x14x16xf32, #tpu.memory_space<vmem>>, vector<1x14x16xf32>,
    %c1_98 = arith.constant 1 : index
    %c0_99 = arith.constant 0 : index
    %c4_100 = arith.constant 4 : index
    %105 = vector.load %arg7[%c1_98, %c0_99, %c4_100] : memref<2x14x22xf32, #tpu.memory_space<vmem>>, vector<1x14x16xf32>
    %106 = vector.shape_cast %105 : vector<1x14x16xf32> to vector<14x16xf32>
    %c11_101 = arith.constant 11 : index
    %c0_102 = arith.constant 0 : index
    %c0_103 = arith.constant 0 : index
    %107 = vector.load %arg8[%c11_101, %c0_102, %c0_103] : memref<14x14x16xf32, #tpu.memory_space<vmem>>, vector<1x14x16xf32>
    %108 = vector.shape_cast %107 : vector<1x14x16xf32> to vector<14x16xf32>
    %109 = vector.shape_cast %106 : vector<14x16xf32> to vector<1x14x16xf32>
    tpu.vector_store %arg8[%c11_101, %c0_102, %c0_103], %109 {strides = array<i32>} : memref<14x14x16xf32, #tpu.memory_space<vmem>>, vector<1x14x16xf32>,
    %c1_104 = arith.constant 1 : index
    %c0_105 = arith.constant 0 : index
    %c5_106 = arith.constant 5 : index
    %110 = vector.load %arg7[%c1_104, %c0_105, %c5_106] : memref<2x14x22xf32, #tpu.memory_space<vmem>>, vector<1x14x16xf32>
    %111 = vector.shape_cast %110 : vector<1x14x16xf32> to vector<14x16xf32>
    %c12 = arith.constant 12 : index
    %c0_107 = arith.constant 0 : index
    %c0_108 = arith.constant 0 : index
    %112 = vector.load %arg8[%c12, %c0_107, %c0_108] : memref<14x14x16xf32, #tpu.memory_space<vmem>>, vector<1x14x16xf32>
    %113 = vector.shape_cast %112 : vector<1x14x16xf32> to vector<14x16xf32>
    %114 = vector.shape_cast %111 : vector<14x16xf32> to vector<1x14x16xf32>
    tpu.vector_store %arg8[%c12, %c0_107, %c0_108], %114 {strides = array<i32>} : memref<14x14x16xf32, #tpu.memory_space<vmem>>, vector<1x14x16xf32>,
    %c1_109 = arith.constant 1 : index
    %c0_110 = arith.constant 0 : index
    %c6_111 = arith.constant 6 : index
    %115 = vector.load %arg7[%c1_109, %c0_110, %c6_111] : memref<2x14x22xf32, #tpu.memory_space<vmem>>, vector<1x14x16xf32>
    %116 = vector.shape_cast %115 : vector<1x14x16xf32> to vector<14x16xf32>
    %c13 = arith.constant 13 : index
    %c0_112 = arith.constant 0 : index
    %c0_113 = arith.constant 0 : index
    %117 = vector.load %arg8[%c13, %c0_112, %c0_113] : memref<14x14x16xf32, #tpu.memory_space<vmem>>, vector<1x14x16xf32>
    %118 = vector.shape_cast %117 : vector<1x14x16xf32> to vector<14x16xf32>
    %119 = vector.shape_cast %116 : vector<14x16xf32> to vector<1x14x16xf32>
    tpu.vector_store %arg8[%c13, %c0_112, %c0_113], %119 {strides = array<i32>} : memref<14x14x16xf32, #tpu.memory_space<vmem>>, vector<1x14x16xf32>,
    %cst_114 = arith.constant 0.000000e+00 : f32
    %120 = vector.broadcast %cst_114 : f32 to vector<8x16xf32>
    %c0_i32_115 = arith.constant 0 : i32
    %c7_i32 = arith.constant 7 : i32
    %121 = arith.muli %c0_i32_115, %c7_i32 : i32
    %c0_i32_116 = arith.constant 0 : i32
    %122 = arith.addi %121, %c0_i32_116 : i32
    %123 = arith.index_cast %122 : i32 to index
    %124 = memref.load %arg2[%123] : memref<98xf32, #tpu.memory_space<smem>>
    %c7_i32_117 = arith.constant 7 : i32
    %125 = arith.muli %c0_i32_115, %c7_i32_117 : i32
    %c49_i32 = arith.constant 49 : i32
    %126 = arith.addi %c49_i32, %125 : i32
    %c0_i32_118 = arith.constant 0 : i32
    %127 = arith.addi %126, %c0_i32_118 : i32
    %128 = arith.index_cast %127 : i32 to index
    %129 = memref.load %arg2[%128] : memref<98xf32, #tpu.memory_space<smem>>
    %c0_119 = arith.constant 0 : index
    %130 = arith.index_cast %c0_i32_115 : i32 to index
    %c0_120 = arith.constant 0 : index
    %131 = vector.load %arg8[%c0_119, %130, %c0_120] : memref<14x14x16xf32, #tpu.memory_space<vmem>>, vector<1x8x16xf32>
    %132 = vector.shape_cast %131 : vector<1x8x16xf32> to vector<8x16xf32>
    %c7_121 = arith.constant 7 : index
    %133 = arith.index_cast %c0_i32_115 : i32 to index
    %c0_122 = arith.constant 0 : index
    %134 = vector.load %arg8[%c7_121, %133, %c0_122] : memref<14x14x16xf32, #tpu.memory_space<vmem>>, vector<1x8x16xf32>
    %135 = vector.shape_cast %134 : vector<1x8x16xf32> to vector<8x16xf32>
    %136 = vector.broadcast %124 : f32 to vector<8x16xf32>
    %137 = arith.mulf %136, %132 : vector<8x16xf32>
    %138 = arith.addf %120, %137 : vector<8x16xf32>
    %139 = vector.broadcast %129 : f32 to vector<8x16xf32>
    %140 = arith.mulf %139, %135 : vector<8x16xf32>
    %141 = arith.addf %120, %140 : vector<8x16xf32>
    %c7_i32_123 = arith.constant 7 : i32
    %142 = arith.muli %c0_i32_115, %c7_i32_123 : i32
    %c1_i32_124 = arith.constant 1 : i32
    %143 = arith.addi %142, %c1_i32_124 : i32
    %144 = arith.index_cast %143 : i32 to index
    %145 = memref.load %arg2[%144] : memref<98xf32, #tpu.memory_space<smem>>
    %c7_i32_125 = arith.constant 7 : i32
    %146 = arith.muli %c0_i32_115, %c7_i32_125 : i32
    %c49_i32_126 = arith.constant 49 : i32
    %147 = arith.addi %c49_i32_126, %146 : i32
    %c1_i32_127 = arith.constant 1 : i32
    %148 = arith.addi %147, %c1_i32_127 : i32
    %149 = arith.index_cast %148 : i32 to index
    %150 = memref.load %arg2[%149] : memref<98xf32, #tpu.memory_space<smem>>
    %c1_128 = arith.constant 1 : index
    %151 = arith.index_cast %c0_i32_115 : i32 to index
    %c0_129 = arith.constant 0 : index
    %152 = vector.load %arg8[%c1_128, %151, %c0_129] : memref<14x14x16xf32, #tpu.memory_space<vmem>>, vector<1x8x16xf32>
    %153 = vector.shape_cast %152 : vector<1x8x16xf32> to vector<8x16xf32>
    %c8_130 = arith.constant 8 : index
    %154 = arith.index_cast %c0_i32_115 : i32 to index
    %c0_131 = arith.constant 0 : index
    %155 = vector.load %arg8[%c8_130, %154, %c0_131] : memref<14x14x16xf32, #tpu.memory_space<vmem>>, vector<1x8x16xf32>
    %156 = vector.shape_cast %155 : vector<1x8x16xf32> to vector<8x16xf32>
    %157 = vector.broadcast %145 : f32 to vector<8x16xf32>
    %158 = arith.mulf %157, %153 : vector<8x16xf32>
    %159 = arith.addf %120, %158 : vector<8x16xf32>
    %160 = vector.broadcast %150 : f32 to vector<8x16xf32>
    %161 = arith.mulf %160, %156 : vector<8x16xf32>
    %162 = arith.addf %120, %161 : vector<8x16xf32>
    %c7_i32_132 = arith.constant 7 : i32
    %163 = arith.muli %c0_i32_115, %c7_i32_132 : i32
    %c2_i32 = arith.constant 2 : i32
    %164 = arith.addi %163, %c2_i32 : i32
    %165 = arith.index_cast %164 : i32 to index
    %166 = memref.load %arg2[%165] : memref<98xf32, #tpu.memory_space<smem>>
    %c7_i32_133 = arith.constant 7 : i32
    %167 = arith.muli %c0_i32_115, %c7_i32_133 : i32
    %c49_i32_134 = arith.constant 49 : i32
    %168 = arith.addi %c49_i32_134, %167 : i32
    %c2_i32_135 = arith.constant 2 : i32
    %169 = arith.addi %168, %c2_i32_135 : i32
    %170 = arith.index_cast %169 : i32 to index
    %171 = memref.load %arg2[%170] : memref<98xf32, #tpu.memory_space<smem>>
    %c2_136 = arith.constant 2 : index
    %172 = arith.index_cast %c0_i32_115 : i32 to index
    %c0_137 = arith.constant 0 : index
    %173 = vector.load %arg8[%c2_136, %172, %c0_137] : memref<14x14x16xf32, #tpu.memory_space<vmem>>, vector<1x8x16xf32>
    %174 = vector.shape_cast %173 : vector<1x8x16xf32> to vector<8x16xf32>
    %c9_138 = arith.constant 9 : index
    %175 = arith.index_cast %c0_i32_115 : i32 to index
    %c0_139 = arith.constant 0 : index
    %176 = vector.load %arg8[%c9_138, %175, %c0_139] : memref<14x14x16xf32, #tpu.memory_space<vmem>>, vector<1x8x16xf32>
    %177 = vector.shape_cast %176 : vector<1x8x16xf32> to vector<8x16xf32>
    %178 = vector.broadcast %166 : f32 to vector<8x16xf32>
    %179 = arith.mulf %178, %174 : vector<8x16xf32>
    %180 = arith.addf %138, %179 : vector<8x16xf32>
    %181 = vector.broadcast %171 : f32 to vector<8x16xf32>
    %182 = arith.mulf %181, %177 : vector<8x16xf32>
    %183 = arith.addf %141, %182 : vector<8x16xf32>
    %c7_i32_140 = arith.constant 7 : i32
    %184 = arith.muli %c0_i32_115, %c7_i32_140 : i32
    %c3_i32_141 = arith.constant 3 : i32
    %185 = arith.addi %184, %c3_i32_141 : i32
    %186 = arith.index_cast %185 : i32 to index
    %187 = memref.load %arg2[%186] : memref<98xf32, #tpu.memory_space<smem>>
    %c7_i32_142 = arith.constant 7 : i32
    %188 = arith.muli %c0_i32_115, %c7_i32_142 : i32
    %c49_i32_143 = arith.constant 49 : i32
    %189 = arith.addi %c49_i32_143, %188 : i32
    %c3_i32_144 = arith.constant 3 : i32
    %190 = arith.addi %189, %c3_i32_144 : i32
    %191 = arith.index_cast %190 : i32 to index
    %192 = memref.load %arg2[%191] : memref<98xf32, #tpu.memory_space<smem>>
    %c3_145 = arith.constant 3 : index
    %193 = arith.index_cast %c0_i32_115 : i32 to index
    %c0_146 = arith.constant 0 : index
    %194 = vector.load %arg8[%c3_145, %193, %c0_146] : memref<14x14x16xf32, #tpu.memory_space<vmem>>, vector<1x8x16xf32>
    %195 = vector.shape_cast %194 : vector<1x8x16xf32> to vector<8x16xf32>
    %c10_147 = arith.constant 10 : index
    %196 = arith.index_cast %c0_i32_115 : i32 to index
    %c0_148 = arith.constant 0 : index
    %197 = vector.load %arg8[%c10_147, %196, %c0_148] : memref<14x14x16xf32, #tpu.memory_space<vmem>>, vector<1x8x16xf32>
    %198 = vector.shape_cast %197 : vector<1x8x16xf32> to vector<8x16xf32>
    %199 = vector.broadcast %187 : f32 to vector<8x16xf32>
    %200 = arith.mulf %199, %195 : vector<8x16xf32>
    %201 = arith.addf %159, %200 : vector<8x16xf32>
    %202 = vector.broadcast %192 : f32 to vector<8x16xf32>
    %203 = arith.mulf %202, %198 : vector<8x16xf32>
    %204 = arith.addf %162, %203 : vector<8x16xf32>
    %c7_i32_149 = arith.constant 7 : i32
    %205 = arith.muli %c0_i32_115, %c7_i32_149 : i32
    %c4_i32 = arith.constant 4 : i32
    %206 = arith.addi %205, %c4_i32 : i32
    %207 = arith.index_cast %206 : i32 to index
    %208 = memref.load %arg2[%207] : memref<98xf32, #tpu.memory_space<smem>>
    %c7_i32_150 = arith.constant 7 : i32
    %209 = arith.muli %c0_i32_115, %c7_i32_150 : i32
    %c49_i32_151 = arith.constant 49 : i32
    %210 = arith.addi %c49_i32_151, %209 : i32
    %c4_i32_152 = arith.constant 4 : i32
    %211 = arith.addi %210, %c4_i32_152 : i32
    %212 = arith.index_cast %211 : i32 to index
    %213 = memref.load %arg2[%212] : memref<98xf32, #tpu.memory_space<smem>>
    %c4_153 = arith.constant 4 : index
    %214 = arith.index_cast %c0_i32_115 : i32 to index
    %c0_154 = arith.constant 0 : index
    %215 = vector.load %arg8[%c4_153, %214, %c0_154] : memref<14x14x16xf32, #tpu.memory_space<vmem>>, vector<1x8x16xf32>
    %216 = vector.shape_cast %215 : vector<1x8x16xf32> to vector<8x16xf32>
    %c11_155 = arith.constant 11 : index
    %217 = arith.index_cast %c0_i32_115 : i32 to index
    %c0_156 = arith.constant 0 : index
    %218 = vector.load %arg8[%c11_155, %217, %c0_156] : memref<14x14x16xf32, #tpu.memory_space<vmem>>, vector<1x8x16xf32>
    %219 = vector.shape_cast %218 : vector<1x8x16xf32> to vector<8x16xf32>
    %220 = vector.broadcast %208 : f32 to vector<8x16xf32>
    %221 = arith.mulf %220, %216 : vector<8x16xf32>
    %222 = arith.addf %180, %221 : vector<8x16xf32>
    %223 = vector.broadcast %213 : f32 to vector<8x16xf32>
    %224 = arith.mulf %223, %219 : vector<8x16xf32>
    %225 = arith.addf %183, %224 : vector<8x16xf32>
    %c7_i32_157 = arith.constant 7 : i32
    %226 = arith.muli %c0_i32_115, %c7_i32_157 : i32
    %c5_i32 = arith.constant 5 : i32
    %227 = arith.addi %226, %c5_i32 : i32
    %228 = arith.index_cast %227 : i32 to index
    %229 = memref.load %arg2[%228] : memref<98xf32, #tpu.memory_space<smem>>
    %c7_i32_158 = arith.constant 7 : i32
    %230 = arith.muli %c0_i32_115, %c7_i32_158 : i32
    %c49_i32_159 = arith.constant 49 : i32
    %231 = arith.addi %c49_i32_159, %230 : i32
    %c5_i32_160 = arith.constant 5 : i32
    %232 = arith.addi %231, %c5_i32_160 : i32
    %233 = arith.index_cast %232 : i32 to index
    %234 = memref.load %arg2[%233] : memref<98xf32, #tpu.memory_space<smem>>
    %c5_161 = arith.constant 5 : index
    %235 = arith.index_cast %c0_i32_115 : i32 to index
    %c0_162 = arith.constant 0 : index
    %236 = vector.load %arg8[%c5_161, %235, %c0_162] : memref<14x14x16xf32, #tpu.memory_space<vmem>>, vector<1x8x16xf32>
    %237 = vector.shape_cast %236 : vector<1x8x16xf32> to vector<8x16xf32>
    %c12_163 = arith.constant 12 : index
    %238 = arith.index_cast %c0_i32_115 : i32 to index
    %c0_164 = arith.constant 0 : index
    %239 = vector.load %arg8[%c12_163, %238, %c0_164] : memref<14x14x16xf32, #tpu.memory_space<vmem>>, vector<1x8x16xf32>
    %240 = vector.shape_cast %239 : vector<1x8x16xf32> to vector<8x16xf32>
    %241 = vector.broadcast %229 : f32 to vector<8x16xf32>
    %242 = arith.mulf %241, %237 : vector<8x16xf32>
    %243 = arith.addf %201, %242 : vector<8x16xf32>
    %244 = vector.broadcast %234 : f32 to vector<8x16xf32>
    %245 = arith.mulf %244, %240 : vector<8x16xf32>
    %246 = arith.addf %204, %245 : vector<8x16xf32>
    %c7_i32_165 = arith.constant 7 : i32
    %247 = arith.muli %c0_i32_115, %c7_i32_165 : i32
    %c6_i32 = arith.constant 6 : i32
    %248 = arith.addi %247, %c6_i32 : i32
    %249 = arith.index_cast %248 : i32 to index
    %250 = memref.load %arg2[%249] : memref<98xf32, #tpu.memory_space<smem>>
    %c7_i32_166 = arith.constant 7 : i32
    %251 = arith.muli %c0_i32_115, %c7_i32_166 : i32
    %c49_i32_167 = arith.constant 49 : i32
    %252 = arith.addi %c49_i32_167, %251 : i32
    %c6_i32_168 = arith.constant 6 : i32
    %253 = arith.addi %252, %c6_i32_168 : i32
    %254 = arith.index_cast %253 : i32 to index
    %255 = memref.load %arg2[%254] : memref<98xf32, #tpu.memory_space<smem>>
    %c6_169 = arith.constant 6 : index
    %256 = arith.index_cast %c0_i32_115 : i32 to index
    %c0_170 = arith.constant 0 : index
    %257 = vector.load %arg8[%c6_169, %256, %c0_170] : memref<14x14x16xf32, #tpu.memory_space<vmem>>, vector<1x8x16xf32>
    %258 = vector.shape_cast %257 : vector<1x8x16xf32> to vector<8x16xf32>
    %c13_171 = arith.constant 13 : index
    %259 = arith.index_cast %c0_i32_115 : i32 to index
    %c0_172 = arith.constant 0 : index
    %260 = vector.load %arg8[%c13_171, %259, %c0_172] : memref<14x14x16xf32, #tpu.memory_space<vmem>>, vector<1x8x16xf32>
    %261 = vector.shape_cast %260 : vector<1x8x16xf32> to vector<8x16xf32>
    %262 = vector.broadcast %250 : f32 to vector<8x16xf32>
    %263 = arith.mulf %262, %258 : vector<8x16xf32>
    %264 = arith.addf %222, %263 : vector<8x16xf32>
    %265 = vector.broadcast %255 : f32 to vector<8x16xf32>
    %266 = arith.mulf %265, %261 : vector<8x16xf32>
    %267 = arith.addf %225, %266 : vector<8x16xf32>
    %c1_i32_173 = arith.constant 1 : i32
    %c7_i32_174 = arith.constant 7 : i32
    %268 = arith.muli %c1_i32_173, %c7_i32_174 : i32
    %c0_i32_175 = arith.constant 0 : i32
    %269 = arith.addi %268, %c0_i32_175 : i32
    %270 = arith.index_cast %269 : i32 to index
    %271 = memref.load %arg2[%270] : memref<98xf32, #tpu.memory_space<smem>>
    %c7_i32_176 = arith.constant 7 : i32
    %272 = arith.muli %c1_i32_173, %c7_i32_176 : i32
    %c49_i32_177 = arith.constant 49 : i32
    %273 = arith.addi %c49_i32_177, %272 : i32
    %c0_i32_178 = arith.constant 0 : i32
    %274 = arith.addi %273, %c0_i32_178 : i32
    %275 = arith.index_cast %274 : i32 to index
    %276 = memref.load %arg2[%275] : memref<98xf32, #tpu.memory_space<smem>>
    %c0_179 = arith.constant 0 : index
    %277 = arith.index_cast %c1_i32_173 : i32 to index
    %c0_180 = arith.constant 0 : index
    %278 = vector.load %arg8[%c0_179, %277, %c0_180] : memref<14x14x16xf32, #tpu.memory_space<vmem>>, vector<1x8x16xf32>
    %279 = vector.shape_cast %278 : vector<1x8x16xf32> to vector<8x16xf32>
    %c7_181 = arith.constant 7 : index
    %280 = arith.index_cast %c1_i32_173 : i32 to index
    %c0_182 = arith.constant 0 : index
    %281 = vector.load %arg8[%c7_181, %280, %c0_182] : memref<14x14x16xf32, #tpu.memory_space<vmem>>, vector<1x8x16xf32>
    %282 = vector.shape_cast %281 : vector<1x8x16xf32> to vector<8x16xf32>
    %283 = vector.broadcast %271 : f32 to vector<8x16xf32>
    %284 = arith.mulf %283, %279 : vector<8x16xf32>
    %285 = arith.addf %264, %284 : vector<8x16xf32>
    %286 = vector.broadcast %276 : f32 to vector<8x16xf32>
    %287 = arith.mulf %286, %282 : vector<8x16xf32>
    %288 = arith.addf %267, %287 : vector<8x16xf32>
    %c7_i32_183 = arith.constant 7 : i32
    %289 = arith.muli %c1_i32_173, %c7_i32_183 : i32
    %c1_i32_184 = arith.constant 1 : i32
    %290 = arith.addi %289, %c1_i32_184 : i32
    %291 = arith.index_cast %290 : i32 to index
    %292 = memref.load %arg2[%291] : memref<98xf32, #tpu.memory_space<smem>>
    %c7_i32_185 = arith.constant 7 : i32
    %293 = arith.muli %c1_i32_173, %c7_i32_185 : i32
    %c49_i32_186 = arith.constant 49 : i32
    %294 = arith.addi %c49_i32_186, %293 : i32
    %c1_i32_187 = arith.constant 1 : i32
    %295 = arith.addi %294, %c1_i32_187 : i32
    %296 = arith.index_cast %295 : i32 to index
    %297 = memref.load %arg2[%296] : memref<98xf32, #tpu.memory_space<smem>>
    %c1_188 = arith.constant 1 : index
    %298 = arith.index_cast %c1_i32_173 : i32 to index
    %c0_189 = arith.constant 0 : index
    %299 = vector.load %arg8[%c1_188, %298, %c0_189] : memref<14x14x16xf32, #tpu.memory_space<vmem>>, vector<1x8x16xf32>
    %300 = vector.shape_cast %299 : vector<1x8x16xf32> to vector<8x16xf32>
    %c8_190 = arith.constant 8 : index
    %301 = arith.index_cast %c1_i32_173 : i32 to index
    %c0_191 = arith.constant 0 : index
    %302 = vector.load %arg8[%c8_190, %301, %c0_191] : memref<14x14x16xf32, #tpu.memory_space<vmem>>, vector<1x8x16xf32>
    %303 = vector.shape_cast %302 : vector<1x8x16xf32> to vector<8x16xf32>
    %304 = vector.broadcast %292 : f32 to vector<8x16xf32>
    %305 = arith.mulf %304, %300 : vector<8x16xf32>
    %306 = arith.addf %243, %305 : vector<8x16xf32>
    %307 = vector.broadcast %297 : f32 to vector<8x16xf32>
    %308 = arith.mulf %307, %303 : vector<8x16xf32>
    %309 = arith.addf %246, %308 : vector<8x16xf32>
    %c7_i32_192 = arith.constant 7 : i32
    %310 = arith.muli %c1_i32_173, %c7_i32_192 : i32
    %c2_i32_193 = arith.constant 2 : i32
    %311 = arith.addi %310, %c2_i32_193 : i32
    %312 = arith.index_cast %311 : i32 to index
    %313 = memref.load %arg2[%312] : memref<98xf32, #tpu.memory_space<smem>>
    %c7_i32_194 = arith.constant 7 : i32
    %314 = arith.muli %c1_i32_173, %c7_i32_194 : i32
    %c49_i32_195 = arith.constant 49 : i32
    %315 = arith.addi %c49_i32_195, %314 : i32
    %c2_i32_196 = arith.constant 2 : i32
    %316 = arith.addi %315, %c2_i32_196 : i32
    %317 = arith.index_cast %316 : i32 to index
    %318 = memref.load %arg2[%317] : memref<98xf32, #tpu.memory_space<smem>>
    %c2_197 = arith.constant 2 : index
    %319 = arith.index_cast %c1_i32_173 : i32 to index
    %c0_198 = arith.constant 0 : index
    %320 = vector.load %arg8[%c2_197, %319, %c0_198] : memref<14x14x16xf32, #tpu.memory_space<vmem>>, vector<1x8x16xf32>
    %321 = vector.shape_cast %320 : vector<1x8x16xf32> to vector<8x16xf32>
    %c9_199 = arith.constant 9 : index
    %322 = arith.index_cast %c1_i32_173 : i32 to index
    %c0_200 = arith.constant 0 : index
    %323 = vector.load %arg8[%c9_199, %322, %c0_200] : memref<14x14x16xf32, #tpu.memory_space<vmem>>, vector<1x8x16xf32>
    %324 = vector.shape_cast %323 : vector<1x8x16xf32> to vector<8x16xf32>
    %325 = vector.broadcast %313 : f32 to vector<8x16xf32>
    %326 = arith.mulf %325, %321 : vector<8x16xf32>
    %327 = arith.addf %285, %326 : vector<8x16xf32>
    %328 = vector.broadcast %318 : f32 to vector<8x16xf32>
    %329 = arith.mulf %328, %324 : vector<8x16xf32>
    %330 = arith.addf %288, %329 : vector<8x16xf32>
    %c7_i32_201 = arith.constant 7 : i32
    %331 = arith.muli %c1_i32_173, %c7_i32_201 : i32
    %c3_i32_202 = arith.constant 3 : i32
    %332 = arith.addi %331, %c3_i32_202 : i32
    %333 = arith.index_cast %332 : i32 to index
    %334 = memref.load %arg2[%333] : memref<98xf32, #tpu.memory_space<smem>>
    %c7_i32_203 = arith.constant 7 : i32
    %335 = arith.muli %c1_i32_173, %c7_i32_203 : i32
    %c49_i32_204 = arith.constant 49 : i32
    %336 = arith.addi %c49_i32_204, %335 : i32
    %c3_i32_205 = arith.constant 3 : i32
    %337 = arith.addi %336, %c3_i32_205 : i32
    %338 = arith.index_cast %337 : i32 to index
    %339 = memref.load %arg2[%338] : memref<98xf32, #tpu.memory_space<smem>>
    %c3_206 = arith.constant 3 : index
    %340 = arith.index_cast %c1_i32_173 : i32 to index
    %c0_207 = arith.constant 0 : index
    %341 = vector.load %arg8[%c3_206, %340, %c0_207] : memref<14x14x16xf32, #tpu.memory_space<vmem>>, vector<1x8x16xf32>
    %342 = vector.shape_cast %341 : vector<1x8x16xf32> to vector<8x16xf32>
    %c10_208 = arith.constant 10 : index
    %343 = arith.index_cast %c1_i32_173 : i32 to index
    %c0_209 = arith.constant 0 : index
    %344 = vector.load %arg8[%c10_208, %343, %c0_209] : memref<14x14x16xf32, #tpu.memory_space<vmem>>, vector<1x8x16xf32>
    %345 = vector.shape_cast %344 : vector<1x8x16xf32> to vector<8x16xf32>
    %346 = vector.broadcast %334 : f32 to vector<8x16xf32>
    %347 = arith.mulf %346, %342 : vector<8x16xf32>
    %348 = arith.addf %306, %347 : vector<8x16xf32>
    %349 = vector.broadcast %339 : f32 to vector<8x16xf32>
    %350 = arith.mulf %349, %345 : vector<8x16xf32>
    %351 = arith.addf %309, %350 : vector<8x16xf32>
    %c7_i32_210 = arith.constant 7 : i32
    %352 = arith.muli %c1_i32_173, %c7_i32_210 : i32
    %c4_i32_211 = arith.constant 4 : i32
    %353 = arith.addi %352, %c4_i32_211 : i32
    %354 = arith.index_cast %353 : i32 to index
    %355 = memref.load %arg2[%354] : memref<98xf32, #tpu.memory_space<smem>>
    %c7_i32_212 = arith.constant 7 : i32
    %356 = arith.muli %c1_i32_173, %c7_i32_212 : i32
    %c49_i32_213 = arith.constant 49 : i32
    %357 = arith.addi %c49_i32_213, %356 : i32
    %c4_i32_214 = arith.constant 4 : i32
    %358 = arith.addi %357, %c4_i32_214 : i32
    %359 = arith.index_cast %358 : i32 to index
    %360 = memref.load %arg2[%359] : memref<98xf32, #tpu.memory_space<smem>>
    %c4_215 = arith.constant 4 : index
    %361 = arith.index_cast %c1_i32_173 : i32 to index
    %c0_216 = arith.constant 0 : index
    %362 = vector.load %arg8[%c4_215, %361, %c0_216] : memref<14x14x16xf32, #tpu.memory_space<vmem>>, vector<1x8x16xf32>
    %363 = vector.shape_cast %362 : vector<1x8x16xf32> to vector<8x16xf32>
    %c11_217 = arith.constant 11 : index
    %364 = arith.index_cast %c1_i32_173 : i32 to index
    %c0_218 = arith.constant 0 : index
    %365 = vector.load %arg8[%c11_217, %364, %c0_218] : memref<14x14x16xf32, #tpu.memory_space<vmem>>, vector<1x8x16xf32>
    %366 = vector.shape_cast %365 : vector<1x8x16xf32> to vector<8x16xf32>
    %367 = vector.broadcast %355 : f32 to vector<8x16xf32>
    %368 = arith.mulf %367, %363 : vector<8x16xf32>
    %369 = arith.addf %327, %368 : vector<8x16xf32>
    %370 = vector.broadcast %360 : f32 to vector<8x16xf32>
    %371 = arith.mulf %370, %366 : vector<8x16xf32>
    %372 = arith.addf %330, %371 : vector<8x16xf32>
    %c7_i32_219 = arith.constant 7 : i32
    %373 = arith.muli %c1_i32_173, %c7_i32_219 : i32
    %c5_i32_220 = arith.constant 5 : i32
    %374 = arith.addi %373, %c5_i32_220 : i32
    %375 = arith.index_cast %374 : i32 to index
    %376 = memref.load %arg2[%375] : memref<98xf32, #tpu.memory_space<smem>>
    %c7_i32_221 = arith.constant 7 : i32
    %377 = arith.muli %c1_i32_173, %c7_i32_221 : i32
    %c49_i32_222 = arith.constant 49 : i32
    %378 = arith.addi %c49_i32_222, %377 : i32
    %c5_i32_223 = arith.constant 5 : i32
    %379 = arith.addi %378, %c5_i32_223 : i32
    %380 = arith.index_cast %379 : i32 to index
    %381 = memref.load %arg2[%380] : memref<98xf32, #tpu.memory_space<smem>>
    %c5_224 = arith.constant 5 : index
    %382 = arith.index_cast %c1_i32_173 : i32 to index
    %c0_225 = arith.constant 0 : index
    %383 = vector.load %arg8[%c5_224, %382, %c0_225] : memref<14x14x16xf32, #tpu.memory_space<vmem>>, vector<1x8x16xf32>
    %384 = vector.shape_cast %383 : vector<1x8x16xf32> to vector<8x16xf32>
    %c12_226 = arith.constant 12 : index
    %385 = arith.index_cast %c1_i32_173 : i32 to index
    %c0_227 = arith.constant 0 : index
    %386 = vector.load %arg8[%c12_226, %385, %c0_227] : memref<14x14x16xf32, #tpu.memory_space<vmem>>, vector<1x8x16xf32>
    %387 = vector.shape_cast %386 : vector<1x8x16xf32> to vector<8x16xf32>
    %388 = vector.broadcast %376 : f32 to vector<8x16xf32>
    %389 = arith.mulf %388, %384 : vector<8x16xf32>
    %390 = arith.addf %348, %389 : vector<8x16xf32>
    %391 = vector.broadcast %381 : f32 to vector<8x16xf32>
    %392 = arith.mulf %391, %387 : vector<8x16xf32>
    %393 = arith.addf %351, %392 : vector<8x16xf32>
    %c7_i32_228 = arith.constant 7 : i32
    %394 = arith.muli %c1_i32_173, %c7_i32_228 : i32
    %c6_i32_229 = arith.constant 6 : i32
    %395 = arith.addi %394, %c6_i32_229 : i32
    %396 = arith.index_cast %395 : i32 to index
    %397 = memref.load %arg2[%396] : memref<98xf32, #tpu.memory_space<smem>>
    %c7_i32_230 = arith.constant 7 : i32
    %398 = arith.muli %c1_i32_173, %c7_i32_230 : i32
    %c49_i32_231 = arith.constant 49 : i32
    %399 = arith.addi %c49_i32_231, %398 : i32
    %c6_i32_232 = arith.constant 6 : i32
    %400 = arith.addi %399, %c6_i32_232 : i32
    %401 = arith.index_cast %400 : i32 to index
    %402 = memref.load %arg2[%401] : memref<98xf32, #tpu.memory_space<smem>>
    %c6_233 = arith.constant 6 : index
    %403 = arith.index_cast %c1_i32_173 : i32 to index
    %c0_234 = arith.constant 0 : index
    %404 = vector.load %arg8[%c6_233, %403, %c0_234] : memref<14x14x16xf32, #tpu.memory_space<vmem>>, vector<1x8x16xf32>
    %405 = vector.shape_cast %404 : vector<1x8x16xf32> to vector<8x16xf32>
    %c13_235 = arith.constant 13 : index
    %406 = arith.index_cast %c1_i32_173 : i32 to index
    %c0_236 = arith.constant 0 : index
    %407 = vector.load %arg8[%c13_235, %406, %c0_236] : memref<14x14x16xf32, #tpu.memory_space<vmem>>, vector<1x8x16xf32>
    %408 = vector.shape_cast %407 : vector<1x8x16xf32> to vector<8x16xf32>
    %409 = vector.broadcast %397 : f32 to vector<8x16xf32>
    %410 = arith.mulf %409, %405 : vector<8x16xf32>
    %411 = arith.addf %369, %410 : vector<8x16xf32>
    %412 = vector.broadcast %402 : f32 to vector<8x16xf32>
    %413 = arith.mulf %412, %408 : vector<8x16xf32>
    %414 = arith.addf %372, %413 : vector<8x16xf32>
    %c2_i32_237 = arith.constant 2 : i32
    %c7_i32_238 = arith.constant 7 : i32
    %415 = arith.muli %c2_i32_237, %c7_i32_238 : i32
    %c0_i32_239 = arith.constant 0 : i32
    %416 = arith.addi %415, %c0_i32_239 : i32
    %417 = arith.index_cast %416 : i32 to index
    %418 = memref.load %arg2[%417] : memref<98xf32, #tpu.memory_space<smem>>
    %c7_i32_240 = arith.constant 7 : i32
    %419 = arith.muli %c2_i32_237, %c7_i32_240 : i32
    %c49_i32_241 = arith.constant 49 : i32
    %420 = arith.addi %c49_i32_241, %419 : i32
    %c0_i32_242 = arith.constant 0 : i32
    %421 = arith.addi %420, %c0_i32_242 : i32
    %422 = arith.index_cast %421 : i32 to index
    %423 = memref.load %arg2[%422] : memref<98xf32, #tpu.memory_space<smem>>
    %c0_243 = arith.constant 0 : index
    %424 = arith.index_cast %c2_i32_237 : i32 to index
    %c0_244 = arith.constant 0 : index
    %425 = vector.load %arg8[%c0_243, %424, %c0_244] : memref<14x14x16xf32, #tpu.memory_space<vmem>>, vector<1x8x16xf32>
    %426 = vector.shape_cast %425 : vector<1x8x16xf32> to vector<8x16xf32>
    %c7_245 = arith.constant 7 : index
    %427 = arith.index_cast %c2_i32_237 : i32 to index
    %c0_246 = arith.constant 0 : index
    %428 = vector.load %arg8[%c7_245, %427, %c0_246] : memref<14x14x16xf32, #tpu.memory_space<vmem>>, vector<1x8x16xf32>
    %429 = vector.shape_cast %428 : vector<1x8x16xf32> to vector<8x16xf32>
    %430 = vector.broadcast %418 : f32 to vector<8x16xf32>
    %431 = arith.mulf %430, %426 : vector<8x16xf32>
    %432 = arith.addf %411, %431 : vector<8x16xf32>
    %433 = vector.broadcast %423 : f32 to vector<8x16xf32>
    %434 = arith.mulf %433, %429 : vector<8x16xf32>
    %435 = arith.addf %414, %434 : vector<8x16xf32>
    %c7_i32_247 = arith.constant 7 : i32
    %436 = arith.muli %c2_i32_237, %c7_i32_247 : i32
    %c1_i32_248 = arith.constant 1 : i32
    %437 = arith.addi %436, %c1_i32_248 : i32
    %438 = arith.index_cast %437 : i32 to index
    %439 = memref.load %arg2[%438] : memref<98xf32, #tpu.memory_space<smem>>
    %c7_i32_249 = arith.constant 7 : i32
    %440 = arith.muli %c2_i32_237, %c7_i32_249 : i32
    %c49_i32_250 = arith.constant 49 : i32
    %441 = arith.addi %c49_i32_250, %440 : i32
    %c1_i32_251 = arith.constant 1 : i32
    %442 = arith.addi %441, %c1_i32_251 : i32
    %443 = arith.index_cast %442 : i32 to index
    %444 = memref.load %arg2[%443] : memref<98xf32, #tpu.memory_space<smem>>
    %c1_252 = arith.constant 1 : index
    %445 = arith.index_cast %c2_i32_237 : i32 to index
    %c0_253 = arith.constant 0 : index
    %446 = vector.load %arg8[%c1_252, %445, %c0_253] : memref<14x14x16xf32, #tpu.memory_space<vmem>>, vector<1x8x16xf32>
    %447 = vector.shape_cast %446 : vector<1x8x16xf32> to vector<8x16xf32>
    %c8_254 = arith.constant 8 : index
    %448 = arith.index_cast %c2_i32_237 : i32 to index
    %c0_255 = arith.constant 0 : index
    %449 = vector.load %arg8[%c8_254, %448, %c0_255] : memref<14x14x16xf32, #tpu.memory_space<vmem>>, vector<1x8x16xf32>
    %450 = vector.shape_cast %449 : vector<1x8x16xf32> to vector<8x16xf32>
    %451 = vector.broadcast %439 : f32 to vector<8x16xf32>
    %452 = arith.mulf %451, %447 : vector<8x16xf32>
    %453 = arith.addf %390, %452 : vector<8x16xf32>
    %454 = vector.broadcast %444 : f32 to vector<8x16xf32>
    %455 = arith.mulf %454, %450 : vector<8x16xf32>
    %456 = arith.addf %393, %455 : vector<8x16xf32>
    %c7_i32_256 = arith.constant 7 : i32
    %457 = arith.muli %c2_i32_237, %c7_i32_256 : i32
    %c2_i32_257 = arith.constant 2 : i32
    %458 = arith.addi %457, %c2_i32_257 : i32
    %459 = arith.index_cast %458 : i32 to index
    %460 = memref.load %arg2[%459] : memref<98xf32, #tpu.memory_space<smem>>
    %c7_i32_258 = arith.constant 7 : i32
    %461 = arith.muli %c2_i32_237, %c7_i32_258 : i32
    %c49_i32_259 = arith.constant 49 : i32
    %462 = arith.addi %c49_i32_259, %461 : i32
    %c2_i32_260 = arith.constant 2 : i32
    %463 = arith.addi %462, %c2_i32_260 : i32
    %464 = arith.index_cast %463 : i32 to index
    %465 = memref.load %arg2[%464] : memref<98xf32, #tpu.memory_space<smem>>
    %c2_261 = arith.constant 2 : index
    %466 = arith.index_cast %c2_i32_237 : i32 to index
    %c0_262 = arith.constant 0 : index
    %467 = vector.load %arg8[%c2_261, %466, %c0_262] : memref<14x14x16xf32, #tpu.memory_space<vmem>>, vector<1x8x16xf32>
    %468 = vector.shape_cast %467 : vector<1x8x16xf32> to vector<8x16xf32>
    %c9_263 = arith.constant 9 : index
    %469 = arith.index_cast %c2_i32_237 : i32 to index
    %c0_264 = arith.constant 0 : index
    %470 = vector.load %arg8[%c9_263, %469, %c0_264] : memref<14x14x16xf32, #tpu.memory_space<vmem>>, vector<1x8x16xf32>
    %471 = vector.shape_cast %470 : vector<1x8x16xf32> to vector<8x16xf32>
    %472 = vector.broadcast %460 : f32 to vector<8x16xf32>
    %473 = arith.mulf %472, %468 : vector<8x16xf32>
    %474 = arith.addf %432, %473 : vector<8x16xf32>
    %475 = vector.broadcast %465 : f32 to vector<8x16xf32>
    %476 = arith.mulf %475, %471 : vector<8x16xf32>
    %477 = arith.addf %435, %476 : vector<8x16xf32>
    %c7_i32_265 = arith.constant 7 : i32
    %478 = arith.muli %c2_i32_237, %c7_i32_265 : i32
    %c3_i32_266 = arith.constant 3 : i32
    %479 = arith.addi %478, %c3_i32_266 : i32
    %480 = arith.index_cast %479 : i32 to index
    %481 = memref.load %arg2[%480] : memref<98xf32, #tpu.memory_space<smem>>
    %c7_i32_267 = arith.constant 7 : i32
    %482 = arith.muli %c2_i32_237, %c7_i32_267 : i32
    %c49_i32_268 = arith.constant 49 : i32
    %483 = arith.addi %c49_i32_268, %482 : i32
    %c3_i32_269 = arith.constant 3 : i32
    %484 = arith.addi %483, %c3_i32_269 : i32
    %485 = arith.index_cast %484 : i32 to index
    %486 = memref.load %arg2[%485] : memref<98xf32, #tpu.memory_space<smem>>
    %c3_270 = arith.constant 3 : index
    %487 = arith.index_cast %c2_i32_237 : i32 to index
    %c0_271 = arith.constant 0 : index
    %488 = vector.load %arg8[%c3_270, %487, %c0_271] : memref<14x14x16xf32, #tpu.memory_space<vmem>>, vector<1x8x16xf32>
    %489 = vector.shape_cast %488 : vector<1x8x16xf32> to vector<8x16xf32>
    %c10_272 = arith.constant 10 : index
    %490 = arith.index_cast %c2_i32_237 : i32 to index
    %c0_273 = arith.constant 0 : index
    %491 = vector.load %arg8[%c10_272, %490, %c0_273] : memref<14x14x16xf32, #tpu.memory_space<vmem>>, vector<1x8x16xf32>
    %492 = vector.shape_cast %491 : vector<1x8x16xf32> to vector<8x16xf32>
    %493 = vector.broadcast %481 : f32 to vector<8x16xf32>
    %494 = arith.mulf %493, %489 : vector<8x16xf32>
    %495 = arith.addf %453, %494 : vector<8x16xf32>
    %496 = vector.broadcast %486 : f32 to vector<8x16xf32>
    %497 = arith.mulf %496, %492 : vector<8x16xf32>
    %498 = arith.addf %456, %497 : vector<8x16xf32>
    %c7_i32_274 = arith.constant 7 : i32
    %499 = arith.muli %c2_i32_237, %c7_i32_274 : i32
    %c4_i32_275 = arith.constant 4 : i32
    %500 = arith.addi %499, %c4_i32_275 : i32
    %501 = arith.index_cast %500 : i32 to index
    %502 = memref.load %arg2[%501] : memref<98xf32, #tpu.memory_space<smem>>
    %c7_i32_276 = arith.constant 7 : i32
    %503 = arith.muli %c2_i32_237, %c7_i32_276 : i32
    %c49_i32_277 = arith.constant 49 : i32
    %504 = arith.addi %c49_i32_277, %503 : i32
    %c4_i32_278 = arith.constant 4 : i32
    %505 = arith.addi %504, %c4_i32_278 : i32
    %506 = arith.index_cast %505 : i32 to index
    %507 = memref.load %arg2[%506] : memref<98xf32, #tpu.memory_space<smem>>
    %c4_279 = arith.constant 4 : index
    %508 = arith.index_cast %c2_i32_237 : i32 to index
    %c0_280 = arith.constant 0 : index
    %509 = vector.load %arg8[%c4_279, %508, %c0_280] : memref<14x14x16xf32, #tpu.memory_space<vmem>>, vector<1x8x16xf32>
    %510 = vector.shape_cast %509 : vector<1x8x16xf32> to vector<8x16xf32>
    %c11_281 = arith.constant 11 : index
    %511 = arith.index_cast %c2_i32_237 : i32 to index
    %c0_282 = arith.constant 0 : index
    %512 = vector.load %arg8[%c11_281, %511, %c0_282] : memref<14x14x16xf32, #tpu.memory_space<vmem>>, vector<1x8x16xf32>
    %513 = vector.shape_cast %512 : vector<1x8x16xf32> to vector<8x16xf32>
    %514 = vector.broadcast %502 : f32 to vector<8x16xf32>
    %515 = arith.mulf %514, %510 : vector<8x16xf32>
    %516 = arith.addf %474, %515 : vector<8x16xf32>
    %517 = vector.broadcast %507 : f32 to vector<8x16xf32>
    %518 = arith.mulf %517, %513 : vector<8x16xf32>
    %519 = arith.addf %477, %518 : vector<8x16xf32>
    %c7_i32_283 = arith.constant 7 : i32
    %520 = arith.muli %c2_i32_237, %c7_i32_283 : i32
    %c5_i32_284 = arith.constant 5 : i32
    %521 = arith.addi %520, %c5_i32_284 : i32
    %522 = arith.index_cast %521 : i32 to index
    %523 = memref.load %arg2[%522] : memref<98xf32, #tpu.memory_space<smem>>
    %c7_i32_285 = arith.constant 7 : i32
    %524 = arith.muli %c2_i32_237, %c7_i32_285 : i32
    %c49_i32_286 = arith.constant 49 : i32
    %525 = arith.addi %c49_i32_286, %524 : i32
    %c5_i32_287 = arith.constant 5 : i32
    %526 = arith.addi %525, %c5_i32_287 : i32
    %527 = arith.index_cast %526 : i32 to index
    %528 = memref.load %arg2[%527] : memref<98xf32, #tpu.memory_space<smem>>
    %c5_288 = arith.constant 5 : index
    %529 = arith.index_cast %c2_i32_237 : i32 to index
    %c0_289 = arith.constant 0 : index
    %530 = vector.load %arg8[%c5_288, %529, %c0_289] : memref<14x14x16xf32, #tpu.memory_space<vmem>>, vector<1x8x16xf32>
    %531 = vector.shape_cast %530 : vector<1x8x16xf32> to vector<8x16xf32>
    %c12_290 = arith.constant 12 : index
    %532 = arith.index_cast %c2_i32_237 : i32 to index
    %c0_291 = arith.constant 0 : index
    %533 = vector.load %arg8[%c12_290, %532, %c0_291] : memref<14x14x16xf32, #tpu.memory_space<vmem>>, vector<1x8x16xf32>
    %534 = vector.shape_cast %533 : vector<1x8x16xf32> to vector<8x16xf32>
    %535 = vector.broadcast %523 : f32 to vector<8x16xf32>
    %536 = arith.mulf %535, %531 : vector<8x16xf32>
    %537 = arith.addf %495, %536 : vector<8x16xf32>
    %538 = vector.broadcast %528 : f32 to vector<8x16xf32>
    %539 = arith.mulf %538, %534 : vector<8x16xf32>
    %540 = arith.addf %498, %539 : vector<8x16xf32>
    %c7_i32_292 = arith.constant 7 : i32
    %541 = arith.muli %c2_i32_237, %c7_i32_292 : i32
    %c6_i32_293 = arith.constant 6 : i32
    %542 = arith.addi %541, %c6_i32_293 : i32
    %543 = arith.index_cast %542 : i32 to index
    %544 = memref.load %arg2[%543] : memref<98xf32, #tpu.memory_space<smem>>
    %c7_i32_294 = arith.constant 7 : i32
    %545 = arith.muli %c2_i32_237, %c7_i32_294 : i32
    %c49_i32_295 = arith.constant 49 : i32
    %546 = arith.addi %c49_i32_295, %545 : i32
    %c6_i32_296 = arith.constant 6 : i32
    %547 = arith.addi %546, %c6_i32_296 : i32
    %548 = arith.index_cast %547 : i32 to index
    %549 = memref.load %arg2[%548] : memref<98xf32, #tpu.memory_space<smem>>
    %c6_297 = arith.constant 6 : index
    %550 = arith.index_cast %c2_i32_237 : i32 to index
    %c0_298 = arith.constant 0 : index
    %551 = vector.load %arg8[%c6_297, %550, %c0_298] : memref<14x14x16xf32, #tpu.memory_space<vmem>>, vector<1x8x16xf32>
    %552 = vector.shape_cast %551 : vector<1x8x16xf32> to vector<8x16xf32>
    %c13_299 = arith.constant 13 : index
    %553 = arith.index_cast %c2_i32_237 : i32 to index
    %c0_300 = arith.constant 0 : index
    %554 = vector.load %arg8[%c13_299, %553, %c0_300] : memref<14x14x16xf32, #tpu.memory_space<vmem>>, vector<1x8x16xf32>
    %555 = vector.shape_cast %554 : vector<1x8x16xf32> to vector<8x16xf32>
    %556 = vector.broadcast %544 : f32 to vector<8x16xf32>
    %557 = arith.mulf %556, %552 : vector<8x16xf32>
    %558 = arith.addf %516, %557 : vector<8x16xf32>
    %559 = vector.broadcast %549 : f32 to vector<8x16xf32>
    %560 = arith.mulf %559, %555 : vector<8x16xf32>
    %561 = arith.addf %519, %560 : vector<8x16xf32>
    %c3_i32_301 = arith.constant 3 : i32
    %c7_i32_302 = arith.constant 7 : i32
    %562 = arith.muli %c3_i32_301, %c7_i32_302 : i32
    %c0_i32_303 = arith.constant 0 : i32
    %563 = arith.addi %562, %c0_i32_303 : i32
    %564 = arith.index_cast %563 : i32 to index
    %565 = memref.load %arg2[%564] : memref<98xf32, #tpu.memory_space<smem>>
    %c7_i32_304 = arith.constant 7 : i32
    %566 = arith.muli %c3_i32_301, %c7_i32_304 : i32
    %c49_i32_305 = arith.constant 49 : i32
    %567 = arith.addi %c49_i32_305, %566 : i32
    %c0_i32_306 = arith.constant 0 : i32
    %568 = arith.addi %567, %c0_i32_306 : i32
    %569 = arith.index_cast %568 : i32 to index
    %570 = memref.load %arg2[%569] : memref<98xf32, #tpu.memory_space<smem>>
    %c0_307 = arith.constant 0 : index
    %571 = arith.index_cast %c3_i32_301 : i32 to index
    %c0_308 = arith.constant 0 : index
    %572 = vector.load %arg8[%c0_307, %571, %c0_308] : memref<14x14x16xf32, #tpu.memory_space<vmem>>, vector<1x8x16xf32>
    %573 = vector.shape_cast %572 : vector<1x8x16xf32> to vector<8x16xf32>
    %c7_309 = arith.constant 7 : index
    %574 = arith.index_cast %c3_i32_301 : i32 to index
    %c0_310 = arith.constant 0 : index
    %575 = vector.load %arg8[%c7_309, %574, %c0_310] : memref<14x14x16xf32, #tpu.memory_space<vmem>>, vector<1x8x16xf32>
    %576 = vector.shape_cast %575 : vector<1x8x16xf32> to vector<8x16xf32>
    %577 = vector.broadcast %565 : f32 to vector<8x16xf32>
    %578 = arith.mulf %577, %573 : vector<8x16xf32>
    %579 = arith.addf %558, %578 : vector<8x16xf32>
    %580 = vector.broadcast %570 : f32 to vector<8x16xf32>
    %581 = arith.mulf %580, %576 : vector<8x16xf32>
    %582 = arith.addf %561, %581 : vector<8x16xf32>
    %c7_i32_311 = arith.constant 7 : i32
    %583 = arith.muli %c3_i32_301, %c7_i32_311 : i32
    %c1_i32_312 = arith.constant 1 : i32
    %584 = arith.addi %583, %c1_i32_312 : i32
    %585 = arith.index_cast %584 : i32 to index
    %586 = memref.load %arg2[%585] : memref<98xf32, #tpu.memory_space<smem>>
    %c7_i32_313 = arith.constant 7 : i32
    %587 = arith.muli %c3_i32_301, %c7_i32_313 : i32
    %c49_i32_314 = arith.constant 49 : i32
    %588 = arith.addi %c49_i32_314, %587 : i32
    %c1_i32_315 = arith.constant 1 : i32
    %589 = arith.addi %588, %c1_i32_315 : i32
    %590 = arith.index_cast %589 : i32 to index
    %591 = memref.load %arg2[%590] : memref<98xf32, #tpu.memory_space<smem>>
    %c1_316 = arith.constant 1 : index
    %592 = arith.index_cast %c3_i32_301 : i32 to index
    %c0_317 = arith.constant 0 : index
    %593 = vector.load %arg8[%c1_316, %592, %c0_317] : memref<14x14x16xf32, #tpu.memory_space<vmem>>, vector<1x8x16xf32>
    %594 = vector.shape_cast %593 : vector<1x8x16xf32> to vector<8x16xf32>
    %c8_318 = arith.constant 8 : index
    %595 = arith.index_cast %c3_i32_301 : i32 to index
    %c0_319 = arith.constant 0 : index
    %596 = vector.load %arg8[%c8_318, %595, %c0_319] : memref<14x14x16xf32, #tpu.memory_space<vmem>>, vector<1x8x16xf32>
    %597 = vector.shape_cast %596 : vector<1x8x16xf32> to vector<8x16xf32>
    %598 = vector.broadcast %586 : f32 to vector<8x16xf32>
    %599 = arith.mulf %598, %594 : vector<8x16xf32>
    %600 = arith.addf %537, %599 : vector<8x16xf32>
    %601 = vector.broadcast %591 : f32 to vector<8x16xf32>
    %602 = arith.mulf %601, %597 : vector<8x16xf32>
    %603 = arith.addf %540, %602 : vector<8x16xf32>
    %c7_i32_320 = arith.constant 7 : i32
    %604 = arith.muli %c3_i32_301, %c7_i32_320 : i32
    %c2_i32_321 = arith.constant 2 : i32
    %605 = arith.addi %604, %c2_i32_321 : i32
    %606 = arith.index_cast %605 : i32 to index
    %607 = memref.load %arg2[%606] : memref<98xf32, #tpu.memory_space<smem>>
    %c7_i32_322 = arith.constant 7 : i32
    %608 = arith.muli %c3_i32_301, %c7_i32_322 : i32
    %c49_i32_323 = arith.constant 49 : i32
    %609 = arith.addi %c49_i32_323, %608 : i32
    %c2_i32_324 = arith.constant 2 : i32
    %610 = arith.addi %609, %c2_i32_324 : i32
    %611 = arith.index_cast %610 : i32 to index
    %612 = memref.load %arg2[%611] : memref<98xf32, #tpu.memory_space<smem>>
    %c2_325 = arith.constant 2 : index
    %613 = arith.index_cast %c3_i32_301 : i32 to index
    %c0_326 = arith.constant 0 : index
    %614 = vector.load %arg8[%c2_325, %613, %c0_326] : memref<14x14x16xf32, #tpu.memory_space<vmem>>, vector<1x8x16xf32>
    %615 = vector.shape_cast %614 : vector<1x8x16xf32> to vector<8x16xf32>
    %c9_327 = arith.constant 9 : index
    %616 = arith.index_cast %c3_i32_301 : i32 to index
    %c0_328 = arith.constant 0 : index
    %617 = vector.load %arg8[%c9_327, %616, %c0_328] : memref<14x14x16xf32, #tpu.memory_space<vmem>>, vector<1x8x16xf32>
    %618 = vector.shape_cast %617 : vector<1x8x16xf32> to vector<8x16xf32>
    %619 = vector.broadcast %607 : f32 to vector<8x16xf32>
    %620 = arith.mulf %619, %615 : vector<8x16xf32>
    %621 = arith.addf %579, %620 : vector<8x16xf32>
    %622 = vector.broadcast %612 : f32 to vector<8x16xf32>
    %623 = arith.mulf %622, %618 : vector<8x16xf32>
    %624 = arith.addf %582, %623 : vector<8x16xf32>
    %c7_i32_329 = arith.constant 7 : i32
    %625 = arith.muli %c3_i32_301, %c7_i32_329 : i32
    %c3_i32_330 = arith.constant 3 : i32
    %626 = arith.addi %625, %c3_i32_330 : i32
    %627 = arith.index_cast %626 : i32 to index
    %628 = memref.load %arg2[%627] : memref<98xf32, #tpu.memory_space<smem>>
    %c7_i32_331 = arith.constant 7 : i32
    %629 = arith.muli %c3_i32_301, %c7_i32_331 : i32
    %c49_i32_332 = arith.constant 49 : i32
    %630 = arith.addi %c49_i32_332, %629 : i32
    %c3_i32_333 = arith.constant 3 : i32
    %631 = arith.addi %630, %c3_i32_333 : i32
    %632 = arith.index_cast %631 : i32 to index
    %633 = memref.load %arg2[%632] : memref<98xf32, #tpu.memory_space<smem>>
    %c3_334 = arith.constant 3 : index
    %634 = arith.index_cast %c3_i32_301 : i32 to index
    %c0_335 = arith.constant 0 : index
    %635 = vector.load %arg8[%c3_334, %634, %c0_335] : memref<14x14x16xf32, #tpu.memory_space<vmem>>, vector<1x8x16xf32>
    %636 = vector.shape_cast %635 : vector<1x8x16xf32> to vector<8x16xf32>
    %c10_336 = arith.constant 10 : index
    %637 = arith.index_cast %c3_i32_301 : i32 to index
    %c0_337 = arith.constant 0 : index
    %638 = vector.load %arg8[%c10_336, %637, %c0_337] : memref<14x14x16xf32, #tpu.memory_space<vmem>>, vector<1x8x16xf32>
    %639 = vector.shape_cast %638 : vector<1x8x16xf32> to vector<8x16xf32>
    %640 = vector.broadcast %628 : f32 to vector<8x16xf32>
    %641 = arith.mulf %640, %636 : vector<8x16xf32>
    %642 = arith.addf %600, %641 : vector<8x16xf32>
    %643 = vector.broadcast %633 : f32 to vector<8x16xf32>
    %644 = arith.mulf %643, %639 : vector<8x16xf32>
    %645 = arith.addf %603, %644 : vector<8x16xf32>
    %c7_i32_338 = arith.constant 7 : i32
    %646 = arith.muli %c3_i32_301, %c7_i32_338 : i32
    %c4_i32_339 = arith.constant 4 : i32
    %647 = arith.addi %646, %c4_i32_339 : i32
    %648 = arith.index_cast %647 : i32 to index
    %649 = memref.load %arg2[%648] : memref<98xf32, #tpu.memory_space<smem>>
    %c7_i32_340 = arith.constant 7 : i32
    %650 = arith.muli %c3_i32_301, %c7_i32_340 : i32
    %c49_i32_341 = arith.constant 49 : i32
    %651 = arith.addi %c49_i32_341, %650 : i32
    %c4_i32_342 = arith.constant 4 : i32
    %652 = arith.addi %651, %c4_i32_342 : i32
    %653 = arith.index_cast %652 : i32 to index
    %654 = memref.load %arg2[%653] : memref<98xf32, #tpu.memory_space<smem>>
    %c4_343 = arith.constant 4 : index
    %655 = arith.index_cast %c3_i32_301 : i32 to index
    %c0_344 = arith.constant 0 : index
    %656 = vector.load %arg8[%c4_343, %655, %c0_344] : memref<14x14x16xf32, #tpu.memory_space<vmem>>, vector<1x8x16xf32>
    %657 = vector.shape_cast %656 : vector<1x8x16xf32> to vector<8x16xf32>
    %c11_345 = arith.constant 11 : index
    %658 = arith.index_cast %c3_i32_301 : i32 to index
    %c0_346 = arith.constant 0 : index
    %659 = vector.load %arg8[%c11_345, %658, %c0_346] : memref<14x14x16xf32, #tpu.memory_space<vmem>>, vector<1x8x16xf32>
    %660 = vector.shape_cast %659 : vector<1x8x16xf32> to vector<8x16xf32>
    %661 = vector.broadcast %649 : f32 to vector<8x16xf32>
    %662 = arith.mulf %661, %657 : vector<8x16xf32>
    %663 = arith.addf %621, %662 : vector<8x16xf32>
    %664 = vector.broadcast %654 : f32 to vector<8x16xf32>
    %665 = arith.mulf %664, %660 : vector<8x16xf32>
    %666 = arith.addf %624, %665 : vector<8x16xf32>
    %c7_i32_347 = arith.constant 7 : i32
    %667 = arith.muli %c3_i32_301, %c7_i32_347 : i32
    %c5_i32_348 = arith.constant 5 : i32
    %668 = arith.addi %667, %c5_i32_348 : i32
    %669 = arith.index_cast %668 : i32 to index
    %670 = memref.load %arg2[%669] : memref<98xf32, #tpu.memory_space<smem>>
    %c7_i32_349 = arith.constant 7 : i32
    %671 = arith.muli %c3_i32_301, %c7_i32_349 : i32
    %c49_i32_350 = arith.constant 49 : i32
    %672 = arith.addi %c49_i32_350, %671 : i32
    %c5_i32_351 = arith.constant 5 : i32
    %673 = arith.addi %672, %c5_i32_351 : i32
    %674 = arith.index_cast %673 : i32 to index
    %675 = memref.load %arg2[%674] : memref<98xf32, #tpu.memory_space<smem>>
    %c5_352 = arith.constant 5 : index
    %676 = arith.index_cast %c3_i32_301 : i32 to index
    %c0_353 = arith.constant 0 : index
    %677 = vector.load %arg8[%c5_352, %676, %c0_353] : memref<14x14x16xf32, #tpu.memory_space<vmem>>, vector<1x8x16xf32>
    %678 = vector.shape_cast %677 : vector<1x8x16xf32> to vector<8x16xf32>
    %c12_354 = arith.constant 12 : index
    %679 = arith.index_cast %c3_i32_301 : i32 to index
    %c0_355 = arith.constant 0 : index
    %680 = vector.load %arg8[%c12_354, %679, %c0_355] : memref<14x14x16xf32, #tpu.memory_space<vmem>>, vector<1x8x16xf32>
    %681 = vector.shape_cast %680 : vector<1x8x16xf32> to vector<8x16xf32>
    %682 = vector.broadcast %670 : f32 to vector<8x16xf32>
    %683 = arith.mulf %682, %678 : vector<8x16xf32>
    %684 = arith.addf %642, %683 : vector<8x16xf32>
    %685 = vector.broadcast %675 : f32 to vector<8x16xf32>
    %686 = arith.mulf %685, %681 : vector<8x16xf32>
    %687 = arith.addf %645, %686 : vector<8x16xf32>
    %c7_i32_356 = arith.constant 7 : i32
    %688 = arith.muli %c3_i32_301, %c7_i32_356 : i32
    %c6_i32_357 = arith.constant 6 : i32
    %689 = arith.addi %688, %c6_i32_357 : i32
    %690 = arith.index_cast %689 : i32 to index
    %691 = memref.load %arg2[%690] : memref<98xf32, #tpu.memory_space<smem>>
    %c7_i32_358 = arith.constant 7 : i32
    %692 = arith.muli %c3_i32_301, %c7_i32_358 : i32
    %c49_i32_359 = arith.constant 49 : i32
    %693 = arith.addi %c49_i32_359, %692 : i32
    %c6_i32_360 = arith.constant 6 : i32
    %694 = arith.addi %693, %c6_i32_360 : i32
    %695 = arith.index_cast %694 : i32 to index
    %696 = memref.load %arg2[%695] : memref<98xf32, #tpu.memory_space<smem>>
    %c6_361 = arith.constant 6 : index
    %697 = arith.index_cast %c3_i32_301 : i32 to index
    %c0_362 = arith.constant 0 : index
    %698 = vector.load %arg8[%c6_361, %697, %c0_362] : memref<14x14x16xf32, #tpu.memory_space<vmem>>, vector<1x8x16xf32>
    %699 = vector.shape_cast %698 : vector<1x8x16xf32> to vector<8x16xf32>
    %c13_363 = arith.constant 13 : index
    %700 = arith.index_cast %c3_i32_301 : i32 to index
    %c0_364 = arith.constant 0 : index
    %701 = vector.load %arg8[%c13_363, %700, %c0_364] : memref<14x14x16xf32, #tpu.memory_space<vmem>>, vector<1x8x16xf32>
    %702 = vector.shape_cast %701 : vector<1x8x16xf32> to vector<8x16xf32>
    %703 = vector.broadcast %691 : f32 to vector<8x16xf32>
    %704 = arith.mulf %703, %699 : vector<8x16xf32>
    %705 = arith.addf %663, %704 : vector<8x16xf32>
    %706 = vector.broadcast %696 : f32 to vector<8x16xf32>
    %707 = arith.mulf %706, %702 : vector<8x16xf32>
    %708 = arith.addf %666, %707 : vector<8x16xf32>
    %c4_i32_365 = arith.constant 4 : i32
    %c7_i32_366 = arith.constant 7 : i32
    %709 = arith.muli %c4_i32_365, %c7_i32_366 : i32
    %c0_i32_367 = arith.constant 0 : i32
    %710 = arith.addi %709, %c0_i32_367 : i32
    %711 = arith.index_cast %710 : i32 to index
    %712 = memref.load %arg2[%711] : memref<98xf32, #tpu.memory_space<smem>>
    %c7_i32_368 = arith.constant 7 : i32
    %713 = arith.muli %c4_i32_365, %c7_i32_368 : i32
    %c49_i32_369 = arith.constant 49 : i32
    %714 = arith.addi %c49_i32_369, %713 : i32
    %c0_i32_370 = arith.constant 0 : i32
    %715 = arith.addi %714, %c0_i32_370 : i32
    %716 = arith.index_cast %715 : i32 to index
    %717 = memref.load %arg2[%716] : memref<98xf32, #tpu.memory_space<smem>>
    %c0_371 = arith.constant 0 : index
    %718 = arith.index_cast %c4_i32_365 : i32 to index
    %c0_372 = arith.constant 0 : index
    %719 = vector.load %arg8[%c0_371, %718, %c0_372] : memref<14x14x16xf32, #tpu.memory_space<vmem>>, vector<1x8x16xf32>
    %720 = vector.shape_cast %719 : vector<1x8x16xf32> to vector<8x16xf32>
    %c7_373 = arith.constant 7 : index
    %721 = arith.index_cast %c4_i32_365 : i32 to index
    %c0_374 = arith.constant 0 : index
    %722 = vector.load %arg8[%c7_373, %721, %c0_374] : memref<14x14x16xf32, #tpu.memory_space<vmem>>, vector<1x8x16xf32>
    %723 = vector.shape_cast %722 : vector<1x8x16xf32> to vector<8x16xf32>
    %724 = vector.broadcast %712 : f32 to vector<8x16xf32>
    %725 = arith.mulf %724, %720 : vector<8x16xf32>
    %726 = arith.addf %705, %725 : vector<8x16xf32>
    %727 = vector.broadcast %717 : f32 to vector<8x16xf32>
    %728 = arith.mulf %727, %723 : vector<8x16xf32>
    %729 = arith.addf %708, %728 : vector<8x16xf32>
    %c7_i32_375 = arith.constant 7 : i32
    %730 = arith.muli %c4_i32_365, %c7_i32_375 : i32
    %c1_i32_376 = arith.constant 1 : i32
    %731 = arith.addi %730, %c1_i32_376 : i32
    %732 = arith.index_cast %731 : i32 to index
    %733 = memref.load %arg2[%732] : memref<98xf32, #tpu.memory_space<smem>>
    %c7_i32_377 = arith.constant 7 : i32
    %734 = arith.muli %c4_i32_365, %c7_i32_377 : i32
    %c49_i32_378 = arith.constant 49 : i32
    %735 = arith.addi %c49_i32_378, %734 : i32
    %c1_i32_379 = arith.constant 1 : i32
    %736 = arith.addi %735, %c1_i32_379 : i32
    %737 = arith.index_cast %736 : i32 to index
    %738 = memref.load %arg2[%737] : memref<98xf32, #tpu.memory_space<smem>>
    %c1_380 = arith.constant 1 : index
    %739 = arith.index_cast %c4_i32_365 : i32 to index
    %c0_381 = arith.constant 0 : index
    %740 = vector.load %arg8[%c1_380, %739, %c0_381] : memref<14x14x16xf32, #tpu.memory_space<vmem>>, vector<1x8x16xf32>
    %741 = vector.shape_cast %740 : vector<1x8x16xf32> to vector<8x16xf32>
    %c8_382 = arith.constant 8 : index
    %742 = arith.index_cast %c4_i32_365 : i32 to index
    %c0_383 = arith.constant 0 : index
    %743 = vector.load %arg8[%c8_382, %742, %c0_383] : memref<14x14x16xf32, #tpu.memory_space<vmem>>, vector<1x8x16xf32>
    %744 = vector.shape_cast %743 : vector<1x8x16xf32> to vector<8x16xf32>
    %745 = vector.broadcast %733 : f32 to vector<8x16xf32>
    %746 = arith.mulf %745, %741 : vector<8x16xf32>
    %747 = arith.addf %684, %746 : vector<8x16xf32>
    %748 = vector.broadcast %738 : f32 to vector<8x16xf32>
    %749 = arith.mulf %748, %744 : vector<8x16xf32>
    %750 = arith.addf %687, %749 : vector<8x16xf32>
    %c7_i32_384 = arith.constant 7 : i32
    %751 = arith.muli %c4_i32_365, %c7_i32_384 : i32
    %c2_i32_385 = arith.constant 2 : i32
    %752 = arith.addi %751, %c2_i32_385 : i32
    %753 = arith.index_cast %752 : i32 to index
    %754 = memref.load %arg2[%753] : memref<98xf32, #tpu.memory_space<smem>>
    %c7_i32_386 = arith.constant 7 : i32
    %755 = arith.muli %c4_i32_365, %c7_i32_386 : i32
    %c49_i32_387 = arith.constant 49 : i32
    %756 = arith.addi %c49_i32_387, %755 : i32
    %c2_i32_388 = arith.constant 2 : i32
    %757 = arith.addi %756, %c2_i32_388 : i32
    %758 = arith.index_cast %757 : i32 to index
    %759 = memref.load %arg2[%758] : memref<98xf32, #tpu.memory_space<smem>>
    %c2_389 = arith.constant 2 : index
    %760 = arith.index_cast %c4_i32_365 : i32 to index
    %c0_390 = arith.constant 0 : index
    %761 = vector.load %arg8[%c2_389, %760, %c0_390] : memref<14x14x16xf32, #tpu.memory_space<vmem>>, vector<1x8x16xf32>
    %762 = vector.shape_cast %761 : vector<1x8x16xf32> to vector<8x16xf32>
    %c9_391 = arith.constant 9 : index
    %763 = arith.index_cast %c4_i32_365 : i32 to index
    %c0_392 = arith.constant 0 : index
    %764 = vector.load %arg8[%c9_391, %763, %c0_392] : memref<14x14x16xf32, #tpu.memory_space<vmem>>, vector<1x8x16xf32>
    %765 = vector.shape_cast %764 : vector<1x8x16xf32> to vector<8x16xf32>
    %766 = vector.broadcast %754 : f32 to vector<8x16xf32>
    %767 = arith.mulf %766, %762 : vector<8x16xf32>
    %768 = arith.addf %726, %767 : vector<8x16xf32>
    %769 = vector.broadcast %759 : f32 to vector<8x16xf32>
    %770 = arith.mulf %769, %765 : vector<8x16xf32>
    %771 = arith.addf %729, %770 : vector<8x16xf32>
    %c7_i32_393 = arith.constant 7 : i32
    %772 = arith.muli %c4_i32_365, %c7_i32_393 : i32
    %c3_i32_394 = arith.constant 3 : i32
    %773 = arith.addi %772, %c3_i32_394 : i32
    %774 = arith.index_cast %773 : i32 to index
    %775 = memref.load %arg2[%774] : memref<98xf32, #tpu.memory_space<smem>>
    %c7_i32_395 = arith.constant 7 : i32
    %776 = arith.muli %c4_i32_365, %c7_i32_395 : i32
    %c49_i32_396 = arith.constant 49 : i32
    %777 = arith.addi %c49_i32_396, %776 : i32
    %c3_i32_397 = arith.constant 3 : i32
    %778 = arith.addi %777, %c3_i32_397 : i32
    %779 = arith.index_cast %778 : i32 to index
    %780 = memref.load %arg2[%779] : memref<98xf32, #tpu.memory_space<smem>>
    %c3_398 = arith.constant 3 : index
    %781 = arith.index_cast %c4_i32_365 : i32 to index
    %c0_399 = arith.constant 0 : index
    %782 = vector.load %arg8[%c3_398, %781, %c0_399] : memref<14x14x16xf32, #tpu.memory_space<vmem>>, vector<1x8x16xf32>
    %783 = vector.shape_cast %782 : vector<1x8x16xf32> to vector<8x16xf32>
    %c10_400 = arith.constant 10 : index
    %784 = arith.index_cast %c4_i32_365 : i32 to index
    %c0_401 = arith.constant 0 : index
    %785 = vector.load %arg8[%c10_400, %784, %c0_401] : memref<14x14x16xf32, #tpu.memory_space<vmem>>, vector<1x8x16xf32>
    %786 = vector.shape_cast %785 : vector<1x8x16xf32> to vector<8x16xf32>
    %787 = vector.broadcast %775 : f32 to vector<8x16xf32>
    %788 = arith.mulf %787, %783 : vector<8x16xf32>
    %789 = arith.addf %747, %788 : vector<8x16xf32>
    %790 = vector.broadcast %780 : f32 to vector<8x16xf32>
    %791 = arith.mulf %790, %786 : vector<8x16xf32>
    %792 = arith.addf %750, %791 : vector<8x16xf32>
    %c7_i32_402 = arith.constant 7 : i32
    %793 = arith.muli %c4_i32_365, %c7_i32_402 : i32
    %c4_i32_403 = arith.constant 4 : i32
    %794 = arith.addi %793, %c4_i32_403 : i32
    %795 = arith.index_cast %794 : i32 to index
    %796 = memref.load %arg2[%795] : memref<98xf32, #tpu.memory_space<smem>>
    %c7_i32_404 = arith.constant 7 : i32
    %797 = arith.muli %c4_i32_365, %c7_i32_404 : i32
    %c49_i32_405 = arith.constant 49 : i32
    %798 = arith.addi %c49_i32_405, %797 : i32
    %c4_i32_406 = arith.constant 4 : i32
    %799 = arith.addi %798, %c4_i32_406 : i32
    %800 = arith.index_cast %799 : i32 to index
    %801 = memref.load %arg2[%800] : memref<98xf32, #tpu.memory_space<smem>>
    %c4_407 = arith.constant 4 : index
    %802 = arith.index_cast %c4_i32_365 : i32 to index
    %c0_408 = arith.constant 0 : index
    %803 = vector.load %arg8[%c4_407, %802, %c0_408] : memref<14x14x16xf32, #tpu.memory_space<vmem>>, vector<1x8x16xf32>
    %804 = vector.shape_cast %803 : vector<1x8x16xf32> to vector<8x16xf32>
    %c11_409 = arith.constant 11 : index
    %805 = arith.index_cast %c4_i32_365 : i32 to index
    %c0_410 = arith.constant 0 : index
    %806 = vector.load %arg8[%c11_409, %805, %c0_410] : memref<14x14x16xf32, #tpu.memory_space<vmem>>, vector<1x8x16xf32>
    %807 = vector.shape_cast %806 : vector<1x8x16xf32> to vector<8x16xf32>
    %808 = vector.broadcast %796 : f32 to vector<8x16xf32>
    %809 = arith.mulf %808, %804 : vector<8x16xf32>
    %810 = arith.addf %768, %809 : vector<8x16xf32>
    %811 = vector.broadcast %801 : f32 to vector<8x16xf32>
    %812 = arith.mulf %811, %807 : vector<8x16xf32>
    %813 = arith.addf %771, %812 : vector<8x16xf32>
    %c7_i32_411 = arith.constant 7 : i32
    %814 = arith.muli %c4_i32_365, %c7_i32_411 : i32
    %c5_i32_412 = arith.constant 5 : i32
    %815 = arith.addi %814, %c5_i32_412 : i32
    %816 = arith.index_cast %815 : i32 to index
    %817 = memref.load %arg2[%816] : memref<98xf32, #tpu.memory_space<smem>>
    %c7_i32_413 = arith.constant 7 : i32
    %818 = arith.muli %c4_i32_365, %c7_i32_413 : i32
    %c49_i32_414 = arith.constant 49 : i32
    %819 = arith.addi %c49_i32_414, %818 : i32
    %c5_i32_415 = arith.constant 5 : i32
    %820 = arith.addi %819, %c5_i32_415 : i32
    %821 = arith.index_cast %820 : i32 to index
    %822 = memref.load %arg2[%821] : memref<98xf32, #tpu.memory_space<smem>>
    %c5_416 = arith.constant 5 : index
    %823 = arith.index_cast %c4_i32_365 : i32 to index
    %c0_417 = arith.constant 0 : index
    %824 = vector.load %arg8[%c5_416, %823, %c0_417] : memref<14x14x16xf32, #tpu.memory_space<vmem>>, vector<1x8x16xf32>
    %825 = vector.shape_cast %824 : vector<1x8x16xf32> to vector<8x16xf32>
    %c12_418 = arith.constant 12 : index
    %826 = arith.index_cast %c4_i32_365 : i32 to index
    %c0_419 = arith.constant 0 : index
    %827 = vector.load %arg8[%c12_418, %826, %c0_419] : memref<14x14x16xf32, #tpu.memory_space<vmem>>, vector<1x8x16xf32>
    %828 = vector.shape_cast %827 : vector<1x8x16xf32> to vector<8x16xf32>
    %829 = vector.broadcast %817 : f32 to vector<8x16xf32>
    %830 = arith.mulf %829, %825 : vector<8x16xf32>
    %831 = arith.addf %789, %830 : vector<8x16xf32>
    %832 = vector.broadcast %822 : f32 to vector<8x16xf32>
    %833 = arith.mulf %832, %828 : vector<8x16xf32>
    %834 = arith.addf %792, %833 : vector<8x16xf32>
    %c7_i32_420 = arith.constant 7 : i32
    %835 = arith.muli %c4_i32_365, %c7_i32_420 : i32
    %c6_i32_421 = arith.constant 6 : i32
    %836 = arith.addi %835, %c6_i32_421 : i32
    %837 = arith.index_cast %836 : i32 to index
    %838 = memref.load %arg2[%837] : memref<98xf32, #tpu.memory_space<smem>>
    %c7_i32_422 = arith.constant 7 : i32
    %839 = arith.muli %c4_i32_365, %c7_i32_422 : i32
    %c49_i32_423 = arith.constant 49 : i32
    %840 = arith.addi %c49_i32_423, %839 : i32
    %c6_i32_424 = arith.constant 6 : i32
    %841 = arith.addi %840, %c6_i32_424 : i32
    %842 = arith.index_cast %841 : i32 to index
    %843 = memref.load %arg2[%842] : memref<98xf32, #tpu.memory_space<smem>>
    %c6_425 = arith.constant 6 : index
    %844 = arith.index_cast %c4_i32_365 : i32 to index
    %c0_426 = arith.constant 0 : index
    %845 = vector.load %arg8[%c6_425, %844, %c0_426] : memref<14x14x16xf32, #tpu.memory_space<vmem>>, vector<1x8x16xf32>
    %846 = vector.shape_cast %845 : vector<1x8x16xf32> to vector<8x16xf32>
    %c13_427 = arith.constant 13 : index
    %847 = arith.index_cast %c4_i32_365 : i32 to index
    %c0_428 = arith.constant 0 : index
    %848 = vector.load %arg8[%c13_427, %847, %c0_428] : memref<14x14x16xf32, #tpu.memory_space<vmem>>, vector<1x8x16xf32>
    %849 = vector.shape_cast %848 : vector<1x8x16xf32> to vector<8x16xf32>
    %850 = vector.broadcast %838 : f32 to vector<8x16xf32>
    %851 = arith.mulf %850, %846 : vector<8x16xf32>
    %852 = arith.addf %810, %851 : vector<8x16xf32>
    %853 = vector.broadcast %843 : f32 to vector<8x16xf32>
    %854 = arith.mulf %853, %849 : vector<8x16xf32>
    %855 = arith.addf %813, %854 : vector<8x16xf32>
    %c5_i32_429 = arith.constant 5 : i32
    %c7_i32_430 = arith.constant 7 : i32
    %856 = arith.muli %c5_i32_429, %c7_i32_430 : i32
    %c0_i32_431 = arith.constant 0 : i32
    %857 = arith.addi %856, %c0_i32_431 : i32
    %858 = arith.index_cast %857 : i32 to index
    %859 = memref.load %arg2[%858] : memref<98xf32, #tpu.memory_space<smem>>
    %c7_i32_432 = arith.constant 7 : i32
    %860 = arith.muli %c5_i32_429, %c7_i32_432 : i32
    %c49_i32_433 = arith.constant 49 : i32
    %861 = arith.addi %c49_i32_433, %860 : i32
    %c0_i32_434 = arith.constant 0 : i32
    %862 = arith.addi %861, %c0_i32_434 : i32
    %863 = arith.index_cast %862 : i32 to index
    %864 = memref.load %arg2[%863] : memref<98xf32, #tpu.memory_space<smem>>
    %c0_435 = arith.constant 0 : index
    %865 = arith.index_cast %c5_i32_429 : i32 to index
    %c0_436 = arith.constant 0 : index
    %866 = vector.load %arg8[%c0_435, %865, %c0_436] : memref<14x14x16xf32, #tpu.memory_space<vmem>>, vector<1x8x16xf32>
    %867 = vector.shape_cast %866 : vector<1x8x16xf32> to vector<8x16xf32>
    %c7_437 = arith.constant 7 : index
    %868 = arith.index_cast %c5_i32_429 : i32 to index
    %c0_438 = arith.constant 0 : index
    %869 = vector.load %arg8[%c7_437, %868, %c0_438] : memref<14x14x16xf32, #tpu.memory_space<vmem>>, vector<1x8x16xf32>
    %870 = vector.shape_cast %869 : vector<1x8x16xf32> to vector<8x16xf32>
    %871 = vector.broadcast %859 : f32 to vector<8x16xf32>
    %872 = arith.mulf %871, %867 : vector<8x16xf32>
    %873 = arith.addf %852, %872 : vector<8x16xf32>
    %874 = vector.broadcast %864 : f32 to vector<8x16xf32>
    %875 = arith.mulf %874, %870 : vector<8x16xf32>
    %876 = arith.addf %855, %875 : vector<8x16xf32>
    %c7_i32_439 = arith.constant 7 : i32
    %877 = arith.muli %c5_i32_429, %c7_i32_439 : i32
    %c1_i32_440 = arith.constant 1 : i32
    %878 = arith.addi %877, %c1_i32_440 : i32
    %879 = arith.index_cast %878 : i32 to index
    %880 = memref.load %arg2[%879] : memref<98xf32, #tpu.memory_space<smem>>
    %c7_i32_441 = arith.constant 7 : i32
    %881 = arith.muli %c5_i32_429, %c7_i32_441 : i32
    %c49_i32_442 = arith.constant 49 : i32
    %882 = arith.addi %c49_i32_442, %881 : i32
    %c1_i32_443 = arith.constant 1 : i32
    %883 = arith.addi %882, %c1_i32_443 : i32
    %884 = arith.index_cast %883 : i32 to index
    %885 = memref.load %arg2[%884] : memref<98xf32, #tpu.memory_space<smem>>
    %c1_444 = arith.constant 1 : index
    %886 = arith.index_cast %c5_i32_429 : i32 to index
    %c0_445 = arith.constant 0 : index
    %887 = vector.load %arg8[%c1_444, %886, %c0_445] : memref<14x14x16xf32, #tpu.memory_space<vmem>>, vector<1x8x16xf32>
    %888 = vector.shape_cast %887 : vector<1x8x16xf32> to vector<8x16xf32>
    %c8_446 = arith.constant 8 : index
    %889 = arith.index_cast %c5_i32_429 : i32 to index
    %c0_447 = arith.constant 0 : index
    %890 = vector.load %arg8[%c8_446, %889, %c0_447] : memref<14x14x16xf32, #tpu.memory_space<vmem>>, vector<1x8x16xf32>
    %891 = vector.shape_cast %890 : vector<1x8x16xf32> to vector<8x16xf32>
    %892 = vector.broadcast %880 : f32 to vector<8x16xf32>
    %893 = arith.mulf %892, %888 : vector<8x16xf32>
    %894 = arith.addf %831, %893 : vector<8x16xf32>
    %895 = vector.broadcast %885 : f32 to vector<8x16xf32>
    %896 = arith.mulf %895, %891 : vector<8x16xf32>
    %897 = arith.addf %834, %896 : vector<8x16xf32>
    %c7_i32_448 = arith.constant 7 : i32
    %898 = arith.muli %c5_i32_429, %c7_i32_448 : i32
    %c2_i32_449 = arith.constant 2 : i32
    %899 = arith.addi %898, %c2_i32_449 : i32
    %900 = arith.index_cast %899 : i32 to index
    %901 = memref.load %arg2[%900] : memref<98xf32, #tpu.memory_space<smem>>
    %c7_i32_450 = arith.constant 7 : i32
    %902 = arith.muli %c5_i32_429, %c7_i32_450 : i32
    %c49_i32_451 = arith.constant 49 : i32
    %903 = arith.addi %c49_i32_451, %902 : i32
    %c2_i32_452 = arith.constant 2 : i32
    %904 = arith.addi %903, %c2_i32_452 : i32
    %905 = arith.index_cast %904 : i32 to index
    %906 = memref.load %arg2[%905] : memref<98xf32, #tpu.memory_space<smem>>
    %c2_453 = arith.constant 2 : index
    %907 = arith.index_cast %c5_i32_429 : i32 to index
    %c0_454 = arith.constant 0 : index
    %908 = vector.load %arg8[%c2_453, %907, %c0_454] : memref<14x14x16xf32, #tpu.memory_space<vmem>>, vector<1x8x16xf32>
    %909 = vector.shape_cast %908 : vector<1x8x16xf32> to vector<8x16xf32>
    %c9_455 = arith.constant 9 : index
    %910 = arith.index_cast %c5_i32_429 : i32 to index
    %c0_456 = arith.constant 0 : index
    %911 = vector.load %arg8[%c9_455, %910, %c0_456] : memref<14x14x16xf32, #tpu.memory_space<vmem>>, vector<1x8x16xf32>
    %912 = vector.shape_cast %911 : vector<1x8x16xf32> to vector<8x16xf32>
    %913 = vector.broadcast %901 : f32 to vector<8x16xf32>
    %914 = arith.mulf %913, %909 : vector<8x16xf32>
    %915 = arith.addf %873, %914 : vector<8x16xf32>
    %916 = vector.broadcast %906 : f32 to vector<8x16xf32>
    %917 = arith.mulf %916, %912 : vector<8x16xf32>
    %918 = arith.addf %876, %917 : vector<8x16xf32>
    %c7_i32_457 = arith.constant 7 : i32
    %919 = arith.muli %c5_i32_429, %c7_i32_457 : i32
    %c3_i32_458 = arith.constant 3 : i32
    %920 = arith.addi %919, %c3_i32_458 : i32
    %921 = arith.index_cast %920 : i32 to index
    %922 = memref.load %arg2[%921] : memref<98xf32, #tpu.memory_space<smem>>
    %c7_i32_459 = arith.constant 7 : i32
    %923 = arith.muli %c5_i32_429, %c7_i32_459 : i32
    %c49_i32_460 = arith.constant 49 : i32
    %924 = arith.addi %c49_i32_460, %923 : i32
    %c3_i32_461 = arith.constant 3 : i32
    %925 = arith.addi %924, %c3_i32_461 : i32
    %926 = arith.index_cast %925 : i32 to index
    %927 = memref.load %arg2[%926] : memref<98xf32, #tpu.memory_space<smem>>
    %c3_462 = arith.constant 3 : index
    %928 = arith.index_cast %c5_i32_429 : i32 to index
    %c0_463 = arith.constant 0 : index
    %929 = vector.load %arg8[%c3_462, %928, %c0_463] : memref<14x14x16xf32, #tpu.memory_space<vmem>>, vector<1x8x16xf32>
    %930 = vector.shape_cast %929 : vector<1x8x16xf32> to vector<8x16xf32>
    %c10_464 = arith.constant 10 : index
    %931 = arith.index_cast %c5_i32_429 : i32 to index
    %c0_465 = arith.constant 0 : index
    %932 = vector.load %arg8[%c10_464, %931, %c0_465] : memref<14x14x16xf32, #tpu.memory_space<vmem>>, vector<1x8x16xf32>
    %933 = vector.shape_cast %932 : vector<1x8x16xf32> to vector<8x16xf32>
    %934 = vector.broadcast %922 : f32 to vector<8x16xf32>
    %935 = arith.mulf %934, %930 : vector<8x16xf32>
    %936 = arith.addf %894, %935 : vector<8x16xf32>
    %937 = vector.broadcast %927 : f32 to vector<8x16xf32>
    %938 = arith.mulf %937, %933 : vector<8x16xf32>
    %939 = arith.addf %897, %938 : vector<8x16xf32>
    %c7_i32_466 = arith.constant 7 : i32
    %940 = arith.muli %c5_i32_429, %c7_i32_466 : i32
    %c4_i32_467 = arith.constant 4 : i32
    %941 = arith.addi %940, %c4_i32_467 : i32
    %942 = arith.index_cast %941 : i32 to index
    %943 = memref.load %arg2[%942] : memref<98xf32, #tpu.memory_space<smem>>
    %c7_i32_468 = arith.constant 7 : i32
    %944 = arith.muli %c5_i32_429, %c7_i32_468 : i32
    %c49_i32_469 = arith.constant 49 : i32
    %945 = arith.addi %c49_i32_469, %944 : i32
    %c4_i32_470 = arith.constant 4 : i32
    %946 = arith.addi %945, %c4_i32_470 : i32
    %947 = arith.index_cast %946 : i32 to index
    %948 = memref.load %arg2[%947] : memref<98xf32, #tpu.memory_space<smem>>
    %c4_471 = arith.constant 4 : index
    %949 = arith.index_cast %c5_i32_429 : i32 to index
    %c0_472 = arith.constant 0 : index
    %950 = vector.load %arg8[%c4_471, %949, %c0_472] : memref<14x14x16xf32, #tpu.memory_space<vmem>>, vector<1x8x16xf32>
    %951 = vector.shape_cast %950 : vector<1x8x16xf32> to vector<8x16xf32>
    %c11_473 = arith.constant 11 : index
    %952 = arith.index_cast %c5_i32_429 : i32 to index
    %c0_474 = arith.constant 0 : index
    %953 = vector.load %arg8[%c11_473, %952, %c0_474] : memref<14x14x16xf32, #tpu.memory_space<vmem>>, vector<1x8x16xf32>
    %954 = vector.shape_cast %953 : vector<1x8x16xf32> to vector<8x16xf32>
    %955 = vector.broadcast %943 : f32 to vector<8x16xf32>
    %956 = arith.mulf %955, %951 : vector<8x16xf32>
    %957 = arith.addf %915, %956 : vector<8x16xf32>
    %958 = vector.broadcast %948 : f32 to vector<8x16xf32>
    %959 = arith.mulf %958, %954 : vector<8x16xf32>
    %960 = arith.addf %918, %959 : vector<8x16xf32>
    %c7_i32_475 = arith.constant 7 : i32
    %961 = arith.muli %c5_i32_429, %c7_i32_475 : i32
    %c5_i32_476 = arith.constant 5 : i32
    %962 = arith.addi %961, %c5_i32_476 : i32
    %963 = arith.index_cast %962 : i32 to index
    %964 = memref.load %arg2[%963] : memref<98xf32, #tpu.memory_space<smem>>
    %c7_i32_477 = arith.constant 7 : i32
    %965 = arith.muli %c5_i32_429, %c7_i32_477 : i32
    %c49_i32_478 = arith.constant 49 : i32
    %966 = arith.addi %c49_i32_478, %965 : i32
    %c5_i32_479 = arith.constant 5 : i32
    %967 = arith.addi %966, %c5_i32_479 : i32
    %968 = arith.index_cast %967 : i32 to index
    %969 = memref.load %arg2[%968] : memref<98xf32, #tpu.memory_space<smem>>
    %c5_480 = arith.constant 5 : index
    %970 = arith.index_cast %c5_i32_429 : i32 to index
    %c0_481 = arith.constant 0 : index
    %971 = vector.load %arg8[%c5_480, %970, %c0_481] : memref<14x14x16xf32, #tpu.memory_space<vmem>>, vector<1x8x16xf32>
    %972 = vector.shape_cast %971 : vector<1x8x16xf32> to vector<8x16xf32>
    %c12_482 = arith.constant 12 : index
    %973 = arith.index_cast %c5_i32_429 : i32 to index
    %c0_483 = arith.constant 0 : index
    %974 = vector.load %arg8[%c12_482, %973, %c0_483] : memref<14x14x16xf32, #tpu.memory_space<vmem>>, vector<1x8x16xf32>
    %975 = vector.shape_cast %974 : vector<1x8x16xf32> to vector<8x16xf32>
    %976 = vector.broadcast %964 : f32 to vector<8x16xf32>
    %977 = arith.mulf %976, %972 : vector<8x16xf32>
    %978 = arith.addf %936, %977 : vector<8x16xf32>
    %979 = vector.broadcast %969 : f32 to vector<8x16xf32>
    %980 = arith.mulf %979, %975 : vector<8x16xf32>
    %981 = arith.addf %939, %980 : vector<8x16xf32>
    %c7_i32_484 = arith.constant 7 : i32
    %982 = arith.muli %c5_i32_429, %c7_i32_484 : i32
    %c6_i32_485 = arith.constant 6 : i32
    %983 = arith.addi %982, %c6_i32_485 : i32
    %984 = arith.index_cast %983 : i32 to index
    %985 = memref.load %arg2[%984] : memref<98xf32, #tpu.memory_space<smem>>
    %c7_i32_486 = arith.constant 7 : i32
    %986 = arith.muli %c5_i32_429, %c7_i32_486 : i32
    %c49_i32_487 = arith.constant 49 : i32
    %987 = arith.addi %c49_i32_487, %986 : i32
    %c6_i32_488 = arith.constant 6 : i32
    %988 = arith.addi %987, %c6_i32_488 : i32
    %989 = arith.index_cast %988 : i32 to index
    %990 = memref.load %arg2[%989] : memref<98xf32, #tpu.memory_space<smem>>
    %c6_489 = arith.constant 6 : index
    %991 = arith.index_cast %c5_i32_429 : i32 to index
    %c0_490 = arith.constant 0 : index
    %992 = vector.load %arg8[%c6_489, %991, %c0_490] : memref<14x14x16xf32, #tpu.memory_space<vmem>>, vector<1x8x16xf32>
    %993 = vector.shape_cast %992 : vector<1x8x16xf32> to vector<8x16xf32>
    %c13_491 = arith.constant 13 : index
    %994 = arith.index_cast %c5_i32_429 : i32 to index
    %c0_492 = arith.constant 0 : index
    %995 = vector.load %arg8[%c13_491, %994, %c0_492] : memref<14x14x16xf32, #tpu.memory_space<vmem>>, vector<1x8x16xf32>
    %996 = vector.shape_cast %995 : vector<1x8x16xf32> to vector<8x16xf32>
    %997 = vector.broadcast %985 : f32 to vector<8x16xf32>
    %998 = arith.mulf %997, %993 : vector<8x16xf32>
    %999 = arith.addf %957, %998 : vector<8x16xf32>
    %1000 = vector.broadcast %990 : f32 to vector<8x16xf32>
    %1001 = arith.mulf %1000, %996 : vector<8x16xf32>
    %1002 = arith.addf %960, %1001 : vector<8x16xf32>
    %c6_i32_493 = arith.constant 6 : i32
    %c7_i32_494 = arith.constant 7 : i32
    %1003 = arith.muli %c6_i32_493, %c7_i32_494 : i32
    %c0_i32_495 = arith.constant 0 : i32
    %1004 = arith.addi %1003, %c0_i32_495 : i32
    %1005 = arith.index_cast %1004 : i32 to index
    %1006 = memref.load %arg2[%1005] : memref<98xf32, #tpu.memory_space<smem>>
    %c7_i32_496 = arith.constant 7 : i32
    %1007 = arith.muli %c6_i32_493, %c7_i32_496 : i32
    %c49_i32_497 = arith.constant 49 : i32
    %1008 = arith.addi %c49_i32_497, %1007 : i32
    %c0_i32_498 = arith.constant 0 : i32
    %1009 = arith.addi %1008, %c0_i32_498 : i32
    %1010 = arith.index_cast %1009 : i32 to index
    %1011 = memref.load %arg2[%1010] : memref<98xf32, #tpu.memory_space<smem>>
    %c0_499 = arith.constant 0 : index
    %1012 = arith.index_cast %c6_i32_493 : i32 to index
    %c0_500 = arith.constant 0 : index
    %1013 = vector.load %arg8[%c0_499, %1012, %c0_500] : memref<14x14x16xf32, #tpu.memory_space<vmem>>, vector<1x8x16xf32>
    %1014 = vector.shape_cast %1013 : vector<1x8x16xf32> to vector<8x16xf32>
    %c7_501 = arith.constant 7 : index
    %1015 = arith.index_cast %c6_i32_493 : i32 to index
    %c0_502 = arith.constant 0 : index
    %1016 = vector.load %arg8[%c7_501, %1015, %c0_502] : memref<14x14x16xf32, #tpu.memory_space<vmem>>, vector<1x8x16xf32>
    %1017 = vector.shape_cast %1016 : vector<1x8x16xf32> to vector<8x16xf32>
    %1018 = vector.broadcast %1006 : f32 to vector<8x16xf32>
    %1019 = arith.mulf %1018, %1014 : vector<8x16xf32>
    %1020 = arith.addf %999, %1019 : vector<8x16xf32>
    %1021 = vector.broadcast %1011 : f32 to vector<8x16xf32>
    %1022 = arith.mulf %1021, %1017 : vector<8x16xf32>
    %1023 = arith.addf %1002, %1022 : vector<8x16xf32>
    %c7_i32_503 = arith.constant 7 : i32
    %1024 = arith.muli %c6_i32_493, %c7_i32_503 : i32
    %c1_i32_504 = arith.constant 1 : i32
    %1025 = arith.addi %1024, %c1_i32_504 : i32
    %1026 = arith.index_cast %1025 : i32 to index
    %1027 = memref.load %arg2[%1026] : memref<98xf32, #tpu.memory_space<smem>>
    %c7_i32_505 = arith.constant 7 : i32
    %1028 = arith.muli %c6_i32_493, %c7_i32_505 : i32
    %c49_i32_506 = arith.constant 49 : i32
    %1029 = arith.addi %c49_i32_506, %1028 : i32
    %c1_i32_507 = arith.constant 1 : i32
    %1030 = arith.addi %1029, %c1_i32_507 : i32
    %1031 = arith.index_cast %1030 : i32 to index
    %1032 = memref.load %arg2[%1031] : memref<98xf32, #tpu.memory_space<smem>>
    %c1_508 = arith.constant 1 : index
    %1033 = arith.index_cast %c6_i32_493 : i32 to index
    %c0_509 = arith.constant 0 : index
    %1034 = vector.load %arg8[%c1_508, %1033, %c0_509] : memref<14x14x16xf32, #tpu.memory_space<vmem>>, vector<1x8x16xf32>
    %1035 = vector.shape_cast %1034 : vector<1x8x16xf32> to vector<8x16xf32>
    %c8_510 = arith.constant 8 : index
    %1036 = arith.index_cast %c6_i32_493 : i32 to index
    %c0_511 = arith.constant 0 : index
    %1037 = vector.load %arg8[%c8_510, %1036, %c0_511] : memref<14x14x16xf32, #tpu.memory_space<vmem>>, vector<1x8x16xf32>
    %1038 = vector.shape_cast %1037 : vector<1x8x16xf32> to vector<8x16xf32>
    %1039 = vector.broadcast %1027 : f32 to vector<8x16xf32>
    %1040 = arith.mulf %1039, %1035 : vector<8x16xf32>
    %1041 = arith.addf %978, %1040 : vector<8x16xf32>
    %1042 = vector.broadcast %1032 : f32 to vector<8x16xf32>
    %1043 = arith.mulf %1042, %1038 : vector<8x16xf32>
    %1044 = arith.addf %981, %1043 : vector<8x16xf32>
    %c7_i32_512 = arith.constant 7 : i32
    %1045 = arith.muli %c6_i32_493, %c7_i32_512 : i32
    %c2_i32_513 = arith.constant 2 : i32
    %1046 = arith.addi %1045, %c2_i32_513 : i32
    %1047 = arith.index_cast %1046 : i32 to index
    %1048 = memref.load %arg2[%1047] : memref<98xf32, #tpu.memory_space<smem>>
    %c7_i32_514 = arith.constant 7 : i32
    %1049 = arith.muli %c6_i32_493, %c7_i32_514 : i32
    %c49_i32_515 = arith.constant 49 : i32
    %1050 = arith.addi %c49_i32_515, %1049 : i32
    %c2_i32_516 = arith.constant 2 : i32
    %1051 = arith.addi %1050, %c2_i32_516 : i32
    %1052 = arith.index_cast %1051 : i32 to index
    %1053 = memref.load %arg2[%1052] : memref<98xf32, #tpu.memory_space<smem>>
    %c2_517 = arith.constant 2 : index
    %1054 = arith.index_cast %c6_i32_493 : i32 to index
    %c0_518 = arith.constant 0 : index
    %1055 = vector.load %arg8[%c2_517, %1054, %c0_518] : memref<14x14x16xf32, #tpu.memory_space<vmem>>, vector<1x8x16xf32>
    %1056 = vector.shape_cast %1055 : vector<1x8x16xf32> to vector<8x16xf32>
    %c9_519 = arith.constant 9 : index
    %1057 = arith.index_cast %c6_i32_493 : i32 to index
    %c0_520 = arith.constant 0 : index
    %1058 = vector.load %arg8[%c9_519, %1057, %c0_520] : memref<14x14x16xf32, #tpu.memory_space<vmem>>, vector<1x8x16xf32>
    %1059 = vector.shape_cast %1058 : vector<1x8x16xf32> to vector<8x16xf32>
    %1060 = vector.broadcast %1048 : f32 to vector<8x16xf32>
    %1061 = arith.mulf %1060, %1056 : vector<8x16xf32>
    %1062 = arith.addf %1020, %1061 : vector<8x16xf32>
    %1063 = vector.broadcast %1053 : f32 to vector<8x16xf32>
    %1064 = arith.mulf %1063, %1059 : vector<8x16xf32>
    %1065 = arith.addf %1023, %1064 : vector<8x16xf32>
    %c7_i32_521 = arith.constant 7 : i32
    %1066 = arith.muli %c6_i32_493, %c7_i32_521 : i32
    %c3_i32_522 = arith.constant 3 : i32
    %1067 = arith.addi %1066, %c3_i32_522 : i32
    %1068 = arith.index_cast %1067 : i32 to index
    %1069 = memref.load %arg2[%1068] : memref<98xf32, #tpu.memory_space<smem>>
    %c7_i32_523 = arith.constant 7 : i32
    %1070 = arith.muli %c6_i32_493, %c7_i32_523 : i32
    %c49_i32_524 = arith.constant 49 : i32
    %1071 = arith.addi %c49_i32_524, %1070 : i32
    %c3_i32_525 = arith.constant 3 : i32
    %1072 = arith.addi %1071, %c3_i32_525 : i32
    %1073 = arith.index_cast %1072 : i32 to index
    %1074 = memref.load %arg2[%1073] : memref<98xf32, #tpu.memory_space<smem>>
    %c3_526 = arith.constant 3 : index
    %1075 = arith.index_cast %c6_i32_493 : i32 to index
    %c0_527 = arith.constant 0 : index
    %1076 = vector.load %arg8[%c3_526, %1075, %c0_527] : memref<14x14x16xf32, #tpu.memory_space<vmem>>, vector<1x8x16xf32>
    %1077 = vector.shape_cast %1076 : vector<1x8x16xf32> to vector<8x16xf32>
    %c10_528 = arith.constant 10 : index
    %1078 = arith.index_cast %c6_i32_493 : i32 to index
    %c0_529 = arith.constant 0 : index
    %1079 = vector.load %arg8[%c10_528, %1078, %c0_529] : memref<14x14x16xf32, #tpu.memory_space<vmem>>, vector<1x8x16xf32>
    %1080 = vector.shape_cast %1079 : vector<1x8x16xf32> to vector<8x16xf32>
    %1081 = vector.broadcast %1069 : f32 to vector<8x16xf32>
    %1082 = arith.mulf %1081, %1077 : vector<8x16xf32>
    %1083 = arith.addf %1041, %1082 : vector<8x16xf32>
    %1084 = vector.broadcast %1074 : f32 to vector<8x16xf32>
    %1085 = arith.mulf %1084, %1080 : vector<8x16xf32>
    %1086 = arith.addf %1044, %1085 : vector<8x16xf32>
    %c7_i32_530 = arith.constant 7 : i32
    %1087 = arith.muli %c6_i32_493, %c7_i32_530 : i32
    %c4_i32_531 = arith.constant 4 : i32
    %1088 = arith.addi %1087, %c4_i32_531 : i32
    %1089 = arith.index_cast %1088 : i32 to index
    %1090 = memref.load %arg2[%1089] : memref<98xf32, #tpu.memory_space<smem>>
    %c7_i32_532 = arith.constant 7 : i32
    %1091 = arith.muli %c6_i32_493, %c7_i32_532 : i32
    %c49_i32_533 = arith.constant 49 : i32
    %1092 = arith.addi %c49_i32_533, %1091 : i32
    %c4_i32_534 = arith.constant 4 : i32
    %1093 = arith.addi %1092, %c4_i32_534 : i32
    %1094 = arith.index_cast %1093 : i32 to index
    %1095 = memref.load %arg2[%1094] : memref<98xf32, #tpu.memory_space<smem>>
    %c4_535 = arith.constant 4 : index
    %1096 = arith.index_cast %c6_i32_493 : i32 to index
    %c0_536 = arith.constant 0 : index
    %1097 = vector.load %arg8[%c4_535, %1096, %c0_536] : memref<14x14x16xf32, #tpu.memory_space<vmem>>, vector<1x8x16xf32>
    %1098 = vector.shape_cast %1097 : vector<1x8x16xf32> to vector<8x16xf32>
    %c11_537 = arith.constant 11 : index
    %1099 = arith.index_cast %c6_i32_493 : i32 to index
    %c0_538 = arith.constant 0 : index
    %1100 = vector.load %arg8[%c11_537, %1099, %c0_538] : memref<14x14x16xf32, #tpu.memory_space<vmem>>, vector<1x8x16xf32>
    %1101 = vector.shape_cast %1100 : vector<1x8x16xf32> to vector<8x16xf32>
    %1102 = vector.broadcast %1090 : f32 to vector<8x16xf32>
    %1103 = arith.mulf %1102, %1098 : vector<8x16xf32>
    %1104 = arith.addf %1062, %1103 : vector<8x16xf32>
    %1105 = vector.broadcast %1095 : f32 to vector<8x16xf32>
    %1106 = arith.mulf %1105, %1101 : vector<8x16xf32>
    %1107 = arith.addf %1065, %1106 : vector<8x16xf32>
    %c7_i32_539 = arith.constant 7 : i32
    %1108 = arith.muli %c6_i32_493, %c7_i32_539 : i32
    %c5_i32_540 = arith.constant 5 : i32
    %1109 = arith.addi %1108, %c5_i32_540 : i32
    %1110 = arith.index_cast %1109 : i32 to index
    %1111 = memref.load %arg2[%1110] : memref<98xf32, #tpu.memory_space<smem>>
    %c7_i32_541 = arith.constant 7 : i32
    %1112 = arith.muli %c6_i32_493, %c7_i32_541 : i32
    %c49_i32_542 = arith.constant 49 : i32
    %1113 = arith.addi %c49_i32_542, %1112 : i32
    %c5_i32_543 = arith.constant 5 : i32
    %1114 = arith.addi %1113, %c5_i32_543 : i32
    %1115 = arith.index_cast %1114 : i32 to index
    %1116 = memref.load %arg2[%1115] : memref<98xf32, #tpu.memory_space<smem>>
    %c5_544 = arith.constant 5 : index
    %1117 = arith.index_cast %c6_i32_493 : i32 to index
    %c0_545 = arith.constant 0 : index
    %1118 = vector.load %arg8[%c5_544, %1117, %c0_545] : memref<14x14x16xf32, #tpu.memory_space<vmem>>, vector<1x8x16xf32>
    %1119 = vector.shape_cast %1118 : vector<1x8x16xf32> to vector<8x16xf32>
    %c12_546 = arith.constant 12 : index
    %1120 = arith.index_cast %c6_i32_493 : i32 to index
    %c0_547 = arith.constant 0 : index
    %1121 = vector.load %arg8[%c12_546, %1120, %c0_547] : memref<14x14x16xf32, #tpu.memory_space<vmem>>, vector<1x8x16xf32>
    %1122 = vector.shape_cast %1121 : vector<1x8x16xf32> to vector<8x16xf32>
    %1123 = vector.broadcast %1111 : f32 to vector<8x16xf32>
    %1124 = arith.mulf %1123, %1119 : vector<8x16xf32>
    %1125 = arith.addf %1083, %1124 : vector<8x16xf32>
    %1126 = vector.broadcast %1116 : f32 to vector<8x16xf32>
    %1127 = arith.mulf %1126, %1122 : vector<8x16xf32>
    %1128 = arith.addf %1086, %1127 : vector<8x16xf32>
    %c7_i32_548 = arith.constant 7 : i32
    %1129 = arith.muli %c6_i32_493, %c7_i32_548 : i32
    %c6_i32_549 = arith.constant 6 : i32
    %1130 = arith.addi %1129, %c6_i32_549 : i32
    %1131 = arith.index_cast %1130 : i32 to index
    %1132 = memref.load %arg2[%1131] : memref<98xf32, #tpu.memory_space<smem>>
    %c7_i32_550 = arith.constant 7 : i32
    %1133 = arith.muli %c6_i32_493, %c7_i32_550 : i32
    %c49_i32_551 = arith.constant 49 : i32
    %1134 = arith.addi %c49_i32_551, %1133 : i32
    %c6_i32_552 = arith.constant 6 : i32
    %1135 = arith.addi %1134, %c6_i32_552 : i32
    %1136 = arith.index_cast %1135 : i32 to index
    %1137 = memref.load %arg2[%1136] : memref<98xf32, #tpu.memory_space<smem>>
    %c6_553 = arith.constant 6 : index
    %1138 = arith.index_cast %c6_i32_493 : i32 to index
    %c0_554 = arith.constant 0 : index
    %1139 = vector.load %arg8[%c6_553, %1138, %c0_554] : memref<14x14x16xf32, #tpu.memory_space<vmem>>, vector<1x8x16xf32>
    %1140 = vector.shape_cast %1139 : vector<1x8x16xf32> to vector<8x16xf32>
    %c13_555 = arith.constant 13 : index
    %1141 = arith.index_cast %c6_i32_493 : i32 to index
    %c0_556 = arith.constant 0 : index
    %1142 = vector.load %arg8[%c13_555, %1141, %c0_556] : memref<14x14x16xf32, #tpu.memory_space<vmem>>, vector<1x8x16xf32>
    %1143 = vector.shape_cast %1142 : vector<1x8x16xf32> to vector<8x16xf32>
    %1144 = vector.broadcast %1132 : f32 to vector<8x16xf32>
    %1145 = arith.mulf %1144, %1140 : vector<8x16xf32>
    %1146 = arith.addf %1104, %1145 : vector<8x16xf32>
    %1147 = vector.broadcast %1137 : f32 to vector<8x16xf32>
    %1148 = arith.mulf %1147, %1143 : vector<8x16xf32>
    %1149 = arith.addf %1107, %1148 : vector<8x16xf32>
    %c7_i32_557 = arith.constant 7 : i32
    %1150 = arith.addf %1146, %1125 : vector<8x16xf32>
    %1151 = arith.addf %1149, %1128 : vector<8x16xf32>
    %1152 = arith.addf %1150, %1151 : vector<8x16xf32>
    %1153 = arith.negf %1152 : vector<8x16xf32>
    %1154 = math.exp %1153 : vector<8x16xf32>
    %cst_558 = arith.constant 1.000000e+00 : f32
    %1155 = vector.broadcast %cst_558 : f32 to vector<8x16xf32>
    %1156 = arith.addf %1155, %1154 : vector<8x16xf32>
    %1157 = arith.divf %1155, %1156 : vector<8x16xf32>
    %c0_i32_559 = arith.constant 0 : i32
    %c4_i32_560 = arith.constant 4 : i32
    %1158 = arith.addi %c0_i32_559, %c4_i32_560 : i32
    %c1_i32_561 = arith.constant 1 : i32
    scf.for %arg9 = %c0_i32_559 to %1158 step %c1_i32_561  : i32 {
      %c0_563 = arith.constant 0 : index
      %1159 = arith.index_cast %arg9 : i32 to index
      %c0_564 = arith.constant 0 : index
      %c0_565 = arith.constant 0 : index
      %1160 = vector.load %arg3[%c0_563, %1159, %c0_564, %c0_565] : memref<1x4x8x16xf32, #tpu.memory_space<vmem>>, vector<1x1x8x16xf32>
      %1161 = vector.shape_cast %1160 : vector<1x1x8x16xf32> to vector<8x16xf32>
      %1162 = arith.mulf %1161, %1157 : vector<8x16xf32>
      %c0_566 = arith.constant 0 : index
      %1163 = arith.index_cast %arg9 : i32 to index
      %c0_567 = arith.constant 0 : index
      %c0_568 = arith.constant 0 : index
      %1164 = vector.load %arg6[%c0_566, %1163, %c0_567, %c0_568] : memref<1x4x8x16xf32, #tpu.memory_space<vmem>>, vector<1x1x8x16xf32>
      %1165 = vector.shape_cast %1164 : vector<1x1x8x16xf32> to vector<8x16xf32>
      %1166 = vector.shape_cast %1162 : vector<8x16xf32> to vector<1x1x8x16xf32>
      tpu.vector_store %arg6[%c0_566, %1163, %c0_567, %c0_568], %1166 {strides = array<i32>} : memref<1x4x8x16xf32, #tpu.memory_space<vmem>>, vector<1x1x8x16xf32>,
    }
    %c4_i32_562 = arith.constant 4 : i32
    return
  }
  func.func @transform_0(%arg0: i32, %arg1: i32) -> i32 {
    %c0_i32 = arith.constant 0 : i32
    %c0_i32_0 = arith.constant 0 : i32
    return %c0_i32 : i32
  }
  func.func @transform_1(%arg0: i32, %arg1: i32) -> (i32, i32, i32, i32) {
    %c0_i32 = arith.constant 0 : i32
    %c0_i32_0 = arith.constant 0 : i32
    %c0_i32_1 = arith.constant 0 : i32
    return %arg0, %c0_i32, %arg1, %c0_i32_0 : i32, i32, i32, i32
  }
  func.func @transform_2(%arg0: i32, %arg1: i32) -> (i32, i32, i32, i32) {
    %c1_i32 = arith.constant 1 : i32
    %0 = arith.muli %arg1, %c1_i32 : i32
    %c1_i32_0 = arith.constant 1 : i32
    %1 = arith.subi %0, %c1_i32_0 : i32
    %c0_i32 = arith.constant 0 : i32
    %2 = arith.maxsi %1, %c0_i32 : i32
    %c0_i32_1 = arith.constant 0 : i32
    %c0_i32_2 = arith.constant 0 : i32
    %c0_i32_3 = arith.constant 0 : i32
    return %arg0, %c0_i32_1, %2, %c0_i32_2 : i32, i32, i32, i32
  }
  func.func @transform_3(%arg0: i32, %arg1: i32) -> (i32, i32, i32, i32) {
    %c1_i32 = arith.constant 1 : i32
    %0 = arith.addi %arg1, %c1_i32 : i32
    %c1_i32_0 = arith.constant 1 : i32
    %1 = arith.muli %0, %c1_i32_0 : i32
    %c1_i32_1 = arith.constant 1 : i32
    %2 = arith.minsi %1, %c1_i32_1 : i32
    %c0_i32 = arith.constant 0 : i32
    %c0_i32_2 = arith.constant 0 : i32
    %c0_i32_3 = arith.constant 0 : i32
    return %arg0, %c0_i32, %2, %c0_i32_2 : i32, i32, i32, i32
  }
  func.func @transform_4(%arg0: i32, %arg1: i32) -> (i32, i32, i32, i32) {
    %c0_i32 = arith.constant 0 : i32
    %c0_i32_0 = arith.constant 0 : i32
    %c0_i32_1 = arith.constant 0 : i32
    return %arg0, %c0_i32, %arg1, %c0_i32_0 : i32, i32, i32, i32
  }
}

</mosaic_0001>

<bundles_post_ra>
// kernel: _lambda_.1
= control target key start
LH: loop header
LB: loop body
LE: loop exit
PB: predicated region body
PF: predicated region fallthrough
CT: control target
= control target key end

     0   :  { %s2983_s0 = inlined_call_operand.vmem [shape: f32[98], index: 0, kind: input, shape index: {}]   ;;  %s2984_s1 = inlined_call_operand.hbm [shape: f32[2,4,16,16], index: 1, kind: input, shape index: {}, may-alias: {1,2,3}]   ;;  %s2985_s2 = inlined_call_operand.hbm [shape: f32[2,4,16,16], index: 2, kind: input, shape index: {}, may-alias: {1,2,3}]   ;;  %s2986_s3 = inlined_call_operand.hbm [shape: f32[2,4,16,16], index: 3, kind: input, shape index: {}, may-alias: {1,2,3}]   ;;  %s2987_s4 = inlined_call_operand.hbm [shape: f32[2,4,16,16], index: 4, kind: output, shape index: {}]  }
   0x1   :  { %3027 = sst [smem:[#allocation43_spill]] %s2983_s0 }
   0x2   :  { %3028 = sst [smem:[#allocation44_spill]] %s2984_s1 }
   0x3   :  { %3029 = sst [smem:[#allocation45_spill]] %s2985_s2 }
   0x4   :  { %3030 = sst [smem:[#allocation46_spill]] %s2986_s3 }
   0x5   :  { %3031 = sst [smem:[#allocation47_spill]] %s2987_s4 }
   0x6   :  { %9 = vsyncpa [#allocation7], 0 }
   0x7   :  { %10 = vsyncpa [#allocation5], 0 }
   0x8   :  { %12 = vsyncpa [#allocation5 + $0x1], 0 }
   0x9   :  { %13 = vsyncpa [#allocation10], 0 }
   0xa   :  { %15 = vsyncpa [#allocation10 + $0x1], 0 }
   0xb   :  { %16 = vsyncpa [#allocation6], 0 }
   0xc   :  { %18 = vsyncpa [#allocation6 + $0x1], 0  ;;  %s2104_s15 = smov 0   ;;  %s2106_s16 = smov 0  }
   0xd   :  { %s2108_s17 = smov 0   ;;  %s2110_s18 = smov 0  }
   0xe   :  { %s2112_s19 = smov 0   ;;  %s2114_s20 = smov 0  }
   0xf   :  { %s2116_s21 = smov 0   ;;  %s2118_s22 = smov 0  }
  0x10   :  { %s2120_s23 = smov 0   ;;  %s2122_s24 = smov 0  }
  0x11   :  { %s2124_s25 = smov 0   ;;  %s2126_s26 = smov 0  }
  0x12   :  { %s2128_s27 = smov 0   ;;  %s2130_s28 = smov 0  }
  0x13 LB: > { %3032 = sst [smem:[#allocation18_spill]] %s1970_s16  ;;  %s33_s29 = sadd.s32 1, %s2010_s26  ;;  %s2018_s28 = sphi %s2130_s28, %s24_s28   ;;  %s2014_s27 = sphi %s2128_s27, %s3119_s27   ;;  %s2010_s26 = sphi %s2126_s26, %s3118_s26   ;;  %s2006_s25 = sphi %s2124_s25, %s3117_s25   ;;  %s2002_s24 = sphi %s2122_s24, %s3116_s24   ;;  %s1998_s23 = sphi %s2120_s23, %s3115_s23   ;;  %s1994_s22 = sphi %s2118_s22, %s3114_s22   ;;  %s1990_s21 = sphi %s2116_s21, %s3113_s21   ;;  %s1986_s20 = sphi %s2114_s20, %s3112_s20   ;;  %s1982_s19 = sphi %s2112_s19, %s3111_s19   ;;  %s1978_s18 = sphi %s2110_s18, %s3110_s18   ;;  %s1974_s17 = sphi %s2108_s17, %s3109_s17   ;;  %s1970_s16 = sphi %s2106_s16, %s3108_s16   ;;  %s1966_s15 = sphi %s2104_s15, %s3107_s15  }
  0x14   : > { %3033 = sst [smem:[#allocation19_spill]] %s1974_s17  ;;  %s36_s30 = sadd.s32 1, %s2014_s27 }
  0x15   : > { %3034 = sst [smem:[#allocation20_spill]] %s1982_s19  ;;  %p34_p0 = scmp.ge.s32.totalorder %s33_s29, 2 }
  0x16   : > { %3035 = sst [smem:[#allocation21_spill]] %s1986_s20  ;;  %p2994_p1 = scmp.eq.s32.totalorder %s2018_s28, 0 }
  0x17   : > { %3036 = sst [smem:[#allocation22_spill]] %s1990_s21  ;;  %s100_s5 = sadd.s32 1, %s1986_s20 }
  0x18   : > { %3037 = sst [smem:[#allocation23_spill]] %s1994_s22  ;;  %s3121_s29 = smov (%p34_p0, %s33_s29), 0 }
  0x19   : > { %3038 = sst [smem:[#allocation24_spill]] %s1998_s23  ;;  %s3123_s30 = smov (!%p34_p0, %s36_s30), %s2014_s27 }
  0x1a   : > { %3039 = sst [smem:[#allocation25_spill]] %s2002_s24  ;;  %s62_s6 = ssub.s32 %s2010_s26, %s3121_s29 }
  0x1b   : > { %3040 = sst [smem:[#allocation26_spill]] %s2006_s25  ;;  %p38_p2 = scmp.ge.s32.totalorder %s3123_s30, 2 }
  0x1c   : > { %3041 = sst [smem:[#allocation27_spill]] %s2010_s26  ;;  %p107_p3 = scmp.ne.s32.totalorder %s1986_s20, %s1982_s19 }
  0x1d   : > { %3042 = sst [smem:[#allocation28_spill]] %s2014_s27  ;;  %s3125_s30 = smov (%p38_p2, %s3123_s30), 0 }
  0x1e   : > { %3043 = sst [smem:[#allocation29_spill]] %s2018_s28  ;;  %s2189_s7 = ssub.s32 %s2014_s27, %s3125_s30 }
  0x1f   : > { %3044 = sst [smem:[#allocation30_spill]] %s3121_s29  ;;  %s2192_s8 = sor.u32 %s62_s6, %s2189_s7 }
  0x20   : > { %3045 = sst [smem:[#allocation31_spill]] %s3125_s30  ;;  %p2196_p4 = por %p107_p3, %p2994_p1 }
  0x21   : > { %p64_p5 = scmp.eq.s32.totalorder %s2192_s8, 0  ;;  %p2993_p6 = scmp.lt.s32.totalorder %s2018_s28, 4 }
  0x22   : > { %p2992_p7 = scmp.eq.s32.totalorder %s2189_s7, 0  ;;  %s232_s11 = sand.u32 1, %s2018_s28  }
  0x23   : > { %s234_s12 = sand.u32 1, %s1986_s20   ;;  %s2991_s30 = sshll.u32 %s2014_s27, 10 }
  0x24   : > { %s2209_s13 = scalar_select %p2992_p7, %s1986_s20, %s100_s5  }
  0x25   : > { %s1346_s14 = sshll.u32 %s234_s12, 5  ;;  %s3048_s2 = sld [smem:[#allocation45_spill]] }
  0x26   : > { %3047 = sst [smem:[#allocation32_spill]] %s2209_s13  ;;  %s236_s25 = scalar_lea.vmem [#allocation9], %s1346_s14 }
  0x27   : > { %s247_s10 = sshll.u32 %s236_s25, 4  ;;  %p2225_p8 = pnand %p2993_p6, %p2196_p4  ;;  %s2219_s10 = int_to_ptr.vmem [resolvable:$true] %s247_s10 }
  0x28   : > { %s2229_s12 = scalar_lea.sflag [#allocation10], %s232_s11 }
  0x29   : > { %p1713_p10 = pneg %p2225_p8 }
  0x2b   : > { %s2217_s4 = scalar_lea.hbm %s3048_s2, %s2991_s30  ;;  %s1716_s9 = scalar_lea.hbm %s3048_s2, 2048 }
  0x2c   : > { %s1711_s29 = scalar_lea.hbm %s2217_s4, 512  ;;  %p1717_p13 = scmp.lt.u32.totalorder %s2217_s4, %s3048_s2 }
  0x2d   : > { %p1712_p9 = scmp.ne.s32.totalorder %s2217_s4, %s1711_s29  ;;  %p1718_p0 = scmp.lt.u32.totalorder %s1716_s9, %s1711_s29 }
  0x2e   : > { %p1720_p3 = scmp.lt.u32.totalorder %s1711_s29, %s2217_s4 }
  0x2f   : > { %p1714_p11 = pnand %p1713_p10, %p1712_p9  ;;  %p1719_p2 = por %p1718_p0, %p1717_p13 }
  0x31   : > { %p1715_p12 = pneg %p1714_p11  ;;  %p1721_p4 = por %p1720_p3, %p1719_p2 }
  0x33   : > { %p1722_p7 = pnand %p1721_p4, %p1715_p12 }
  0x35   : > { %1725 = shalt.err (!%p1722_p7)
}
  0x36   : > { %s1726_s11 = scalar_lea.vmem %s2219_s10, 512  ;;  %s2060_s25 = smov [#allocation9]  }
  0x37   : > { %p1727_p9 = scmp.ne.s32.totalorder %s2219_s10, %s1726_s11  ;;  %s1731_s14 = sshll.u32 %s2060_s25, 4  ;;  %s1732_s14 = int_to_ptr.vmem [resolvable:$false] %s1731_s14 }
  0x38   : > { %s1733_s30 = scalar_lea.vmem %s1732_s14, 1024  ;;  %p1734_p1 = scmp.lt.s32.totalorder %s2219_s10, %s1732_s14 }
  0x39   : > { %p1729_p11 = pnand %p1727_p9, %p1713_p10  ;;  %p1735_p13 = scmp.lt.s32.totalorder %s1733_s30, %s1726_s11 }
  0x3b   : > { %p1730_p6 = pneg %p1729_p11  ;;  %p1736_p0 = por %p1735_p13, %p1734_p1 }
  0x3d   : > { %p1737_p2 = pnand %p1736_p0, %p1730_p6 }
  0x3f   : > { %1740 = shalt.err (!%p1737_p2)
}
  0x40   : > { %s2995_s29 = smov 256   ;;  %s2997_s9 = smov 128  }
  0x41   : > { %s2999_s6 = smov 8   ;;  %s2261_s11 = sadd.s32 4294967295, %s2018_s28  }
  0x42   : > { %1488 = dma.hbm_to_vmem [thread:$0]  (!%p2225_p8), %s2217_s4, 512, %s2219_s10, %s2229_s12, %s2995_s29, %s2997_s9, %s2999_s6  }
  0x43   : > { %s1337_s25 = sadd.s32 4294967294, %s2018_s28   ;;  %p79_p1 = scmp.ne.s32.totalorder %s1994_s22, %s1990_s21 }
  0x44   : > { %p3006_p6 = scmp.eq.s32.totalorder %s2261_s11, 0  ;;  %p113_p7 = scmp.ne.s32.totalorder %s1982_s19, %s1978_s18 }
  0x45   : > { %p147_p10 = scmp.ne.s32.totalorder %s1970_s16, %s1966_s15  ;;  %p179_p9 = scmp.eq.s32.totalorder %s1337_s25, 3 }
  0x46   : > { %p2274_p8 = por %p3006_p6, %p79_p1  ;;  %p2280_p3 = por %p113_p7, %p3006_p6 }
  0x47   : > { %p2286_p4 = por %p147_p10, %p3006_p6  ;;  %p1340_p11 = scmp.ge.s32.totalorder %s2018_s28, 1 }
  0x48   : > { %s3050_s4 = scalar_select %p2274_p8, 1, 0 }
  0x49   : > { %s3051_s10 = scalar_select %p2280_p3, 1, 0 }
  0x4a   : > { %s3052_s18 = scalar_select %p2286_p4, 1, 0 }
  0x4b   : > { %p186_p13 = scmp.lt.s32.totalorder %s2018_s28, 5  ;;  %p2292_p0 = por %p179_p9, %p79_p1 }
  0x4c   : > { %s3056_s0 = sld [smem:[#allocation43_spill]]  ;;  %s3057_s9 = sshll.u32 %s2014_s27, 3 }
  0x4d   : > { %s3053_s15 = scalar_select %p2292_p0, 1, 0 }
  0x4e   : > { %p2296_p2 = pnand %p1340_p11, %p186_p13  ;;  %s219_s25 = sadd.s32 %s2010_s26, %s3057_s9 }
  0x4f   : > { %3054 = sst [smem:[#allocation33_spill]] %s3053_s15  ;;  %s66_s2 = sadd.s32 1, %s1998_s23 }
  0x50   : > { %p1478_p7 = pneg %p2296_p2  ;;  %p73_p1 = scmp.ne.s32.totalorder %s1998_s23, %s1994_s22 }
  0x51   : > { %s2318_s13 = scalar_select %p64_p5, %s1998_s23, %s66_s2  }
  0x52   : > { %s199_s29 = sshll.u32 %s3056_s0, 4  ;;  %p2310_p10 = pnand %p1478_p7, %p3006_p6  ;;  %s200_s29 = int_to_ptr.vmem [resolvable:$true] %s199_s29 }
  0x53   : > { %3059 = sst [smem:[#allocation34_spill]] %s2318_s13  ;;  %s1741_s20 = scalar_lea.vmem %s200_s29, 16 }
  0x54   : > { %p1742_p9 = scmp.ne.s32.totalorder %s200_s29, %s1741_s20  ;;  %p1743_p11 = pneg %p2310_p10 }
  0x55   : > { %p1749_p0 = scmp.lt.s32.totalorder %s200_s29, %s200_s29  ;;  %p1750_p4 = scmp.lt.s32.totalorder %s1741_s20, %s1741_s20 }
  0x56   : > { %p1744_p13 = pnand %p1743_p11, %p1742_p9 }
  0x57   : > { %p1751_p3 = por %p1750_p4, %p1749_p0 }
  0x58   : > { %p1745_p12 = pneg %p1744_p13 }
  0x5a   : > { %p1752_p8 = pnand %p1751_p3, %p1745_p12 }
  0x5c   : > { %1755 = shalt.err (!%p1752_p8)
}
  0x5d   : > { %s2064_s9 = smov [#allocation4]   ;;  %p3060_p5 = scmp.eq.s32.totalorder %s2018_s28, 0 }
  0x5e   : > { %1481 = dma.vmem_to_smem (!%p2310_p10), %s200_s29, 16, %s2064_s9, [#allocation7]  }
  0x5f   : > { %p75_p7 = por %p3060_p5, %p73_p1  ;;  %p3061_p9 = scmp.eq.s32.totalorder %s2261_s11, 3 }
  0x60   : > { %s210_s20 = sand.u32 1, %s1998_s23   ;;  %s1345_s8 = sshll.u32 %s219_s25, 7 }
  0x61   : > { %p2336_p4 = por %p3061_p9, %p73_p1  ;;  %s1343_s6 = sshll.u32 %s210_s20, 5 }
  0x62   : > { %s3064_s1 = sld [smem:[#allocation44_spill]]  ;;  %s214_s29 = scalar_lea.vmem [#allocation8], %s1343_s6 }
  0x63   : > { %s3062_s2 = scalar_select %p2336_p4, 1, 0 }
  0x64   : > { %s222_s9 = sshll.u32 %s214_s29, 4  ;;  %p3065_p12 = scmp.lt.s32.totalorder %s2018_s28, 4  ;;  %s2352_s9 = int_to_ptr.vmem [resolvable:$true] %s222_s9 }
  0x65   : > { %3063 = sst [smem:[#allocation35_spill]] %s3062_s2  ;;  %s2354_s25 = scalar_lea.sflag [#allocation5], %s210_s20 }
  0x66   : > { %p2348_p8 = pnand %p3065_p12, %p75_p7 }
  0x68   : > { %s2344_s0 = scalar_lea.hbm %s3064_s1, %s1345_s8  ;;  %p1758_p0 = pneg %p2348_p8 }
  0x69   : > { %s1756_s14 = scalar_lea.hbm %s2344_s0, 512  ;;  %s1761_s30 = scalar_lea.hbm %s3064_s1, 2048 }
  0x6a   : > { %p1757_p3 = scmp.ne.s32.totalorder %s2344_s0, %s1756_s14  ;;  %p1762_p11 = scmp.lt.u32.totalorder %s2344_s0, %s3064_s1 }
  0x6b   : > { %p1763_p13 = scmp.lt.u32.totalorder %s1761_s30, %s1756_s14  ;;  %p1765_p7 = scmp.lt.u32.totalorder %s1756_s14, %s2344_s0 }
  0x6c   : > { %p1759_p10 = pnand %p1758_p0, %p1757_p3 }
  0x6d   : > { %p1764_p5 = por %p1763_p13, %p1762_p11 }
  0x6e   : > { %p1760_p1 = pneg %p1759_p10 }
  0x6f   : > { %p1766_p9 = por %p1765_p7, %p1764_p5 }
  0x71   : > { %p1767_p12 = pnand %p1766_p9, %p1760_p1 }
  0x73   : > { %1770 = shalt.err (!%p1767_p12)
}
  0x74   : > { %s1771_s20 = scalar_lea.vmem %s2352_s9, 512  ;;  %s2065_s8 = smov [#allocation8]  }
  0x75   : > { %p1772_p3 = scmp.ne.s32.totalorder %s2352_s9, %s1771_s20  ;;  %s1776_s6 = sshll.u32 %s2065_s8, 4  ;;  %s1777_s6 = int_to_ptr.vmem [resolvable:$false] %s1776_s6 }
  0x76   : > { %s1778_s13 = scalar_lea.vmem %s1777_s6, 1024  ;;  %p1779_p4 = scmp.lt.s32.totalorder %s2352_s9, %s1777_s6 }
  0x77   : > { %p1774_p10 = pnand %p1772_p3, %p1758_p0  ;;  %p1780_p11 = scmp.lt.s32.totalorder %s1778_s13, %s1771_s20 }
  0x79   : > { %p1775_p6 = pneg %p1774_p10  ;;  %p1781_p13 = por %p1780_p11, %p1779_p4 }
  0x7b   : > { %p1782_p5 = pnand %p1781_p13, %p1775_p6 }
  0x7d   : > { %1785 = shalt.err (!%p1782_p5)
}
  0x7e   : > { %s3067_s14 = smov 8   ;;  %s3068_s30 = smov 128  }
  0x7f   : > { %s3069_s29 = smov 256   ;;  %s134_s20 = sadd.s32 1, %s1974_s17 }
  0x80   : > { %1485 = dma.hbm_to_vmem [thread:$0]  (!%p2348_p8), %s2344_s0, 512, %s2352_s9, %s2354_s25, %s3069_s29, %s3068_s30, %s3067_s14  }
  0x81   : > { %p141_p6 = scmp.ne.s32.totalorder %s1974_s17, %s1970_s16  ;;  %s259_s8 = sand.u32 1, %s1974_s17  }
  0x82   : > { %s1350_s26 = sshll.u32 %s259_s8, 5  ;;  %p3070_p4 = scmp.eq.s32.totalorder %s2018_s28, 0 }
  0x83   : > { %s261_s6 = scalar_lea.vmem [#allocation11], %s1350_s26  ;;  %p3071_p1 = scmp.eq.s32.totalorder %s2189_s7, 0 }
  0x84   : > { %p143_p0 = por %p141_p6, %p3070_p4  ;;  %s272_s13 = sshll.u32 %s261_s6, 4  ;;  %s2398_s13 = int_to_ptr.vmem [resolvable:$true] %s272_s13 }
  0x85   : > { %s2394_s1 = scalar_select %p3071_p1, %s1974_s17, %s134_s20  }
  0x86   : > { %s3073_s23 = sshll.u32 %s2014_s27, 10  ;;  %s3074_s3 = sld [smem:[#allocation46_spill]] }
  0x87   : > { %3072 = sst [smem:[#allocation36_spill]] %s2394_s1  ;;  %s1962_s15 = sadd.s32 128, %s3073_s23 }
  0x88   : > { %p3075_p8 = scmp.lt.s32.totalorder %s2018_s28, 4 }
  0x8a   : > { %p2407_p7 = pnand %p3075_p8, %p143_p0 }
  0x8c   : > { %s2403_s24 = scalar_lea.hbm %s3074_s3, %s1962_s15  ;;  %p1788_p12 = pneg %p2407_p7 }
  0x8d   : > { %s1786_s7 = scalar_lea.hbm %s2403_s24, 512  ;;  %s1791_s15 = scalar_lea.hbm %s3074_s3, 2048 }
  0x8e   : > { %p1787_p9 = scmp.ne.s32.totalorder %s2403_s24, %s1786_s7  ;;  %p1792_p11 = scmp.lt.u32.totalorder %s2403_s24, %s3074_s3 }
  0x8f   : > { %p1793_p13 = scmp.lt.u32.totalorder %s1791_s15, %s1786_s7  ;;  %p1795_p6 = scmp.lt.u32.totalorder %s1786_s7, %s2403_s24 }
  0x90   : > { %p1789_p3 = pnand %p1788_p12, %p1787_p9 }
  0x91   : > { %p1794_p5 = por %p1793_p13, %p1792_p11 }
  0x92   : > { %p1790_p10 = pneg %p1789_p3 }
  0x93   : > { %p1796_p4 = por %p1795_p6, %p1794_p5 }
  0x95   : > { %p1797_p0 = pnand %p1796_p4, %p1790_p10 }
  0x97   : > { %1800 = shalt.err (!%p1797_p0)
}
  0x98   : > { %s1801_s25 = scalar_lea.vmem %s2398_s13, 512  ;;  %s2066_s20 = smov [#allocation11]  }
  0x99   : > { %p1802_p1 = scmp.ne.s32.totalorder %s2398_s13, %s1801_s25  ;;  %s1806_s8 = sshll.u32 %s2066_s20, 4  ;;  %s1807_s8 = int_to_ptr.vmem [resolvable:$false] %s1806_s8 }
  0x9a   : > { %s1808_s26 = scalar_lea.vmem %s1807_s8, 1024  ;;  %p1809_p3 = scmp.lt.s32.totalorder %s2398_s13, %s1807_s8 }
  0x9b   : > { %p1804_p8 = pnand %p1802_p1, %p1788_p12  ;;  %p1810_p11 = scmp.lt.s32.totalorder %s1808_s26, %s1801_s25 }
  0x9d   : > { %p1805_p9 = pneg %p1804_p8  ;;  %p1811_p13 = por %p1810_p11, %p1809_p3 }
  0x9f   : > { %p1812_p5 = pnand %p1811_p13, %p1805_p9 }
  0xa1   : > { %1815 = shalt.err (!%p1812_p5)
}
  0xa2   : > { %1491 = dma.hbm_to_vmem [thread:$0]  (!%p2407_p7), %s2403_s24, 512, %s2398_s13, %s2229_s12, %s3069_s29, %s3068_s30, %s3067_s14  }
  0xa3   : > { %284 = sbr.rel (%p2296_p2) target bundleno = 623 (0x26f), region = 36 }
  0xaa   : > { %p3077_p12 = scmp.eq.s32.totalorder %s2261_s11, 0 }
  0xac   : > { %1941 = dma.done.wait (%p3077_p12), [#allocation7], 16   ;;  %p3078_p10 = pmov %p3077_p12 }
  0xad   : > { %s2447_s6 = sand.u32 1, %s1994_s22   ;;  %p3081_p7 = scmp.ne.s32.totalorder %s3050_s4, 0 }
  0xae   : > { %1943 = vsyncadd (%p3078_p10), [#allocation7], 4294967280  ;;  %3079 = sst [smem:[#allocation37_spill]] %s2447_s6  ;;  %s1355_s0 = sshll.u32 %s2447_s6, 5 }
  0xaf   : > { %s291_s7 = scalar_lea.sflag [#allocation5], %s2447_s6  ;;  %s2451_s21 = scalar_lea.vmem [#allocation8], %s1355_s0 }
  0xb0   : > { %3080 = sst [smem:[#allocation38_spill]] %s2451_s21 }
  0xb1   : > { %1945 = dma.done.wait (%p3081_p7), %s291_s7, 512  }
  0xb2   : > { %1947 = vsyncadd (%p3081_p7), %s291_s7, 4294966784  ;;  %s299_s24 = sand.u32 1, %s2261_s11   ;;  %s301_s12 = sand.u32 1, %s1982_s19  }
  0xb3   : > { %s2459_s5 = sshll.u32 %s301_s12, 5  ;;  %s300_s14 = scalar_lea.sflag [#allocation10], %s299_s24 }
  0xb4   : > { %s303_s30 = scalar_lea.vmem [#allocation9], %s2459_s5  ;;  %p3082_p2 = scmp.ne.s32.totalorder %s3051_s10, 0 }
  0xb6   : > { %1949 = dma.done.wait (%p3082_p2), %s300_s14, 512  }
  0xb7   : > { %1951 = vsyncadd (%p3082_p2), %s300_s14, 4294966784  ;;  %s310_s29 = sand.u32 1, %s1970_s16   ;;  %p3083_p6 = scmp.ne.s32.totalorder %s3052_s18, 0 }
  0xb8   : > { %s2467_s4 = sshll.u32 %s310_s29, 5 }
  0xb9   : > { %s312_s13 = scalar_lea.vmem [#allocation11], %s2467_s4 }
  0xba   : > { %1953 = dma.done.wait (%p3083_p6), %s300_s14, 512  }
  0xbb   : > { %1955 = vsyncadd (%p3083_p6), %s300_s14, 4294966784 }
  0xbc   : > { %317 = sfence }
  0xbd   : > { %v354_v0 = vld [vmem:[%s2451_s21] sm:$0xff]   ;;  %s2475_s11 = scalar_lea.vmem [#allocation12], %s1355_s0  ;;  %s2028_s10 = smov 1  }
  0xbe   : > { %3084 = sst [smem:[#allocation39_spill]] %s2475_s11  ;;  %v2020_v1 = vmov %v354_v0   ;;  %v2024_v2 = vmov %v354_v0  }
  0xbf LB: >> { %s1359_s23 = sshll.u32 %s2030_s10, 3  ;;  %s360_s10 = sadd.s32 1, %s2030_s10   ;;  %s2030_s10 = sphi %s2028_s10, %s360_s10   ;;  %v2026_v2 = vphi %v2024_v2, %v2025_v2   ;;  %v2022_v1 = vphi %v2020_v1, %v2021_v1  }
  0xc0   : >> { %s364_s15 = scalar_lea.vmem %s2451_s21, %s1359_s23 [#allocation8]  ;;  %p357_p4 = scmp.ge.s32.totalorder %s360_s10, 4  }
  0xc1   : >> { %v365_v3 = vld [vmem:[%s364_s15] sm:$0xff]  ;;  %s2040_s18 = smov (%p357_p4), 1  }
  0xc2   : >> { %v366_v4 = vadd.f32 %v2026_v2, %v365_v3   ;;  %v367_v5 = vmax.f32 %v2022_v1, %v365_v3   ;;  %359 = sbr.rel (!%p357_p4) target bundleno = 191 (0xbf), region = 157  ;;  %v368_v6 = vld [vmem:[%s303_s30] sm:$0xff] (%p357_p4)  }
  0xc3   : > { %v2032_v7 = vmov (%p357_p4), %v368_v6   ;;  %v2036_v8 = vmov (%p357_p4), %v368_v6  }
  0xc4   : >> { %v2021_v1 = vmov %v367_v5   ;;  %v2025_v2 = vmov %v366_v4  }
  0xc9 LB: >> { %s1360_s2 = sshll.u32 %s2042_s18, 3  ;;  %s374_s18 = sadd.s32 1, %s2042_s18   ;;  %s2042_s18 = sphi %s2040_s18, %s374_s18   ;;  %v2038_v8 = vphi %v2036_v8, %v2037_v8   ;;  %v2034_v7 = vphi %v2032_v7, %v2033_v7  }
  0xca   : >> { %s378_s9 = scalar_lea.vmem %s303_s30, %s1360_s2 [#allocation9]  ;;  %p371_p0 = scmp.ge.s32.totalorder %s374_s18, 4  }
  0xcb   : >> { %v379_v9 = vld [vmem:[%s378_s9] sm:$0xff]  ;;  %s2052_s25 = smov (%p371_p0), 1  }
  0xcc   : >> { %v380_v10 = vadd.f32 %v2038_v8, %v379_v9   ;;  %v381_v11 = vmax.f32 %v2034_v7, %v379_v9   ;;  %373 = sbr.rel (!%p371_p0) target bundleno = 201 (0xc9), region = 168  ;;  %v382_v12 = vld [vmem:[%s312_s13] sm:$0xff] (%p371_p0)  }
  0xcd   : > { %v2044_v13 = vmov (%p371_p0), %v382_v12   ;;  %v2048_v14 = vmov (%p371_p0), %v382_v12  }
  0xce   : >> { %v2033_v7 = vmov %v381_v11   ;;  %v2037_v8 = vmov %v380_v10  }
  0xd3 LB: >> { %s1361_s20 = sshll.u32 %s2054_s25, 3  ;;  %s388_s25 = sadd.s32 1, %s2054_s25   ;;  %s2054_s25 = sphi %s2052_s25, %s388_s25   ;;  %v2050_v14 = vphi %v2048_v14, %v2049_v14   ;;  %v2046_v13 = vphi %v2044_v13, %v2045_v13  }
  0xd4   : >> { %s392_s8 = scalar_lea.vmem %s312_s13, %s1361_s20 [#allocation11]  ;;  %p385_p1 = scmp.ge.s32.totalorder %s388_s25, 4  }
  0xd5   : >> { %v393_v15 = vld [vmem:[%s392_s8] sm:$0xff]  ;;  %s3085_s26 = sld [smem:[#allocation25_spill]] (%p385_p1)  ;;  %vm408_vm0 = vcmask (%p385_p1), 179200   ;;  %vm410_vm1 = vcmask (%p385_p1), 177152   ;;  %s2067_s0 = smov (%p385_p1), 3   ;;  %v2068_v18 = vmov (%p385_p1), 0.0  }
  0xd6   : >> { %v394_v16 = vadd.f32 %v2050_v14, %v393_v15   ;;  %v395_v17 = vmax.f32 %v2046_v13, %v393_v15   ;;  %387 = sbr.rel (!%p385_p1) target bundleno = 211 (0xd3), region = 179  ;;  %427 = vrot.lane.b32.xlu1 (%p385_p1), %v366_v4, %s2067_s0  ;;  %409 = vst.msk [vmem:[#allocation2] sm:$0xff] (%p385_p1), %vm408_vm0, %v2068_v18  ;;  %412 = vst.msk [vmem:[#allocation2 + $0x10] sm:$0xff] (%p385_p1), %vm408_vm0, %v2068_v18  ;;  %vm430_vm2 = vcmask (%p385_p1), 154648   ;;  %vm418_vm3 = vcmask (%p385_p1), 154653   ;;  %s2069_s14 = smov (%p385_p1), 126  }
  0xd7   : > { %411 = vst.msk [vmem:[#allocation2 + $0x8] sm:$0x3f] (%p385_p1), %vm410_vm1, %v2068_v18  ;;  %413 = vst.msk [vmem:[#allocation2 + $0x18] sm:$0x3f] (%p385_p1), %vm410_vm1, %v2068_v18  ;;  %vm441_vm4 = vcmask (%p385_p1), 149528   ;;  %vm450_vm5 = vcmask (%p385_p1), 130048  }
  0xd8   : >> { %v2045_v13 = vmov %v395_v17   ;;  %v2049_v14 = vmov %v394_v16   ;;  %vm452_vm6 = vcmask (%p385_p1), 128000   ;;  %s2070_s30 = smov (%p385_p1), 124   ;;  %s2071_s29 = smov (%p385_p1), 122  }
  0xd9   : > { %s2072_s4 = smov (%p385_p1), 127   ;;  %s2073_s13 = smov (%p385_p1), 125  }
  0xda   : > { %433 = vrot.lane.b32.xlu1 (%p385_p1), %v367_v5, %s2067_s0  ;;  %s2074_s10 = smov (%p385_p1), 123   ;;  %s2493_s23 = sld [smem:[#allocation4 + $0x2]] (%p385_p1) }
  0xdb   : > { %p396_p8 = scmp.gt.s32.totalorder (%p385_p1), %s3085_s26, 0  ;;  %p399_p9 = scmp.lt.s32.totalorder (%p385_p1), %s3085_s26, 1 }
  0xdc   : > { %s2495_s15 = sld [smem:[#allocation4]] (%p385_p1)  ;;  %s2497_s18 = sld [smem:[#allocation4 + $0x33]] (%p385_p1) }
  0xdd   : > { %s397_s7 = scalar_select %p396_p8, 1, 0 }
  0xde   : > { %s400_s24 = scalar_select %p399_p9, 1, 0 }
  0xdf   : > { %s398_s12 = scvt.s32.f32 %s397_s7  ;;  %s2499_s2 = sld [smem:[#allocation4 + $0x4]] }
  0xe0   : > { %s401_s5 = scvt.s32.f32 %s400_s24  ;;  %s2501_s9 = sld [smem:[#allocation4 + $0x31]]  ;;  %v639_v52 = vstv %s2493_s23 }
  0xe1   : > { %v402_v19 = vstv %s398_s12  ;;  %s2505_s25 = sld [smem:[#allocation4 + $0x35]]  ;;  %s2507_s20 = sld [smem:[#allocation4 + $0x6]] }
  0xe2   : > { %v403_v20 = vmul.f32 %v402_v19, %v380_v10  ;;  %v405_v21 = vstv %s401_s5  ;;  %v404_v23 = vmul.f32 %v402_v19, %v381_v11  ;;  %s2511_s8 = sld [smem:[#allocation4 + $0x38]]  ;;  %s2513_s26 = sld [smem:[#allocation4 + $0x3f]]  ;;  %v619_v55 = vstv %s2495_s15 }
  0xe3   : > { %v407_v22 = vmul.f32 %v405_v21, %v395_v17  ;;  %v406_v24 = vmul.f32 %v405_v21, %v394_v16  ;;  %s2518_s7 = sld [smem:[#allocation4 + $0x46]]  ;;  %s2520_s24 = sld [smem:[#allocation4 + $0x4d]]  ;;  %v642_v56 = vstv %s2497_s18 }
  0xe4   : > { %415 = vrot.lane.b32.xlu0 %v403_v20, %s2067_s0  ;;  %s2522_s12 = sld [smem:[#allocation4 + $0x54]]  ;;  %s2527_s5 = sld [smem:[#allocation4 + $0x7]] }
  0xe5   : > { %444 = vrot.lane.b32.xlu1 %v407_v22, %s2067_s0  ;;  %v659_v58 = vstv %s2499_s2  ;;  %s2546_s23 = sld [smem:[#allocation4 + $0x3a]]  ;;  %s2548_s15 = sld [smem:[#allocation4 + $0xb]] }
  0xe6   : > { %v622_v63 = vstv %s2501_s9  ;;  %s2550_s18 = sld [smem:[#allocation4 + $0x10]]  ;;  %s2554_s2 = sld [smem:[#allocation4 + $0x2a]] }
  0xe7   : > { %v662_v1 = vstv %s2505_s25  ;;  %v679_v2 = vstv %s2507_s20  ;;  %s2557_s9 = sld [smem:[#allocation4 + $0x17]]  ;;  %s2559_s25 = sld [smem:[#allocation4 + $0x3c]] }
  0xe8   : > { %421 = vrot.lane.b32.xlu0 %v404_v23, %s2067_s0  ;;  %s2561_s20 = sld [smem:[#allocation4 + $0x1e]]  ;;  %s2563_s3 = sld [smem:[#allocation4 + $0x25]] }
  0xe9   : > { %s2566_s27 = sld [smem:[#allocation4 + $0x2c]]  ;;  %s2571_s22 = sld [smem:[#allocation4 + $0x41]] }
  0xea   : > { %v689_v19 = vstv %s2527_s5  ;;  %s2576_s5 = sld [smem:[#allocation4 + $0x3e]]  ;;  %s2583_s19 = sld [smem:[#allocation4 + $0x4f]] }
  0xeb   : > { %s2590_s1 = sld [smem:[#allocation4 + $0x5d]]  ;;  %s2611_s17 = sld [smem:[#allocation4 + $0x43]] }
  0xec   : > { %438 = vrot.lane.b32.xlu0 %v406_v24, %s2067_s0  ;;  %s2516_s0 = sld [smem:[#allocation4 + $0x37]]  ;;  %s2619_s16 = sld [smem:[#allocation4 + $0x14]] }
  0xed   : > { %s2622_s28 = sld [smem:[#allocation4 + $0x51]]  ;;  %s2624_s6 = sld [smem:[#allocation4 + $0x58]] }
  0xee   : > { %s2633_s11 = sld [smem:[#allocation4 + $0x45]]  ;;  %s2646_s21 = sld [smem:[#allocation4 + $0x22]] }
  0xef   : > { %3086 = sst [smem:[#allocation40_spill]] %s2566_s27 }
  0xf1   : > { %3088 = sst [smem:[#allocation42_spill]] %s2590_s1 }
  0xf2   : > { %v682_v14 = vstv %s2516_s0  ;;  %s2568_s0 = sld [smem:[#allocation4 + $0xd]] }
 0x148   : > { %v428_v25 = vpop.permute.xlu1 %427 }
 0x149   : > { %431 = vst.msk [vmem:[#allocation2 + $0x3] sm:$0xff] %vm430_vm2, %v428_v25  ;;  %v692_v25 = vstv %s2511_s8  ;;  %s2581_s8 = sld [smem:[#allocation4 + $0x48]] }
 0x14c   : > { %v434_v26 = vpop.permute.xlu1 %433 }
 0x14d   : > { %436 = vst.msk [vmem:[#allocation2 + $0x13] sm:$0xff] %vm430_vm2, %v434_v26 }
 0x156   : > { %v416_v27 = vpop.permute.xlu0 %415 }
 0x157   : > { %419 = vst.msk [vmem:[#allocation2 - $0x5] sm:$0xe0] %vm418_vm3, %v416_v27  ;;  %v445_v28 = vpop.permute.xlu1 %444 }
 0x158   : > { %447 = vst.msk [vmem:[#allocation2 + $0x1b] sm:$0x7] %vm441_vm4, %v445_v28 }
 0x15a   : > { %v422_v29 = vpop.permute.xlu0 %421 }
 0x15b   : > { %425 = vst.msk [vmem:[#allocation2 + $0xb] sm:$0xe0] %vm418_vm3, %v422_v29  ;;  %v762_v29 = vstv %s2513_s26  ;;  %s2595_s26 = sld [smem:[#allocation4 + $0x12]] }
 0x15e   : > { %v448_v30 = vld [vmem:[#allocation2] sm:$0xff]  ;;  %v439_v31 = vpop.permute.xlu0 %438 }
 0x15f   : > { %451 = vst.msk [vmem:[#allocation3] sm:$0xff] %vm450_vm5, %v448_v30  ;;  %v533_v32 = vld [vmem:[#allocation2 + $0x18] sm:$0x3f]  ;;  %471 = vrot.lane.b32.xlu0 %v448_v30, %s2069_s14 }
 0x160   : > { %442 = vst.msk [vmem:[#allocation2 + $0xb] sm:$0x7] %vm441_vm4, %v439_v31  ;;  %v551_v36 = vld [vmem:[#allocation2 + $0x18] sm:$0x3f]  ;;  %v902_v31 = vstv %s2520_s24  ;;  %s2656_s24 = sld [smem:[#allocation4 + $0x53]] }
 0x161   : > { %536 = vst.msk [vmem:[#allocation3 + $0x78] sm:$0x3f] %vm452_vm6, %v533_v32  ;;  %v577_v38 = vld [vmem:[#allocation2 + $0x18] sm:$0x3f] }
 0x162   : > { %v532_v33 = vld [vmem:[#allocation2 + $0x10] sm:$0xff]  ;;  %v603_v40 = vld [vmem:[#allocation2 + $0x18] sm:$0x3f] }
 0x163   : > { %535 = vst.msk [vmem:[#allocation3 + $0x70] sm:$0xff] %vm450_vm5, %v532_v33  ;;  %497 = vrot.lane.b32.xlu0 %v448_v30, %s2070_s30  ;;  %554 = vrot.lane.b32.xlu1 %v532_v33, %s2069_s14  ;;  %v538_v42 = vld [vmem:[#allocation2 + $0x18] sm:$0x3f] }
 0x164   : > { %v564_v44 = vld [vmem:[#allocation2 + $0x18] sm:$0x3f] }
 0x165   : > { %v590_v46 = vld [vmem:[#allocation2 + $0x18] sm:$0x3f] }
 0x166   : > { %v617_v54 = vld [vmem:[#allocation3] sm:$0xff] }
 0x167   : > { %v449_v34 = vld [vmem:[#allocation2 + $0x8] sm:$0x3f]  ;;  %523 = vrot.lane.b32.xlu0 %v448_v30, %s2071_s29  ;;  %580 = vrot.lane.b32.xlu1 %v532_v33, %s2070_s30  ;;  %v620_v3 = vmul.f32 %v619_v55, %v617_v54  ;;  %v849_v54 = vstv %s2557_s9  ;;  %s2760_s9 = sld [smem:[#allocation4 + $0x5a]] }
 0x168   : > { %453 = vst.msk [vmem:[#allocation3 + $0x8] sm:$0x3f] %vm452_vm6, %v449_v34  ;;  %v468_v35 = vld [vmem:[#allocation2 + $0x8] sm:$0x3f]  ;;  %v972_v34 = vstv %s2522_s12  ;;  %s2597_s12 = sld [smem:[#allocation4 + $0x19]] }
 0x169   : > { %v494_v37 = vld [vmem:[#allocation2 + $0x8] sm:$0x3f] }
 0x16a   : > { %v520_v39 = vld [vmem:[#allocation2 + $0x8] sm:$0x3f]  ;;  %v618_v0 = vld [vmem:[#allocation3 + $0x70] sm:$0xff] }
 0x16b   : > { %606 = vrot.lane.b32.xlu1 %v532_v33, %s2071_s29  ;;  %473 = vrot.lane.b32.xlu0 %v468_v35, %s2069_s14  ;;  %v455_v41 = vld [vmem:[#allocation2 + $0x8] sm:$0x3f]  ;;  %v623_v11 = vmul.f32 %v622_v63, %v618_v0  ;;  %v688_v28 = vld [vmem:[#allocation3 + $0x71] sm:$0xff]  ;;  %v749_v0 = vstv %s2568_s0  ;;  %s2630_s0 = sld [smem:[#allocation4 + $0x1b]] }
 0x16c   : > { %v481_v43 = vld [vmem:[#allocation2 + $0x8] sm:$0x3f] }
 0x16d   : > { %v507_v45 = vld [vmem:[#allocation2 + $0x8] sm:$0x3f] }
 0x16f   : > { %556 = vrot.lane.b32.xlu1 %v551_v36, %s2069_s14  ;;  %499 = vrot.lane.b32.xlu0 %v494_v37, %s2070_s30  ;;  %s2531_s14 = sld [smem:[#allocation4 + $0xe]]  ;;  %v687_v18 = vld [vmem:[#allocation3 + $0x1] sm:$0xff]  ;;  %v712_v36 = vstv %s2546_s23  ;;  %s2603_s23 = sld [smem:[#allocation4 + $0x20]] }
 0x173   : > { %582 = vrot.lane.b32.xlu1 %v577_v38, %s2070_s30  ;;  %525 = vrot.lane.b32.xlu0 %v520_v39, %s2071_s29  ;;  %s2533_s30 = sld [smem:[#allocation4 + $0x5b]]  ;;  %v729_v38 = vstv %s2548_s15  ;;  %s2609_s15 = sld [smem:[#allocation4 + $0x27]] }
 0x175   : > { %v759_v39 = vstv %s2531_s14  ;;  %s2663_s14 = sld [smem:[#allocation4 + $0x1]] }
 0x177   : > { %608 = vrot.lane.b32.xlu1 %v603_v40, %s2071_s29  ;;  %458 = vrot.lane.b32.xlu0 %v448_v30, %s2072_s4  ;;  %s2538_s29 = sld [smem:[#allocation4 + $0x9]] }
 0x179   : > { %v1042_v35 = vstv %s2533_s30  ;;  %s2677_s30 = sld [smem:[#allocation4 + $0x32]] }
 0x17b   : > { %484 = vrot.lane.b32.xlu1 %v448_v30, %s2073_s13  ;;  %541 = vrot.lane.b32.xlu0 %v532_v33, %s2072_s4 }
 0x17d   : > { %v709_v26 = vstv %s2538_s29  ;;  %s2588_s29 = sld [smem:[#allocation4 + $0x56]] }
 0x17f   : > { %567 = vrot.lane.b32.xlu1 %v532_v33, %s2073_s13  ;;  %510 = vrot.lane.b32.xlu0 %v448_v30, %s2074_s10  ;;  %v832_v30 = vstv %s2518_s7  ;;  %s2654_s7 = sld [smem:[#allocation4 + $0x4c]] }
 0x183   : > { %593 = vrot.lane.b32.xlu1 %v532_v33, %s2074_s10  ;;  %460 = vrot.lane.b32.xlu0 %v455_v41, %s2072_s4  ;;  %v690_v33 = vmul.f32 %v689_v19, %v687_v18  ;;  %3087 = sst [smem:[#allocation41_spill]] %s2588_s29  ;;  %v897_v18 = vld [vmem:[#allocation3 + $0x4] sm:$0xff] }
 0x184   : > { %v967_v19 = vld [vmem:[#allocation3 + $0x5] sm:$0xff] }
 0x187   : > { %543 = vrot.lane.b32.xlu1 %v538_v42, %s2072_s4  ;;  %486 = vrot.lane.b32.xlu0 %v481_v43, %s2073_s13  ;;  %s2540_s4 = sld [smem:[#allocation4 + $0x15]] }
 0x18b   : > { %569 = vrot.lane.b32.xlu1 %v564_v44, %s2073_s13  ;;  %512 = vrot.lane.b32.xlu0 %v507_v45, %s2074_s10  ;;  %s2542_s13 = sld [smem:[#allocation4 + $0x1c]]  ;;  %v693_v45 = vmul.f32 %v692_v25, %v688_v28 }
 0x18d   : > { %v829_v40 = vstv %s2540_s4  ;;  %s2698_s4 = sld [smem:[#allocation4 + $0x8]] }
 0x18f   : > { %595 = vrot.lane.b32.xlu1 %v590_v46, %s2074_s10  ;;  %s2544_s10 = sld [smem:[#allocation4 + $0x23]] }
 0x191   : > { %v899_v46 = vstv %s2542_s13  ;;  %s2700_s13 = sld [smem:[#allocation4 + $0xf]] }
 0x1d1   : > { %v472_v47 = vpop.permute.xlu0 %471 }
 0x1d2   : > { %478 = vst.msk [vmem:[#allocation3 + $0x20] sm:$0xff] %vm450_vm5, %v472_v47  ;;  %v779_v47 = vstv %s2550_s18  ;;  %s2735_s18 = sld [smem:[#allocation4 + $0xc]] }
 0x1d5   : > { %v555_v48 = vpop.permute.xlu1 %554  ;;  %v498_v49 = vpop.permute.xlu0 %497 }
 0x1d6   : > { %561 = vst.msk [vmem:[#allocation3 + $0x90] sm:$0xff] %vm450_vm5, %v555_v48  ;;  %504 = vst.msk [vmem:[#allocation3 + $0x40] sm:$0xff] %vm450_vm5, %v498_v49  ;;  %v732_v49 = vstv %s2559_s25  ;;  %s2616_s25 = sld [smem:[#allocation4 + $0x4a]] }
 0x1d9   : > { %v581_v50 = vpop.permute.xlu1 %580  ;;  %v524_v51 = vpop.permute.xlu0 %523  ;;  %v637_v53 = vld [vmem:[#allocation3 + $0x20] sm:$0xff] }
 0x1da   : > { %587 = vst.msk [vmem:[#allocation3 + $0xb0] sm:$0xff] %vm450_vm5, %v581_v50  ;;  %530 = vst.msk [vmem:[#allocation3 + $0x60] sm:$0xff] %vm450_vm5, %v524_v51  ;;  %v640_v62 = vmul.f32 %v639_v52, %v637_v53  ;;  %v969_v50 = vstv %s2544_s10  ;;  %v1039_v51 = vstv %s2554_s2  ;;  %v758_v52 = vld [vmem:[#allocation3 + $0x72] sm:$0xff]  ;;  %s2726_s10 = sld [smem:[#allocation4 + $0x3b]] }
 0x1db   : > { %v828_v53 = vld [vmem:[#allocation3 + $0x73] sm:$0xff]  ;;  %s2757_s2 = sld [smem:[#allocation4 + $0x13]] }
 0x1dc   : > { %v641_v10 = vadd.f32 %v640_v62, %v620_v3  ;;  %v1059_v62 = vstv %s2566_s27  ;;  %s2665_s27 = sld [smem:[#allocation4 + $0x3]] }
 0x1dd   : > { %v638_v57 = vld [vmem:[#allocation3 + $0x90] sm:$0xff]  ;;  %v657_v59 = vld [vmem:[#allocation3 + $0x40] sm:$0xff]  ;;  %v607_v60 = vpop.permute.xlu1 %606  ;;  %v474_v61 = vpop.permute.xlu0 %473 }
 0x1de   : > { %613 = vst.msk [vmem:[#allocation3 + $0xd0] sm:$0xff] %vm450_vm5, %v607_v60  ;;  %v643_v4 = vmul.f32 %v642_v56, %v638_v57  ;;  %v660_v5 = vmul.f32 %v659_v58, %v657_v59  ;;  %v898_v58 = vld [vmem:[#allocation3 + $0x74] sm:$0xff]  ;;  %v919_v60 = vstv %s2561_s20  ;;  %s2775_s20 = sld [smem:[#allocation4 + $0x18]] }
 0x1df   : > { %479 = vst.msk [vmem:[#allocation3 + $0x28] sm:$0x3f] %vm452_vm6, %v474_v61  ;;  %v968_v59 = vld [vmem:[#allocation3 + $0x75] sm:$0xff]  ;;  %v989_v61 = vstv %s2563_s3  ;;  %s2827_s3 = sld [smem:[#allocation4 + $0x26]] }
 0x1e0   : > { %v644_v15 = vadd.f32 %v643_v4, %v623_v11  ;;  %v661_v16 = vadd.f32 %v660_v5, %v641_v10  ;;  %v782_v4 = vstv %s2571_s22  ;;  %v752_v11 = vstv %s2576_s5  ;;  %s2648_s5 = sld [smem:[#allocation4 + $0x29]]  ;;  %s2715_s22 = sld [smem:[#allocation4 + $0xa]] }
 0x1e1   : > { %v658_v6 = vld [vmem:[#allocation3 + $0xb0] sm:$0xff]  ;;  %v677_v7 = vld [vmem:[#allocation3 + $0x60] sm:$0xff]  ;;  %v557_v8 = vpop.permute.xlu1 %556  ;;  %v500_v9 = vpop.permute.xlu0 %499 }
 0x1e2   : > { %v663_v12 = vmul.f32 %v662_v1, %v658_v6  ;;  %v680_v13 = vmul.f32 %v679_v2, %v677_v7  ;;  %562 = vst.msk [vmem:[#allocation3 + $0x98] sm:$0x3f] %vm452_vm6, %v557_v8  ;;  %505 = vst.msk [vmem:[#allocation3 + $0x48] sm:$0x3f] %vm452_vm6, %v500_v9  ;;  %v757_v6 = vld [vmem:[#allocation3 + $0x2] sm:$0xff]  ;;  %v2626_v7 = vmul.f32 %v762_v29, %v758_v52  ;;  %v1038_v8 = vld [vmem:[#allocation3 + $0x76] sm:$0xff]  ;;  %v1062_v29 = vstv %s2590_s1 }
 0x1e3   : > { %v827_v9 = vld [vmem:[#allocation3 + $0x3] sm:$0xff]  ;;  %s2679_s1 = sld [smem:[#allocation4 + $0x34]] }
 0x1e4   : > { %v664_v22 = vadd.f32 %v663_v12, %v644_v15  ;;  %v681_v23 = vadd.f32 %v680_v13, %v661_v16  ;;  %v2637_v12 = vmul.f32 %v832_v30, %v828_v53  ;;  %v2641_v13 = vmul.f32 %v902_v31, %v898_v58  ;;  %v1037_v31 = vld [vmem:[#allocation3 + $0x6] sm:$0xff] }
 0x1e5   : > { %v678_v17 = vld [vmem:[#allocation3 + $0xd0] sm:$0xff]  ;;  %v583_v20 = vpop.permute.xlu1 %582  ;;  %v526_v21 = vpop.permute.xlu0 %525  ;;  %v852_v15 = vstv %s2581_s8  ;;  %v872_v58 = vstv %s2616_s25  ;;  %s2765_s8 = sld [smem:[#allocation4 + $0x16]] }
 0x1e6   : > { %v683_v24 = vmul.f32 %v682_v14, %v678_v17  ;;  %588 = vst.msk [vmem:[#allocation3 + $0xb8] sm:$0x3f] %vm452_vm6, %v583_v20  ;;  %531 = vst.msk [vmem:[#allocation3 + $0x68] sm:$0x3f] %vm452_vm6, %v526_v21  ;;  %v707_v27 = vld [vmem:[#allocation3 + $0x21] sm:$0xff]  ;;  %v691_v43 = vadd.f32 %v690_v33, %v681_v23  ;;  %v2643_v14 = vmul.f32 %v972_v34, %v968_v59  ;;  %v992_v23 = vstv %s2588_s29  ;;  %s2689_s29 = sld [smem:[#allocation4 + $0x36]] }
 0x1e7   : > { %v710_v44 = vmul.f32 %v709_v26, %v707_v27  ;;  %v777_v21 = vld [vmem:[#allocation3 + $0x22] sm:$0xff]  ;;  %v2660_v26 = vmul.f32 %v1042_v35, %v1038_v8  ;;  %v799_v35 = vstv %s2595_s26  ;;  %s2687_s26 = sld [smem:[#allocation4 + $0x5]]  ;;  %v942_v59 = vstv %s2622_s28  ;;  %s2794_s28 = sld [smem:[#allocation4 + $0x1a]] }
 0x1e8   : > { %v684_v32 = vadd.f32 %v683_v24, %v664_v22  ;;  %v922_v22 = vstv %s2583_s19  ;;  %v760_v24 = vmul.f32 %v759_v39, %v757_v6  ;;  %v2675_v39 = vmul.f32 %v899_v46, %v897_v18  ;;  %s2782_s19 = sld [smem:[#allocation4 + $0x1d]]  ;;  %s2801_s25 = sld [smem:[#allocation4 + $0x4e]] }
 0x1e9   : > { %v708_v37 = vld [vmem:[#allocation3 + $0x91] sm:$0xff]  ;;  %v609_v41 = vpop.permute.xlu1 %608  ;;  %v459_v42 = vpop.permute.xlu0 %458  ;;  %v727_v48 = vld [vmem:[#allocation3 + $0x41] sm:$0xff]  ;;  %v711_v3 = vadd.f32 %v710_v44, %v691_v43  ;;  %v1012_v6 = vstv %s2624_s6  ;;  %v959_v8 = vstv %s2646_s21  ;;  %s2796_s21 = sld [smem:[#allocation4 + $0x4b]]  ;;  %s2849_s6 = sld [smem:[#allocation4 + $0x28]] }
 0x1ea   : > { %614 = vst.msk [vmem:[#allocation3 + $0xd8] sm:$0x3f] %vm452_vm6, %v609_v41  ;;  %v694_v55 = vadd.f32 %v693_v45, %v684_v32  ;;  %v713_v56 = vmul.f32 %v712_v36, %v708_v37  ;;  %v730_v57 = vmul.f32 %v729_v38, %v727_v48  ;;  %v778_v34 = vld [vmem:[#allocation3 + $0x92] sm:$0xff]  ;;  %v869_v36 = vstv %s2597_s12  ;;  %v797_v37 = vld [vmem:[#allocation3 + $0x42] sm:$0xff]  ;;  %s2777_s12 = sld [smem:[#allocation4 + $0x44]] }
 0x1eb   : > { %465 = vst.msk [vmem:[#allocation3 + $0x10] sm:$0xff] %vm450_vm5, %v459_v42  ;;  %v830_v38 = vmul.f32 %v829_v40, %v827_v9  ;;  %v780_v41 = vmul.f32 %v779_v47, %v777_v21  ;;  %v2685_v42 = vmul.f32 %v969_v50, %v967_v19  ;;  %v939_v40 = vstv %s2603_s23  ;;  %v867_v21 = vld [vmem:[#allocation3 + $0x43] sm:$0xff]  ;;  %s2784_s23 = sld [smem:[#allocation4 + $0x49]] }
 0x1ec   : > { %v714_v16 = vadd.f32 %v713_v56, %v694_v55  ;;  %v731_v17 = vadd.f32 %v730_v57, %v711_v3  ;;  %v802_v45 = vstv %s2611_s17  ;;  %v819_v48 = vstv %s2619_s16  ;;  %s2707_s16 = sld [smem:[#allocation4 + $0x39]]  ;;  %s2713_s17 = sld [smem:[#allocation4 + $0x40]] }
 0x1ed   : > { %v728_v63 = vld [vmem:[#allocation3 + $0xb1] sm:$0xff]  ;;  %v485_v1 = vpop.permute.xlu1 %484  ;;  %v542_v2 = vpop.permute.xlu0 %541  ;;  %v747_v10 = vld [vmem:[#allocation3 + $0x61] sm:$0xff]  ;;  %v783_v53 = vmul.f32 %v782_v4, %v778_v34  ;;  %v800_v55 = vmul.f32 %v799_v35, %v797_v37  ;;  %v1029_v9 = vstv %s2648_s5  ;;  %v652_v34 = vstv %s2679_s1  ;;  %s2751_s1 = sld [smem:[#allocation4 + $0x42]]  ;;  %s2864_s5 = sld [smem:[#allocation4 + $0x5e]] }
 0x1ee   : > { %v733_v5 = vmul.f32 %v732_v49, %v728_v63  ;;  %491 = vst.msk [vmem:[#allocation3 + $0x30] sm:$0xff] %vm450_vm5, %v485_v1  ;;  %548 = vst.msk [vmem:[#allocation3 + $0x80] sm:$0xff] %vm450_vm5, %v542_v2  ;;  %v750_v20 = vmul.f32 %v749_v0, %v747_v10  ;;  %v798_v46 = vld [vmem:[#allocation3 + $0xb2] sm:$0xff]  ;;  %v2696_v49 = vmul.f32 %v1039_v51, %v1037_v31  ;;  %v817_v47 = vld [vmem:[#allocation3 + $0x62] sm:$0xff]  ;;  %v1009_v51 = vstv %s2609_s15  ;;  %s2851_s15 = sld [smem:[#allocation4 + $0x59]] }
 0x1ef   : > { %v822_v63 = vstv %s2633_s11  ;;  %v803_v1 = vmul.f32 %v802_v45, %v798_v46  ;;  %v820_v3 = vmul.f32 %v819_v48, %v817_v47  ;;  %s2721_s11 = sld [smem:[#allocation4 + $0x11]]  ;;  %v868_v35 = vld [vmem:[#allocation3 + $0xb3] sm:$0xff]  ;;  %v887_v37 = vld [vmem:[#allocation3 + $0x63] sm:$0xff]  ;;  %v769_v45 = vstv %s2700_s13  ;;  %s2833_s13 = sld [smem:[#allocation4 + $0x2e]] }
 0x1f0   : > { %v734_v30 = vadd.f32 %v733_v5, %v714_v16  ;;  %v751_v32 = vadd.f32 %v750_v20, %v731_v17  ;;  %v847_v5 = vld [vmem:[#allocation3 + $0x23] sm:$0xff]  ;;  %v892_v17 = vstv %s2654_s7  ;;  %v848_v20 = vld [vmem:[#allocation3 + $0x93] sm:$0xff] }
 0x1f1   : > { %v748_v25 = vld [vmem:[#allocation3 + $0xd1] sm:$0xff]  ;;  %v568_v27 = vpop.permute.xlu1 %567  ;;  %v511_v28 = vpop.permute.xlu0 %510  ;;  %v853_v47 = vmul.f32 %v852_v15, %v848_v20  ;;  %v873_v15 = vmul.f32 %v872_v58, %v868_v35 }
 0x1f2   : > { %v753_v33 = vmul.f32 %v752_v11, %v748_v25  ;;  %574 = vst.msk [vmem:[#allocation3 + $0xa0] sm:$0xff] %vm450_vm5, %v568_v27  ;;  %517 = vst.msk [vmem:[#allocation3 + $0x50] sm:$0xff] %vm450_vm5, %v511_v28  ;;  %v761_v43 = vadd.f32 %v760_v24, %v751_v32  ;;  %v818_v0 = vld [vmem:[#allocation3 + $0xd2] sm:$0xff]  ;;  %v962_v24 = vstv %s2656_s24  ;;  %v629_v25 = vstv %s2663_s14  ;;  %s2810_s24 = sld [smem:[#allocation4 + $0x50]]  ;;  %s2812_s14 = sld [smem:[#allocation4 + $0x21]] }
 0x1f3   : > { %v823_v19 = vmul.f32 %v822_v63, %v818_v0  ;;  %v649_v27 = vstv %s2665_s27  ;;  %v632_v28 = vstv %s2677_s30  ;;  %v702_v63 = vstv %s2707_s16  ;;  %s2753_s27 = sld [smem:[#allocation4 + $0x3d]]  ;;  %s2822_s30 = sld [smem:[#allocation4 + $0x24]] }
 0x1f4   : > { %v754_v44 = vadd.f32 %v753_v33, %v734_v30  ;;  %v781_v56 = vadd.f32 %v780_v41, %v761_v43  ;;  %v850_v30 = vmul.f32 %v849_v54, %v847_v5  ;;  %v669_v41 = vstv %s2687_s26  ;;  %s2824_s26 = sld [smem:[#allocation4 + $0x55]]  ;;  %s2835_s16 = sld [smem:[#allocation4 + $0x5f]] }
 0x1f5   : > { %v594_v50 = vpop.permute.xlu1 %593  ;;  %v461_v52 = vpop.permute.xlu0 %460  ;;  %v647_v33 = vld [vmem:[#allocation3 + $0x30] sm:$0xff]  ;;  %v672_v43 = vstv %s2689_s29  ;;  %v870_v54 = vmul.f32 %v869_v36, %v867_v21  ;;  %v772_v0 = vstv %s2713_s17  ;;  %s2767_s29 = sld [smem:[#allocation4 + $0x47]]  ;;  %s2841_s17 = sld [smem:[#allocation4 + $0x2b]] }
 0x1f6   : > { %v764_v57 = vadd.f32 %v2626_v7, %v754_v44  ;;  %600 = vst.msk [vmem:[#allocation3 + $0xc0] sm:$0xff] %vm450_vm5, %v594_v50  ;;  %v801_v2 = vadd.f32 %v800_v55, %v781_v56  ;;  %v889_v7 = vstv %s2630_s0  ;;  %v699_v44 = vstv %s2698_s4  ;;  %v888_v56 = vld [vmem:[#allocation3 + $0xd3] sm:$0xff]  ;;  %s2803_s0 = sld [smem:[#allocation4 + $0x1f]]  ;;  %s2831_s4 = sld [smem:[#allocation4 + $0x52]] }
 0x1f7   : > { %466 = vst.msk [vmem:[#allocation3 + $0x18] sm:$0x3f] %vm452_vm6, %v461_v52  ;;  %v627_v52 = vld [vmem:[#allocation3 + $0x10] sm:$0xff] }
 0x1f8   : > { %v784_v4 = vadd.f32 %v783_v53, %v764_v57  ;;  %v821_v16 = vadd.f32 %v820_v3, %v801_v2  ;;  %v650_v57 = vmul.f32 %v649_v27, %v647_v33  ;;  %v890_v2 = vmul.f32 %v889_v7, %v887_v37  ;;  %v628_v3 = vld [vmem:[#allocation3 + $0x80] sm:$0xff]  ;;  %v918_v7 = vld [vmem:[#allocation3 + $0x94] sm:$0xff] }
 0x1f9   : > { %v544_v10 = vpop.permute.xlu1 %543  ;;  %v487_v11 = vpop.permute.xlu0 %486  ;;  %v648_v53 = vld [vmem:[#allocation3 + $0xa0] sm:$0xff]  ;;  %v667_v55 = vld [vmem:[#allocation3 + $0x50] sm:$0xff]  ;;  %v633_v33 = vmul.f32 %v632_v28, %v628_v3 }
 0x1fa   : > { %v804_v18 = vadd.f32 %v803_v1, %v784_v4  ;;  %549 = vst.msk [vmem:[#allocation3 + $0x88] sm:$0x3f] %vm452_vm6, %v544_v10  ;;  %492 = vst.msk [vmem:[#allocation3 + $0x38] sm:$0x3f] %vm452_vm6, %v487_v11  ;;  %v831_v31 = vadd.f32 %v830_v38, %v821_v16  ;;  %v719_v1 = vstv %s2715_s22  ;;  %v917_v10 = vld [vmem:[#allocation3 + $0x24] sm:$0xff]  ;;  %v630_v11 = vmul.f32 %v629_v25, %v627_v52  ;;  %s2845_s22 = sld [smem:[#allocation4 + $0x57]] }
 0x1fb   : > { %v653_v16 = vmul.f32 %v652_v34, %v648_v53 }
 0x1fc   : > { %v824_v32 = vadd.f32 %v823_v19, %v804_v18  ;;  %v851_v38 = vadd.f32 %v850_v30, %v831_v31  ;;  %v670_v18 = vmul.f32 %v669_v41, %v667_v55  ;;  %v789_v19 = vstv %s2721_s11  ;;  %v958_v55 = vld [vmem:[#allocation3 + $0xd4] sm:$0xff]  ;;  %s2859_s11 = sld [smem:[#allocation4 + $0x5c]] }
 0x1fd   : > { %v570_v46 = vpop.permute.xlu1 %569  ;;  %v513_v48 = vpop.permute.xlu0 %512  ;;  %v668_v4 = vld [vmem:[#allocation3 + $0xc0] sm:$0xff]  ;;  %v893_v30 = vmul.f32 %v892_v17, %v888_v56  ;;  %v722_v31 = vstv %s2726_s10  ;;  %v651_v25 = vadd.f32 %v650_v57, %v630_v11  ;;  %v920_v17 = vmul.f32 %v919_v60, %v917_v10  ;;  %s2861_s10 = sld [smem:[#allocation4 + $0x2d]] }
 0x1fe   : > { %v834_v50 = vadd.f32 %v2637_v12, %v824_v32  ;;  %575 = vst.msk [vmem:[#allocation3 + $0xa8] sm:$0x3f] %vm452_vm6, %v570_v46  ;;  %518 = vst.msk [vmem:[#allocation3 + $0x58] sm:$0x3f] %vm452_vm6, %v513_v48  ;;  %v871_v36 = vadd.f32 %v870_v54, %v851_v38  ;;  %v697_v5 = vld [vmem:[#allocation3 + $0x11] sm:$0xff]  ;;  %v937_v32 = vld [vmem:[#allocation3 + $0x44] sm:$0xff]  ;;  %v673_v34 = vmul.f32 %v672_v43, %v668_v4  ;;  %v739_v48 = vstv %s2735_s18 }
 0x1ff   : > { %v700_v35 = vmul.f32 %v699_v44, %v697_v5  ;;  %v654_v54 = vadd.f32 %v653_v16, %v633_v33  ;;  %v671_v38 = vadd.f32 %v670_v18, %v651_v25  ;;  %v923_v44 = vmul.f32 %v922_v22, %v918_v7  ;;  %v987_v33 = vld [vmem:[#allocation3 + $0x25] sm:$0xff]  ;;  %s2866_s18 = sld [smem:[#allocation4 + $0x2f]] }
 0x200   : > { %v854_v12 = vadd.f32 %v853_v47, %v834_v50  ;;  %v891_v21 = vadd.f32 %v890_v2, %v871_v36  ;;  %v938_v47 = vld [vmem:[#allocation3 + $0xb4] sm:$0xff]  ;;  %v940_v60 = vmul.f32 %v939_v40, %v937_v32  ;;  %v963_v16 = vmul.f32 %v962_v24, %v958_v55 }
 0x201   : > { %v596_v20 = vpop.permute.xlu1 %595  ;;  %v698_v58 = vld [vmem:[#allocation3 + $0x81] sm:$0xff]  ;;  %v717_v37 = vld [vmem:[#allocation3 + $0x31] sm:$0xff]  ;;  %v674_v56 = vadd.f32 %v673_v34, %v654_v54  ;;  %v701_v57 = vadd.f32 %v700_v35, %v671_v38  ;;  %v943_v40 = vmul.f32 %v942_v59, %v938_v47  ;;  %v1032_v24 = vstv %s2760_s9  ;;  %s2875_s9 = sld [smem:[#allocation4 + $0x61]] }
 0x202   : > { %v874_v27 = vadd.f32 %v873_v15, %v854_v12  ;;  %601 = vst.msk [vmem:[#allocation3 + $0xc8] sm:$0x3f] %vm452_vm6, %v596_v20  ;;  %v901_v41 = vadd.f32 %v2675_v39, %v891_v21  ;;  %v703_v28 = vmul.f32 %v702_v63, %v698_v58  ;;  %v720_v50 = vmul.f32 %v719_v1, %v717_v37  ;;  %v957_v39 = vld [vmem:[#allocation3 + $0x64] sm:$0xff]  ;;  %v767_v63 = vld [vmem:[#allocation3 + $0x12] sm:$0xff] }
 0x203   : > { %v792_v1 = vstv %s2751_s1  ;;  %v960_v12 = vmul.f32 %v959_v8, %v957_v39  ;;  %v770_v59 = vmul.f32 %v769_v45, %v767_v63  ;;  %v768_v18 = vld [vmem:[#allocation3 + $0x82] sm:$0xff]  ;;  %v787_v20 = vld [vmem:[#allocation3 + $0x32] sm:$0xff]  ;;  %v809_v21 = vstv %s2757_s2  ;;  %s2871_s1 = sld [smem:[#allocation4 + $0x30]] }
 0x204   : > { %v894_v46 = vadd.f32 %v893_v30, %v874_v27  ;;  %v921_v52 = vadd.f32 %v920_v17, %v901_v41  ;;  %v704_v3 = vadd.f32 %v703_v28, %v674_v56  ;;  %v721_v4 = vadd.f32 %v720_v50, %v701_v57  ;;  %v988_v34 = vld [vmem:[#allocation3 + $0x95] sm:$0xff]  ;;  %v838_v50 = vld [vmem:[#allocation3 + $0x83] sm:$0xff] }
 0x205   : > { %v718_v43 = vld [vmem:[#allocation3 + $0xa1] sm:$0xff]  ;;  %v737_v15 = vld [vmem:[#allocation3 + $0x51] sm:$0xff]  ;;  %v839_v25 = vstv %s2765_s8  ;;  %v842_v45 = vstv %s2767_s29  ;;  %v773_v35 = vmul.f32 %v772_v0, %v768_v18  ;;  %v790_v37 = vmul.f32 %v789_v19, %v787_v20  ;;  %s2879_s8 = sld [smem:[#allocation4 + $0x60]]  ;;  %s2056_s29 = smov 0  }
 0x206   : > { %v904_v53 = vadd.f32 %v2641_v13, %v894_v46  ;;  %v723_v22 = vmul.f32 %v722_v31, %v718_v43  ;;  %v941_v36 = vadd.f32 %v940_v60, %v921_v52  ;;  %v742_v13 = vstv %s2753_s27  ;;  %v788_v30 = vld [vmem:[#allocation3 + $0xa2] sm:$0xff]  ;;  %v807_v31 = vld [vmem:[#allocation3 + $0x52] sm:$0xff] }
 0x207   : > { %v740_v5 = vmul.f32 %v739_v48, %v737_v15  ;;  %v837_v46 = vld [vmem:[#allocation3 + $0x13] sm:$0xff]  ;;  %v859_v48 = vstv %s2775_s20  ;;  %v793_v47 = vmul.f32 %v792_v1, %v788_v30  ;;  %v810_v54 = vmul.f32 %v809_v21, %v807_v31  ;;  %v1007_v56 = vld [vmem:[#allocation3 + $0x45] sm:$0xff] }
 0x208   : > { %v924_v2 = vadd.f32 %v923_v44, %v904_v53  ;;  %v961_v8 = vadd.f32 %v960_v12, %v941_v36  ;;  %v724_v27 = vadd.f32 %v723_v22, %v704_v3  ;;  %v812_v38 = vstv %s2777_s12  ;;  %v857_v43 = vld [vmem:[#allocation3 + $0x33] sm:$0xff]  ;;  %v1027_v18 = vld [vmem:[#allocation3 + $0x65] sm:$0xff] }
 0x209   : > { %v738_v10 = vld [vmem:[#allocation3 + $0xc1] sm:$0xff]  ;;  %v741_v58 = vadd.f32 %v740_v5, %v721_v4  ;;  %v990_v52 = vmul.f32 %v989_v61, %v987_v33  ;;  %v993_v39 = vmul.f32 %v992_v23, %v988_v34  ;;  %v909_v53 = vstv %s2782_s19  ;;  %v907_v12 = vld [vmem:[#allocation3 + $0x14] sm:$0xff] }
 0x20a   : > { %v944_v11 = vadd.f32 %v943_v40, %v924_v2  ;;  %v743_v7 = vmul.f32 %v742_v13, %v738_v10  ;;  %v808_v28 = vld [vmem:[#allocation3 + $0xc2] sm:$0xff]  ;;  %v971_v0 = vadd.f32 %v2685_v42, %v961_v8  ;;  %v862_v55 = vstv %s2784_s23  ;;  %v1008_v42 = vld [vmem:[#allocation3 + $0xb5] sm:$0xff] }
 0x20b   : > { %v771_v17 = vadd.f32 %v770_v59, %v741_v58  ;;  %v840_v57 = vmul.f32 %v839_v25, %v837_v46  ;;  %v813_v1 = vmul.f32 %v812_v38, %v808_v28  ;;  %v843_v22 = vmul.f32 %v842_v45, %v838_v50  ;;  %v858_v23 = vld [vmem:[#allocation3 + $0xa3] sm:$0xff]  ;;  %v877_v40 = vld [vmem:[#allocation3 + $0x53] sm:$0xff] }
 0x20c   : > { %v964_v32 = vadd.f32 %v963_v16, %v944_v11  ;;  %v744_v41 = vadd.f32 %v743_v7, %v724_v27  ;;  %v860_v61 = vmul.f32 %v859_v48, %v857_v43  ;;  %v879_v15 = vstv %s2794_s28  ;;  %v878_v5 = vld [vmem:[#allocation3 + $0xc3] sm:$0xff]  ;;  %v1028_v20 = vld [vmem:[#allocation3 + $0xd5] sm:$0xff] }
 0x20d   : > { %v791_v44 = vadd.f32 %v790_v37, %v771_v17  ;;  %v882_v36 = vstv %s2796_s21  ;;  %v991_v2 = vadd.f32 %v990_v52, %v971_v0  ;;  %v1010_v10 = vmul.f32 %v1009_v51, %v1007_v56  ;;  %v908_v51 = vld [vmem:[#allocation3 + $0x84] sm:$0xff]  ;;  %v927_v31 = vld [vmem:[#allocation3 + $0x34] sm:$0xff] }
 0x20e   : > { %v974_v19 = vadd.f32 %v2643_v14, %v964_v32  ;;  %v774_v60 = vadd.f32 %v773_v35, %v744_v41  ;;  %v1013_v11 = vmul.f32 %v1012_v6, %v1008_v42  ;;  %v912_v16 = vstv %s2801_s25  ;;  %v928_v33 = vld [vmem:[#allocation3 + $0xa4] sm:$0xff]  ;;  %v947_v35 = vld [vmem:[#allocation3 + $0x54] sm:$0xff] }
 0x20f   : > { %v811_v14 = vadd.f32 %v810_v54, %v791_v44  ;;  %v929_v59 = vstv %s2803_s0  ;;  %v863_v21 = vmul.f32 %v862_v55, %v858_v23  ;;  %v880_v27 = vmul.f32 %v879_v15, %v877_v40  ;;  %v977_v0 = vld [vmem:[#allocation3 + $0x15] sm:$0xff]  ;;  %v948_v43 = vld [vmem:[#allocation3 + $0xc4] sm:$0xff] }
 0x210   : > { %v794_v63 = vadd.f32 %v793_v47, %v774_v60  ;;  %v994_v13 = vadd.f32 %v993_v39, %v974_v19  ;;  %v910_v58 = vmul.f32 %v909_v53, %v907_v12  ;;  %v932_v6 = vstv %s2810_s24  ;;  %v978_v52 = vld [vmem:[#allocation3 + $0x85] sm:$0xff]  ;;  %v997_v39 = vld [vmem:[#allocation3 + $0x35] sm:$0xff] }
 0x211   : > { %v841_v3 = vadd.f32 %v840_v57, %v811_v14  ;;  %v949_v7 = vstv %s2812_s14  ;;  %v883_v32 = vmul.f32 %v882_v36, %v878_v5  ;;  %v1011_v25 = vadd.f32 %v1010_v10, %v991_v2  ;;  %v998_v2 = vld [vmem:[#allocation3 + $0xa5] sm:$0xff]  ;;  %v1017_v12 = vld [vmem:[#allocation3 + $0x55] sm:$0xff] }
 0x212   : > { %v814_v4 = vadd.f32 %v813_v1, %v794_v63  ;;  %v1014_v45 = vadd.f32 %v1013_v11, %v994_v13  ;;  %v1030_v17 = vmul.f32 %v1029_v9, %v1027_v18  ;;  %v1033_v41 = vmul.f32 %v1032_v24, %v1028_v20  ;;  %v1057_v63 = vld [vmem:[#allocation3 + $0x26] sm:$0xff]  ;;  %v1058_v1 = vld [vmem:[#allocation3 + $0x96] sm:$0xff] }
 0x213   : > { %v861_v8 = vadd.f32 %v860_v61, %v841_v3  ;;  %v979_v46 = vstv %s2822_s30  ;;  %v982_v48 = vstv %s2824_s26  ;;  %v913_v47 = vmul.f32 %v912_v16, %v908_v51  ;;  %v1047_v10 = vld [vmem:[#allocation3 + $0x16] sm:$0xff] }
 0x214   : > { %v844_v30 = vadd.f32 %v843_v22, %v814_v4  ;;  %v930_v54 = vmul.f32 %v929_v59, %v927_v31  ;;  %v999_v19 = vstv %s2827_s3  ;;  %v933_v9 = vmul.f32 %v932_v6, %v928_v33  ;;  %v1018_v59 = vld [vmem:[#allocation3 + $0xc5] sm:$0xff] }
 0x215   : > { %v881_v34 = vadd.f32 %v880_v27, %v861_v8  ;;  %v950_v24 = vmul.f32 %v949_v7, %v947_v35  ;;  %v952_v50 = vstv %s2831_s4  ;;  %v1031_v44 = vadd.f32 %v1030_v17, %v1011_v25  ;;  %v1077_v27 = vld [vmem:[#allocation3 + $0x46] sm:$0xff]  ;;  %v1067_v7 = vld [vmem:[#allocation3 + $0x36] sm:$0xff] }
 0x216   : > { %v864_v37 = vadd.f32 %v863_v21, %v844_v30  ;;  %v1034_v60 = vadd.f32 %v1033_v41, %v1014_v45  ;;  %v1079_v56 = vstv %s2833_s13  ;;  %v1082_v42 = vstv %s2835_s16  ;;  %v1078_v30 = vld [vmem:[#allocation3 + $0xb6] sm:$0xff]  ;;  %v1048_v6 = vld [vmem:[#allocation3 + $0x86] sm:$0xff] }
 0x217   : > { %v911_v38 = vadd.f32 %v910_v58, %v881_v34  ;;  %v1049_v57 = vstv %s2841_s17  ;;  %v1002_v14 = vstv %s2845_s22  ;;  %v980_v22 = vmul.f32 %v979_v46, %v977_v0  ;;  %v1068_v34 = vld [vmem:[#allocation3 + $0xa6] sm:$0xff]  ;;  %v1087_v35 = vld [vmem:[#allocation3 + $0x56] sm:$0xff] }
 0x218   : > { %v884_v28 = vadd.f32 %v883_v32, %v864_v37  ;;  %v953_v15 = vmul.f32 %v952_v50, %v948_v43  ;;  %v983_v40 = vmul.f32 %v982_v48, %v978_v52  ;;  %v1000_v36 = vmul.f32 %v999_v19, %v997_v39  ;;  %v1097_v48 = vld [vmem:[#allocation3 + $0x66] sm:$0xff]  ;;  %v1098_v19 = vld [vmem:[#allocation3 + $0xd6] sm:$0xff] }
 0x219   : > { %v931_v53 = vadd.f32 %v930_v54, %v911_v38  ;;  %v1019_v13 = vstv %s2849_s6  ;;  %v1022_v3 = vstv %s2851_s15  ;;  %v1041_v4 = vadd.f32 %v2696_v49, %v1031_v44  ;;  %v1088_v43 = vld [vmem:[#allocation3 + $0xc6] sm:$0xff] }
 0x21a   : > { %v914_v55 = vadd.f32 %v913_v47, %v884_v28  ;;  %v1044_v5 = vadd.f32 %v2660_v26, %v1034_v60  ;;  %v1060_v18 = vmul.f32 %v1059_v62, %v1057_v63  ;;  %v1063_v20 = vmul.f32 %v1062_v29, %v1058_v1 }
 0x21b   : > { %v951_v61 = vadd.f32 %v950_v24, %v931_v53  ;;  %v1052_v21 = vstv %s2859_s11  ;;  %v1069_v8 = vstv %s2861_s10  ;;  %v1003_v58 = vmul.f32 %v1002_v14, %v998_v2 }
 0x21c   : > { %v934_v23 = vadd.f32 %v933_v9, %v914_v55  ;;  %v1020_v31 = vmul.f32 %v1019_v13, %v1017_v12  ;;  %v1050_v26 = vmul.f32 %v1049_v57, %v1047_v10  ;;  %v1072_v32 = vstv %s2864_s5 }
 0x21d   : > { %v981_v11 = vadd.f32 %v980_v22, %v951_v61  ;;  %v1089_v25 = vstv %s2866_s18  ;;  %v1023_v45 = vmul.f32 %v1022_v3, %v1018_v59  ;;  %v1061_v33 = vadd.f32 %v1060_v18, %v1041_v4 }
 0x21e   : > { %v954_v16 = vadd.f32 %v953_v15, %v934_v23  ;;  %v1064_v62 = vadd.f32 %v1063_v20, %v1044_v5  ;;  %v1080_v17 = vmul.f32 %v1079_v56, %v1077_v27  ;;  %v1083_v41 = vmul.f32 %v1082_v42, %v1078_v30 }
 0x21f   : > { %v1001_v51 = vadd.f32 %v1000_v36, %v981_v11  ;;  %v1099_v46 = vstv %s2871_s1  ;;  %v1053_v47 = vmul.f32 %v1052_v21, %v1048_v6  ;;  %v1070_v54 = vmul.f32 %v1069_v8, %v1067_v7 }
 0x220   : > { %v984_v49 = vadd.f32 %v983_v40, %v954_v16  ;;  %v1102_v0 = vstv %s2875_s9  ;;  %v1073_v9 = vmul.f32 %v1072_v32, %v1068_v34  ;;  %v1090_v24 = vmul.f32 %v1089_v25, %v1087_v35 }
 0x221   : > { %v1021_v29 = vadd.f32 %v1020_v31, %v1001_v51  ;;  %v1092_v50 = vstv %s2879_s8  ;;  %v1081_v44 = vadd.f32 %v1080_v17, %v1061_v33  ;;  %v1084_v60 = vadd.f32 %v1083_v41, %v1064_v62 }
 0x222   : > { %v1004_v37 = vadd.f32 %v1003_v58, %v984_v49  ;;  %v1100_v53 = vmul.f32 %v1099_v46, %v1097_v48  ;;  %v1103_v55 = vmul.f32 %v1102_v0, %v1098_v19  ;;  %v1093_v57 = vmul.f32 %v1092_v50, %v1088_v43 }
 0x223   : > { %v1051_v38 = vadd.f32 %v1050_v26, %v1021_v29 }
 0x224   : > { %v1024_v28 = vadd.f32 %v1023_v45, %v1004_v37  ;;  %v1101_v14 = vadd.f32 %v1100_v53, %v1081_v44  ;;  %v1104_v63 = vadd.f32 %v1103_v55, %v1084_v60 }
 0x225   : > { %v1071_v52 = vadd.f32 %v1070_v54, %v1051_v38 }
 0x226   : > { %v1054_v39 = vadd.f32 %v1053_v47, %v1024_v28 }
 0x227   : > { %v1091_v56 = vadd.f32 %v1090_v24, %v1071_v52 }
 0x228   : > { %v1074_v42 = vadd.f32 %v1073_v9, %v1054_v39 }
 0x229   : > { %v1105_v22 = vadd.f32 %v1101_v14, %v1091_v56 }
 0x22a   : > { %v1094_v1 = vadd.f32 %v1093_v57, %v1074_v42 }
 0x22c   : > { %v1106_v61 = vadd.f32 %v1104_v63, %v1094_v1 }
 0x22e   : > { %v1107_v23 = vadd.f32 %v1106_v61, %v1105_v22 }
 0x230   : > { %v1459_v15 = vmul.f32 -1.442695, %v1107_v23 }
 0x232   : > { %1707 = vpow2.f32 %v1459_v15 }
 0x23c   : > { %v1708_v40 = vpop.eup %1707 }
 0x23d   : > { %v1111_v36 = vadd.f32 1.0, %v1708_v40 }
 0x23f   : > { %1709 = vrcp.f32 %v1111_v36 }
 0x249   : > { %v1710_v2 = vpop.eup %1709 }
 0x24a LB: >> { %s3092_s20 = sld [smem:[#allocation38_spill]]  ;;  %s3093_s12 = sld [smem:[#allocation39_spill]]  ;;  %s2058_s29 = sphi %s2056_s29, %s1119_s29  }
 0x24b   : >> { %s1460_s19 = sshll.u32 %s2058_s29, 3  ;;  %s1119_s29 = sadd.s32 1, %s2058_s29  }
 0x24c   : >> { %p1116_p3 = scmp.ge.s32.totalorder %s1119_s29, 4  }
 0x24d   : > { %s3094_s21 = sld [smem:[#allocation26_spill]] (%p1116_p3)  ;;  %s3095_s25 = sld [smem:[#allocation25_spill]] (%p1116_p3) }
 0x24e   : > { %1118 = sbr.rel (!%p1116_p3) target bundleno = 586 (0x24a), region = 190  ;;  %s3096_s0 = sld [smem:[#allocation39_spill]] (%p1116_p3) }
 0x24f   : > { %s3097_s7 = sld [smem:[#allocation37_spill]] (%p1116_p3)  ;;  %s3098_s24 = sld [smem:[#allocation35_spill]] (%p1116_p3) }
 0x250   : >> { %s1121_s23 = scalar_lea.vmem %s3092_s20, %s1460_s19  ;;  %s1124_s28 = scalar_lea.vmem %s3093_s12, %s1460_s19 }
 0x251   : >> { %v1122_v13 = vld [vmem:[%s1121_s23] sm:$0xff]  ;;  %s3099_s16 = sld [smem:[#allocation47_spill]] (%p1116_p3)  ;;  %s2075_s11 = smov (%p1116_p3), [#allocation12]  }
 0x252   : >> { %v1123_v12 = vmul.f32 %v1710_v2, %v1122_v13  ;;  %s1820_s10 = sshll.u32 (%p1116_p3), %s2075_s11, 4  ;;  %s1821_s10 = int_to_ptr.vmem [resolvable:$false] %s1820_s10 }
 0x253   : > { %s1462_s14 = sshll.u32 (%p1116_p3), %s3094_s21, 3  ;;  %s1822_s5 = scalar_lea.vmem (%p1116_p3), %s1821_s10, 1024 }
 0x254   : >> { %1125 = vst.msk [vmem:[%s1124_s28] sm:$0xff] %vm450_vm5, %v1123_v12  ;;  %s1138_s30 = sadd.s32 (%p1116_p3), %s3095_s25, %s1462_s14  ;;  %s1141_s26 = sshll.u32 (%p1116_p3), %s3096_s0, 4  ;;  %s2900_s26 = int_to_ptr.vmem [resolvable:$true] %s1141_s26 }
 0x255   : > { %s1463_s3 = sshll.u32 %s1138_s30, 7  ;;  %s1127_s22 = scalar_lea.sflag [#allocation6], %s3097_s7 }
 0x256   : > { %s1816_s15 = scalar_lea.vmem %s2900_s26, 512  ;;  %p3101_p13 = scmp.ne.s32.totalorder %s3098_s24, 0 }
 0x257   : > { %s3100_s6 = smov %s3099_s16  ;;  %s2905_s17 = scalar_lea.hbm %s3099_s16, %s1463_s3 }
 0x258   : > { %p1817_p11 = scmp.ne.s32.totalorder %s2900_s26, %s1816_s15  ;;  %p1823_p10 = scmp.lt.s32.totalorder %s2900_s26, %s1821_s10 }
 0x259   : > { %p1824_p7 = scmp.lt.s32.totalorder %s1822_s5, %s1816_s15 }
 0x25a   : > { %p1818_p5 = pnand %p1817_p11, %p3101_p13 }
 0x25b   : > { %p1825_p2 = por %p1824_p7, %p1823_p10 }
 0x25c   : > { %p1819_p12 = pneg %p1818_p5 }
 0x25e   : > { %p1826_p6 = pnand %p1825_p2, %p1819_p12 }
 0x260   : > { %1829 = shalt.err (!%p1826_p6)
}
 0x261   : > { %s1830_s18 = scalar_lea.hbm %s2905_s17, 512  ;;  %s1834_s2 = scalar_lea.hbm %s3100_s6, 2048 }
 0x262   : > { %p1831_p4 = scmp.ne.s32.totalorder %s2905_s17, %s1830_s18  ;;  %p1835_p8 = scmp.lt.u32.totalorder %s2905_s17, %s3100_s6 }
 0x263   : > { %p1836_p9 = scmp.lt.u32.totalorder %s1834_s2, %s1830_s18  ;;  %p1838_p11 = scmp.lt.u32.totalorder %s1830_s18, %s2905_s17 }
 0x264   : > { %p1832_p0 = pnand %p1831_p4, %p3101_p13 }
 0x265   : > { %p1837_p3 = por %p1836_p9, %p1835_p8 }
 0x266   : > { %p1833_p1 = pneg %p1832_p0 }
 0x267   : > { %p1839_p5 = por %p1838_p11, %p1837_p3 }
 0x269   : > { %p1840_p12 = pnand %p1839_p5, %p1833_p1 }
 0x26b   : > { %1843 = shalt.err (!%p1840_p12)
}
 0x26c   : > { %s2076_s29 = smov 128   ;;  %s2077_s20 = smov 256  }
 0x26d   : > { %s2078_s12 = smov 8  }
 0x26e   : > { %1476 = dma.vmem_to_hbm [thread:$0]  (%p3101_p13), %s2900_s26, 512, %s2905_s17, %s1127_s22, %s2076_s29, %s2077_s20, %s2078_s12  }
 0x26f PF: > { %s3102_s19 = sld [smem:[#allocation29_spill]]  ;;  %s3103_s23 = sld [smem:[#allocation22_spill]] }
 0x270   : > { %s3104_s28 = sld [smem:[#allocation33_spill]] }
 0x275   : > { %p1499_p10 = scmp.ge.s32.totalorder %s3102_s19, 2  ;;  %s1156_s21 = sand.u32 1, %s3103_s23  }
 0x276   : > { %p3105_p7 = scmp.ne.s32.totalorder %s3104_s28, 0  ;;  %s1157_s25 = scalar_lea.sflag [#allocation6], %s1156_s21 }
 0x278   : > { %p1493_p2 = pnand %p1499_p10, %p3105_p7 }
 0x27a   : > { %1957 = dma.done.wait (!%p1493_p2), %s1157_s25, 512  }
 0x27b   : > { %1959 = vsyncadd (!%p1493_p2), %s1157_s25, 4294966784  ;;  %s24_s28 = sadd.s32 1, %s3102_s19   ;;  %s3107_s15 = sld [smem:[#allocation18_spill]] }
 0x27c   : > { %p2936_p6 = scmp.ge.s32.totalorder %s24_s28, 6   ;;  %s3108_s16 = sld [smem:[#allocation19_spill]] }
 0x27d   : > { %s3109_s17 = sld [smem:[#allocation36_spill]]  ;;  %s3110_s18 = sld [smem:[#allocation20_spill]] }
 0x27e   : > { %s3111_s19 = sld [smem:[#allocation21_spill]]  ;;  %s3112_s20 = sld [smem:[#allocation32_spill]] }
 0x27f   : > { %s3113_s21 = sld [smem:[#allocation23_spill]]  ;;  %s3114_s22 = sld [smem:[#allocation24_spill]] }
 0x280   : > { %s3115_s23 = sld [smem:[#allocation34_spill]]  ;;  %s3116_s24 = sld [smem:[#allocation27_spill]] }
 0x281   : > { %s3117_s25 = sld [smem:[#allocation28_spill]]  ;;  %s3118_s26 = sld [smem:[#allocation30_spill]] }
 0x282   : > { %s3119_s27 = sld [smem:[#allocation31_spill]]  ;;  %23 = sbr.rel (!%p2936_p6) target bundleno = 19 (0x13), region = 201 }
 0x289   :  { %1162 = vsyncpa [#allocation5], 1 }
 0x28a   :  { %1164 = vsyncpa [#allocation5 + $0x1], 1 }
 0x28b   :  { %1165 = vsyncpa [#allocation10], 1 }
 0x28c   :  { %1167 = vsyncpa [#allocation10 + $0x1], 1 }
 0x28d   :  { %1168 = vsyncpa [#allocation6], 1 }
 0x28e   :  { %1170 = vsyncpa [#allocation6 + $0x1], 1 }
 0x28f   :  { %1171 = vsyncpa [#allocation7], 1 }
 0x290   :  { %1173 = vsyncpa [#allocation7 + $0x1], 1 }

</bundles_post_ra>
